<compile_context>
chip_gen: v6e
topology: v6e:2x2x1
jax: 0.10.0
libtpu: 0.0.40
codegen_flags: <defaults>
</compile_context>

<pallas_src>
import functools

import jax
import jax.numpy as jnp
from jax.experimental import pallas as pl
from jax.experimental.pallas import tpu as pltpu

LANE = 128  # pad every encoder channel dim to the 128-lane vreg width


def _elementwise_dtype():
    """bf16 elementwise only on chips with a bf16 VALU (v6e/v7x); f32 on v5e-."""
    try:
        kind = jax.devices()[0].device_kind.lower()
    except Exception:
        return jnp.float32
    if any(tag in kind for tag in ("v6", "v7", "7x")):
        return jnp.bfloat16
    return jnp.float32


# ----------------------------------------------------------------------------- #
# Fused encoder kernel (stem + all gated blocks + partial GAP)
# ----------------------------------------------------------------------------- #
def _fused_encoder_kernel(gsum_ref, x_ref, sw_ref, sb_ref, fw_ref, fb_ref,
                          rw_ref, rb_ref, feat_ref, pool_ref,
                          *, num_per_block, c_last, compute_dtype):
    """One (sample, row-tile) grid point; no cross-iteration state (fully parallel).

    gsum_ref : SMEM (num_blocks,) f32            -- g0+g1 per block (g0 folded into conv2)
    x_ref    : VMEM (tm, C) f32                  -- UNPADDED input rows
    sw_ref   : VMEM (C, LANE) f32, sb_ref (1, LANE) f32   -- stem (VPU FMAs)
    fw_ref   : VMEM (L, LANE, 2*LANE) bf16, fb_ref (L, 1, 2*LANE) f32
               -- per-layer [downsample | first-conv] packed along N
    rw_ref   : VMEM (R, LANE, LANE) bf16, rb_ref (R, 1, LANE) f32
               -- remaining block convs (conv2 pre-scaled by gate g0)
    feat_ref : VMEM (tm, c_last) f32             -- backbone feature rows (out)
    pool_ref : VMEM (1, 8, LANE) f32             -- per-tile partial GAP sums (out)
    """
    cdt = compute_dtype
    cin = x_ref.shape[1]

    # ---- stem: tiny-C 1x1 conv as C vector FMAs (input stays unpadded in HBM) ----
    x = x_ref[...]                                           # (tm, C) f32
    sw = sw_ref[...]                                         # (C, LANE) f32
    acc = x[:, 0:1] * sw[0:1, :]                             # (tm,1)*(1,LANE)->(tm,LANE)
    for c in range(1, cin):
        acc = acc + x[:, c:c + 1] * sw[c:c + 1, :]
    feat = jnp.maximum(acc + sb_ref[...], 0.0).astype(cdt)   # (tm, LANE)

    rest_idx = 0
    block_count = 0
    for layer_idx, nblocks in enumerate(num_per_block):
        for block_idx in range(nblocks):
            feat_lo = feat.astype(jnp.bfloat16)              # no-op when cdt is bf16
            if block_idx == 0:
                # downsample + first conv share the same input -> one fused
                # (LANE, 2*LANE) MXU matmul; split the result along lanes.
                both = (jnp.dot(feat_lo, fw_ref[layer_idx],
                                preferred_element_type=jnp.float32).astype(cdt)
                        + fb_ref[layer_idx].astype(cdt))     # (tm, 2*LANE)
                identity = both[:, :LANE]                    # ds(feat), no relu
                h = jnp.maximum(both[:, LANE:], 0.0)         # relu(conv1(feat))
            else:
                # identity reuses the live value (no extra HBM read).  Note: at
                # large tm it does NOT stay purely in registers; the compiler
                # spills to VMEM as needed.
                identity = feat
                h = jnp.maximum(
                    jnp.dot(feat_lo, rw_ref[rest_idx],
                            preferred_element_type=jnp.float32).astype(cdt)
                    + rb_ref[rest_idx].astype(cdt), 0.0)
                rest_idx += 1
            # second conv of the block; weight/bias pre-scaled by gate g0 in the
            # wrapper, so no per-tile g0 multiply here.
            block_out = (jnp.dot(h.astype(jnp.bfloat16), rw_ref[rest_idx],
                                 preferred_element_type=jnp.float32).astype(cdt)
                         + rb_ref[rest_idx].astype(cdt))
            rest_idx += 1
            gsum = gsum_ref[block_count].astype(cdt)         # g0 + g1 (SMEM scalar)
            # relu(g0*block(feat) + (g0+g1)*identity) == original gated update
            feat = jnp.maximum(block_out + gsum * identity, 0.0)
            block_count += 1

    feat_f32 = feat.astype(jnp.float32)
    # backbone features: only the real c_last channels are written back (no padded
    # 128-lane slab, no wrapper slice afterwards).
    feat_ref[...] = feat_f32[:, :c_last]
    # per-tile partial GAP sums; finalize (/HW) + classification head run in the
    # wrapper so both grid axes stay 'parallel' (megacore-safe for small batch).
    col_sum = jnp.sum(feat_f32, axis=0, keepdims=True)       # (1, LANE)
    pool_ref[...] = jnp.broadcast_to(col_sum.reshape(1, 1, LANE), (1, 8, LANE))


def fused_encoder_forward(x_rows, stem_w, stem_b, fused_w, fused_b, rest_w, rest_b,
                          gsum, *, batch, hw, num_per_block, c_last,
                          compute_dtype, tile_cap=2048):
    """Whole gated encoder + partial GAP in ONE pallas_call.

    Returns (feat (B*HW, c_last) f32, pooled (B, LANE) f32 == mean over H*W).
    """
    m, cin = x_rows.shape
    assert m == batch * hw
    assert hw % 8 == 0, "H*W must be a multiple of 8 for (8,128) tiling"
    n_layers = fused_w.shape[0]
    n_rest = rest_w.shape[0]

    # Row-tile size: largest multiple-of-8 divisor of H*W, capped.  Bigger tiles
    # amortize the ~0.35us per-grid-step overhead; ~6 MiB of live intermediates
    # per 2048 rows keeps us far under the 32 MiB scoped VMEM limit (and v7x's
    # 64 MiB physical VMEM).
    tm = min(hw, tile_cap)
    tm -= tm % 8
    while hw % tm != 0:
        tm -= 8
    num_tiles = hw // tm

    kernel = functools.partial(
        _fused_encoder_kernel,
        num_per_block=tuple(num_per_block),
        c_last=c_last,
        compute_dtype=compute_dtype,
    )

    feat, pool = pl.pallas_call(
        kernel,
        out_shape=(
            jax.ShapeDtypeStruct((m, c_last), jnp.float32),
            jax.ShapeDtypeStruct((batch * num_tiles, 8, LANE), jnp.float32),
        ),
        grid_spec=pltpu.PrefetchScalarGridSpec(
            num_scalar_prefetch=0,
            grid=(batch, num_tiles),
            in_specs=[
                # per-block gsum scalars live in SMEM
                pl.BlockSpec(memory_space=pltpu.MemorySpace.SMEM),
                # UNPADDED input row tile of one sample (tm*C*4 B per tile)
                pl.BlockSpec((tm, cin), lambda b, t: (b * num_tiles + t, 0)),
                # weights/biases: constant index_map -> DMA'd once, resident across
                # the whole grid (the redundant 2nd buffer is only ~0.4 MiB).
                pl.BlockSpec((cin, LANE), lambda b, t: (0, 0)),
                pl.BlockSpec((1, LANE), lambda b, t: (0, 0)),
                pl.BlockSpec((n_layers, LANE, 2 * LANE), lambda b, t: (0, 0, 0)),
                pl.BlockSpec((n_layers, 1, 2 * LANE), lambda b, t: (0, 0, 0)),
                pl.BlockSpec((n_rest, LANE, LANE), lambda b, t: (0, 0, 0)),
                pl.BlockSpec((n_rest, 1, LANE), lambda b, t: (0, 0, 0)),
            ],
            out_specs=[
                pl.BlockSpec((tm, c_last), lambda b, t: (b * num_tiles + t, 0)),
                pl.BlockSpec((1, 8, LANE), lambda b, t: (b * num_tiles + t, 0, 0)),
            ],
        ),
        compiler_params=pltpu.CompilerParams(
            # no cross-iteration state -> both axes parallel (megacore on v7x even
            # when batch is 1, since row tiles also shard across cores)
            dimension_semantics=("parallel", "parallel"),
            vmem_limit_bytes=32 * 1024 * 1024,
        ),
    )(gsum, x_rows, stem_w, stem_b, fused_w, fused_b, rest_w, rest_b)

    # GAP finalize outside the kernel (keeps the row-tile axis parallel).
    pooled = pool[:, 0, :].reshape(batch, num_tiles, LANE).sum(axis=1) / float(hw)
    return feat, pooled


# ----------------------------------------------------------------------------- #
# DDPGateMTL (forward pass only) in JAX, using the fused Pallas kernel above
# ----------------------------------------------------------------------------- #
class DDPGateMTLPallas:
    def __init__(self, datasets, in_channels=3, num_per_block=(2, 2),
                 layer_channels=(32, 64), num_classes=10, temperature=5.0,
                 is_hardsampling=False, seed=42):
        self.datasets = list(datasets)
        self.base_dataset = self.datasets[0]
        self.num_per_block = list(num_per_block)
        self.layer_channels = list(layer_channels)
        self.num_classes = num_classes
        self.temperature = temperature            # TODO(synk): decay_function schedule
        self.is_hardsampling = is_hardsampling
        self.lambda_sparsity = 1.0
        self.sparsity_weight = 1.0                # sparsity_weighting=None branch
        self.return_layers = {d: [str(len(self.num_per_block) - 1)] for d in self.datasets}
        self.compute_dtype = _elementwise_dtype()

        key = jax.random.PRNGKey(seed)
        ks = iter(jax.random.split(key, 512))

        def nrm(shape, fan_in):
            return jax.random.normal(next(ks), shape, jnp.float32) / jnp.sqrt(fan_in)

        # zero-padded packers: padded rows/cols and biases are EXACTLY zero, so
        # padded lanes of every intermediate stay exactly zero through the net.
        def pad_w(w):
            assert w.shape[0] <= LANE and w.shape[1] <= LANE
            return jnp.zeros((LANE, LANE), jnp.float32).at[:w.shape[0], :w.shape[1]].set(w)

        def pad_b(b):
            assert b.shape[0] <= LANE
            return jnp.zeros((1, LANE), jnp.float32).at[0, :b.shape[0]].set(b)

        c0 = self.layer_channels[0]
        c_last = self.layer_channels[-1]

        # shared encoder.  TODO(synk): the reference BasicBlock has 3x3 convs +
        # BatchNorm; each block is modeled here as two 1x1 convs without BN.
        fused_w, fused_b = [], []       # per layer: [downsample | first conv1] on N
        rest_w, rest_b = [], []         # conv1 (non-first blocks) and conv2 (all)
        conv2_rest_idx = []             # rest-index of each block's conv2 (block order)
        cin = c0
        for li, nb in enumerate(self.num_per_block):
            cout = self.layer_channels[li]
            ds_w, ds_b = nrm((cin, cout), cin), jnp.zeros((cout,), jnp.float32)
            bc_in = cin
            for bi in range(nb):
                w1, b1 = nrm((bc_in, cout), bc_in), jnp.zeros((cout,), jnp.float32)
                w2, b2 = nrm((cout, cout), cout), jnp.zeros((cout,), jnp.float32)
                if bi == 0:
                    fused_w.append(jnp.concatenate([pad_w(ds_w), pad_w(w1)], axis=1))
                    fused_b.append(jnp.concatenate([pad_b(ds_b), pad_b(b1)], axis=1))
                else:
                    rest_w.append(pad_w(w1))
                    rest_b.append(pad_b(b1))
                conv2_rest_idx.append(len(rest_w))
                rest_w.append(pad_w(w2))
                rest_b.append(pad_b(b2))
                bc_in = cout
            cin = cout

        self.fused_w = jnp.stack(fused_w).astype(jnp.bfloat16)   # (L, LANE, 2*LANE)
        self.fused_b = jnp.stack(fused_b)                        # (L, 1, 2*LANE) f32
        # f32 masters; gate g0 is folded into each block's conv2 per call, then bf16
        self.rest_w_f32 = jnp.stack(rest_w)                      # (R, LANE, LANE)
        self.rest_b_f32 = jnp.stack(rest_b)                      # (R, 1, LANE)
        self.conv2_rest_idx = jnp.asarray(conv2_rest_idx, jnp.int32)
        self.n_rest = self.rest_w_f32.shape[0]

        # per-task stems (unpadded input rows -> C FMAs in the kernel) and
        # classification heads (batched matmul in the wrapper).
        # TODO(synk): det/seg heads are not reproduced.
        self.stem_w = {d: jnp.zeros((in_channels, LANE), jnp.float32)
                           .at[:, :c0].set(nrm((in_channels, c0), in_channels))
                       for d in self.datasets}
        self.stem_b = {d: jnp.zeros((1, LANE), jnp.float32) for d in self.datasets}
        self.head_w = {d: nrm((c_last, num_classes), c_last) for d in self.datasets}
        self.head_b = {d: jnp.zeros((num_classes,), jnp.float32) for d in self.datasets}

        # _make_gate: logits = 0.5 * ones((sum(num_per_block), 2))
        n_gates = sum(self.num_per_block)
        self.task_gating_params = {d: 0.5 * jnp.ones((n_gates, 2), jnp.float32)
                                   for d in self.datasets}

    def train_sample_policy(self, cur_task, rng):
        # gumbel-softmax over (num_blocks, 2) logits -- ~8 scalars, plain JAX.
        logits = self.task_gating_params[cur_task]
        u = jax.random.uniform(rng, logits.shape, jnp.float32, 1e-6, 1.0 - 1e-6)
        y = (logits - jnp.log(-jnp.log(u))) / self.temperature
        soft = jax.nn.softmax(y, axis=-1)
        if self.is_hardsampling:
            hard = jax.nn.one_hot(jnp.argmax(soft, axis=-1), soft.shape[-1], dtype=soft.dtype)
            soft = hard + soft - jax.lax.stop_gradient(soft)   # straight-through
        return soft

    def get_features(self, x_nchw, cur_task, rng):
        B, C, H, W = x_nchw.shape
        HW = H * W
        # NCHW -> NHWC rows; NO channel padding or extra cast pass in the wrapper.
        x_rows = jnp.transpose(x_nchw, (0, 2, 3, 1)).reshape(B * HW, C).astype(jnp.float32)

        # policy sampling (training path)
        policies = self.train_sample_policy(cur_task, rng)      # (num_blocks, 2)
        g0 = policies[:, 0]
        gsum = (policies[:, 0] + policies[:, 1]).astype(jnp.float32)
        # fold g0 into each block's second conv (tiny per-call 128x128 scaling)
        # so the kernel only does  relu(block_out_scaled + gsum*identity).
        scale = jnp.ones((self.n_rest,), jnp.float32).at[self.conv2_rest_idx].set(g0)
        rest_w = (self.rest_w_f32 * scale[:, None, None]).astype(jnp.bfloat16)
        rest_b = self.rest_b_f32 * scale[:, None, None]

        feat, pooled = fused_encoder_forward(
            x_rows, self.stem_w[cur_task], self.stem_b[cur_task],
            self.fused_w, self.fused_b, rest_w, rest_b, gsum,
            batch=B, hw=HW, num_per_block=self.num_per_block,
            c_last=self.layer_channels[-1], compute_dtype=self.compute_dtype)

        c_last = self.layer_channels[-1]
        # batched classification head: one (B x c_last) @ (c_last x classes) matmul.
        logits = pooled[:, :c_last] @ self.head_w[cur_task] + self.head_b[cur_task]

        last_key = str(len(self.num_per_block) - 1)
        # TODO(synk): only the last layer's feature map is exported; intermediate
        #             return_layers would need additional out_specs.
        backbone_feats = {last_key: feat}                       # (B*HW, c_last) f32

        # TODO(synk): disjointed_policy_loss / task-specific losses (external fns)
        return {"outputs": logits,
                "policy": policies,
                "backbone_feats": backbone_feats}

    def forward(self, data_dict, cur_dataset, rng):
        # training mode, retrain_phase=False -> get_features path
        return self.get_features(data_dict, cur_dataset, rng)


if __name__ == "__main__":
    key = jax.random.PRNGKey(0)
    k_x, k_noise = jax.random.split(key)

    B, Cin, H, W = 2, 3, 16, 16
    x = jax.random.normal(k_x, (B, Cin, H, W), dtype=jnp.float32)  # NCHW like PyTorch

    model = DDPGateMTLPallas(datasets=["task_a", "task_b"],
                             in_channels=Cin,
                             num_per_block=(2, 2),
                             layer_channels=(32, 64),
                             num_classes=10,
                             temperature=5.0)

    out = model.forward(x, "task_a", k_noise)
    jax.block_until_ready(out["outputs"])
    jax.block_until_ready(out["policy"])
    jax.block_until_ready(out["backbone_feats"]["1"])

    assert out["outputs"].shape == (B, 10)
    assert out["policy"].shape == (sum(model.num_per_block), 2)
    assert out["backbone_feats"]["1"].shape == (B * H * W, 64)
    assert bool(jnp.all(jnp.isfinite(out["outputs"])))
    assert bool(jnp.all(jnp.isfinite(out["backbone_feats"]["1"])))
    print("KERNEL_OK")
</pallas_src>

<mosaic_0001>
module attributes {stable_mosaic.version = 11 : i64} {
  func.func @_fused_encoder_kernel(%arg0: i32, %arg1: i32, %arg2: memref<4xf32, #tpu.memory_space<smem>>, %arg3: memref<256x3xf32, #tpu.memory_space<vmem>>, %arg4: memref<3x128xf32, #tpu.memory_space<vmem>>, %arg5: memref<1x128xf32, #tpu.memory_space<vmem>>, %arg6: memref<2x128x256xbf16, #tpu.memory_space<vmem>>, %arg7: memref<2x1x256xf32, #tpu.memory_space<vmem>>, %arg8: memref<6x128x128xbf16, #tpu.memory_space<vmem>>, %arg9: memref<6x1x128xf32, #tpu.memory_space<vmem>>, %arg10: memref<256x64xf32, #tpu.memory_space<vmem>>, %arg11: memref<1x8x128xf32, #tpu.memory_space<vmem>>) attributes {dimension_semantics = [#tpu.dimension_semantics<parallel>, #tpu.dimension_semantics<parallel>], iteration_bounds = array<i64: 2, 1>, scalar_prefetch = 0 : i64, scratch_operands = 0 : i64, tpu.core_type = #tpu.core_type<tc>, window_params = [{transform_indices = @transform_0, window_bounds = array<i64: 4>}, {transform_indices = @transform_1, window_bounds = array<i64: 256, 3>}, {pipeline_mode = #tpu.pipeline_mode<synchronous>, transform_indices = @transform_2, window_bounds = array<i64: 3, 128>}, {pipeline_mode = #tpu.pipeline_mode<synchronous>, transform_indices = @transform_3, window_bounds = array<i64: 1, 128>}, {pipeline_mode = #tpu.pipeline_mode<synchronous>, transform_indices = @transform_4, window_bounds = array<i64: 2, 128, 256>}, {pipeline_mode = #tpu.pipeline_mode<synchronous>, transform_indices = @transform_5, window_bounds = array<i64: 2, 1, 256>}, {pipeline_mode = #tpu.pipeline_mode<synchronous>, transform_indices = @transform_6, window_bounds = array<i64: 6, 128, 128>}, {pipeline_mode = #tpu.pipeline_mode<synchronous>, transform_indices = @transform_7, window_bounds = array<i64: 6, 1, 128>}, {transform_indices = @transform_8, window_bounds = array<i64: 256, 64>}, {transform_indices = @transform_9, window_bounds = array<i64: 1, 8, 128>}]} {
    %c0 = arith.constant 0 : index
    %c0_0 = arith.constant 0 : index
    %0 = vector.load %arg3[%c0, %c0_0] : memref<256x3xf32, #tpu.memory_space<vmem>>, vector<256x3xf32>
    %c0_1 = arith.constant 0 : index
    %c0_2 = arith.constant 0 : index
    %1 = vector.load %arg4[%c0_1, %c0_2] : memref<3x128xf32, #tpu.memory_space<vmem>>, vector<3x128xf32>
    %2 = vector.extract_strided_slice %0 {offsets = [0, 0], sizes = [256, 1], strides = [1, 1]} : vector<256x3xf32> to vector<256x1xf32>
    %3 = vector.extract_strided_slice %1 {offsets = [0, 0], sizes = [1, 128], strides = [1, 1]} : vector<3x128xf32> to vector<1x128xf32>
    %4 = vector.broadcast %2 : vector<256x1xf32> to vector<256x128xf32>
    %5 = vector.broadcast %3 : vector<1x128xf32> to vector<256x128xf32>
    %6 = arith.mulf %4, %5 : vector<256x128xf32>
    %7 = vector.extract_strided_slice %0 {offsets = [0, 1], sizes = [256, 1], strides = [1, 1]} : vector<256x3xf32> to vector<256x1xf32>
    %8 = vector.extract_strided_slice %1 {offsets = [1, 0], sizes = [1, 128], strides = [1, 1]} : vector<3x128xf32> to vector<1x128xf32>
    %9 = vector.broadcast %7 : vector<256x1xf32> to vector<256x128xf32>
    %10 = vector.broadcast %8 : vector<1x128xf32> to vector<256x128xf32>
    %11 = arith.mulf %9, %10 : vector<256x128xf32>
    %12 = arith.addf %6, %11 : vector<256x128xf32>
    %13 = vector.extract_strided_slice %0 {offsets = [0, 2], sizes = [256, 1], strides = [1, 1]} : vector<256x3xf32> to vector<256x1xf32>
    %14 = vector.extract_strided_slice %1 {offsets = [2, 0], sizes = [1, 128], strides = [1, 1]} : vector<3x128xf32> to vector<1x128xf32>
    %15 = vector.broadcast %13 : vector<256x1xf32> to vector<256x128xf32>
    %16 = vector.broadcast %14 : vector<1x128xf32> to vector<256x128xf32>
    %17 = arith.mulf %15, %16 : vector<256x128xf32>
    %18 = arith.addf %12, %17 : vector<256x128xf32>
    %c0_3 = arith.constant 0 : index
    %c0_4 = arith.constant 0 : index
    %19 = vector.load %arg5[%c0_3, %c0_4] : memref<1x128xf32, #tpu.memory_space<vmem>>, vector<1x128xf32>
    %20 = vector.broadcast %19 : vector<1x128xf32> to vector<256x128xf32>
    %21 = arith.addf %18, %20 : vector<256x128xf32>
    %cst = arith.constant 0.000000e+00 : f32
    %22 = vector.broadcast %cst : f32 to vector<256x128xf32>
    %23 = arith.maximumf %21, %22 : vector<256x128xf32>
    %24 = arith.truncf %23 : vector<256x128xf32> to vector<256x128xbf16>
    %c0_5 = arith.constant 0 : index
    %c0_6 = arith.constant 0 : index
    %c0_7 = arith.constant 0 : index
    %25 = vector.load %arg6[%c0_5, %c0_6, %c0_7] : memref<2x128x256xbf16, #tpu.memory_space<vmem>>, vector<1x128x256xbf16>
    %26 = vector.shape_cast %25 : vector<1x128x256xbf16> to vector<128x256xbf16>
    %cst_8 = arith.constant dense<0.000000e+00> : vector<256x256xf32>
    %27 = tpu.matmul %24, %26, %cst_8 {dimension_numbers = #tpu.dot_dimension_numbers<[1], [0], [0], [1], [0, 0, 1, 1], [], []>} : vector<256x128xbf16>, vector<128x256xbf16>, vector<256x256xf32> -> vector<256x256xf32>
    %c0_9 = arith.constant 0 : index
    %c0_10 = arith.constant 0 : index
    %c0_11 = arith.constant 0 : index
    %28 = vector.load %arg7[%c0_9, %c0_10, %c0_11] : memref<2x1x256xf32, #tpu.memory_space<vmem>>, vector<1x1x256xf32>
    %29 = vector.shape_cast %28 : vector<1x1x256xf32> to vector<1x256xf32>
    %30 = vector.broadcast %29 : vector<1x256xf32> to vector<256x256xf32>
    %31 = arith.addf %27, %30 : vector<256x256xf32>
    %32 = vector.extract_strided_slice %31 {offsets = [0, 0], sizes = [256, 128], strides = [1, 1]} : vector<256x256xf32> to vector<256x128xf32>
    %33 = vector.extract_strided_slice %31 {offsets = [0, 128], sizes = [256, 128], strides = [1, 1]} : vector<256x256xf32> to vector<256x128xf32>
    %cst_12 = arith.constant 0.000000e+00 : f32
    %34 = vector.broadcast %cst_12 : f32 to vector<256x128xf32>
    %35 = arith.maximumf %33, %34 : vector<256x128xf32>
    %36 = arith.truncf %35 : vector<256x128xf32> to vector<256x128xbf16>
    %c0_13 = arith.constant 0 : index
    %c0_14 = arith.constant 0 : index
    %c0_15 = arith.constant 0 : index
    %37 = vector.load %arg8[%c0_13, %c0_14, %c0_15] : memref<6x128x128xbf16, #tpu.memory_space<vmem>>, vector<1x128x128xbf16>
    %38 = vector.shape_cast %37 : vector<1x128x128xbf16> to vector<128x128xbf16>
    %cst_16 = arith.constant dense<0.000000e+00> : vector<256x128xf32>
    %39 = tpu.matmul %36, %38, %cst_16 {dimension_numbers = #tpu.dot_dimension_numbers<[1], [0], [0], [1], [0, 0, 1, 1], [], []>} : vector<256x128xbf16>, vector<128x128xbf16>, vector<256x128xf32> -> vector<256x128xf32>
    %c0_17 = arith.constant 0 : index
    %c0_18 = arith.constant 0 : index
    %c0_19 = arith.constant 0 : index
    %40 = vector.load %arg9[%c0_17, %c0_18, %c0_19] : memref<6x1x128xf32, #tpu.memory_space<vmem>>, vector<1x1x128xf32>
    %41 = vector.shape_cast %40 : vector<1x1x128xf32> to vector<1x128xf32>
    %42 = vector.broadcast %41 : vector<1x128xf32> to vector<256x128xf32>
    %43 = arith.addf %39, %42 : vector<256x128xf32>
    %c0_20 = arith.constant 0 : index
    %44 = memref.load %arg2[%c0_20] : memref<4xf32, #tpu.memory_space<smem>>
    %45 = vector.broadcast %44 : f32 to vector<256x128xf32>
    %46 = arith.mulf %45, %32 : vector<256x128xf32>
    %47 = arith.addf %43, %46 : vector<256x128xf32>
    %cst_21 = arith.constant 0.000000e+00 : f32
    %48 = vector.broadcast %cst_21 : f32 to vector<256x128xf32>
    %49 = arith.maximumf %47, %48 : vector<256x128xf32>
    %50 = arith.truncf %49 : vector<256x128xf32> to vector<256x128xbf16>
    %c1 = arith.constant 1 : index
    %c0_22 = arith.constant 0 : index
    %c0_23 = arith.constant 0 : index
    %51 = vector.load %arg8[%c1, %c0_22, %c0_23] : memref<6x128x128xbf16, #tpu.memory_space<vmem>>, vector<1x128x128xbf16>
    %52 = vector.shape_cast %51 : vector<1x128x128xbf16> to vector<128x128xbf16>
    %cst_24 = arith.constant dense<0.000000e+00> : vector<256x128xf32>
    %53 = tpu.matmul %50, %52, %cst_24 {dimension_numbers = #tpu.dot_dimension_numbers<[1], [0], [0], [1], [0, 0, 1, 1], [], []>} : vector<256x128xbf16>, vector<128x128xbf16>, vector<256x128xf32> -> vector<256x128xf32>
    %c1_25 = arith.constant 1 : index
    %c0_26 = arith.constant 0 : index
    %c0_27 = arith.constant 0 : index
    %54 = vector.load %arg9[%c1_25, %c0_26, %c0_27] : memref<6x1x128xf32, #tpu.memory_space<vmem>>, vector<1x1x128xf32>
    %55 = vector.shape_cast %54 : vector<1x1x128xf32> to vector<1x128xf32>
    %56 = vector.broadcast %55 : vector<1x128xf32> to vector<256x128xf32>
    %57 = arith.addf %53, %56 : vector<256x128xf32>
    %cst_28 = arith.constant 0.000000e+00 : f32
    %58 = vector.broadcast %cst_28 : f32 to vector<256x128xf32>
    %59 = arith.maximumf %57, %58 : vector<256x128xf32>
    %60 = arith.truncf %59 : vector<256x128xf32> to vector<256x128xbf16>
    %c2 = arith.constant 2 : index
    %c0_29 = arith.constant 0 : index
    %c0_30 = arith.constant 0 : index
    %61 = vector.load %arg8[%c2, %c0_29, %c0_30] : memref<6x128x128xbf16, #tpu.memory_space<vmem>>, vector<1x128x128xbf16>
    %62 = vector.shape_cast %61 : vector<1x128x128xbf16> to vector<128x128xbf16>
    %cst_31 = arith.constant dense<0.000000e+00> : vector<256x128xf32>
    %63 = tpu.matmul %60, %62, %cst_31 {dimension_numbers = #tpu.dot_dimension_numbers<[1], [0], [0], [1], [0, 0, 1, 1], [], []>} : vector<256x128xbf16>, vector<128x128xbf16>, vector<256x128xf32> -> vector<256x128xf32>
    %c2_32 = arith.constant 2 : index
    %c0_33 = arith.constant 0 : index
    %c0_34 = arith.constant 0 : index
    %64 = vector.load %arg9[%c2_32, %c0_33, %c0_34] : memref<6x1x128xf32, #tpu.memory_space<vmem>>, vector<1x1x128xf32>
    %65 = vector.shape_cast %64 : vector<1x1x128xf32> to vector<1x128xf32>
    %66 = vector.broadcast %65 : vector<1x128xf32> to vector<256x128xf32>
    %67 = arith.addf %63, %66 : vector<256x128xf32>
    %c1_35 = arith.constant 1 : index
    %68 = memref.load %arg2[%c1_35] : memref<4xf32, #tpu.memory_space<smem>>
    %69 = vector.broadcast %68 : f32 to vector<256x128xf32>
    %70 = arith.mulf %69, %49 : vector<256x128xf32>
    %71 = arith.addf %67, %70 : vector<256x128xf32>
    %cst_36 = arith.constant 0.000000e+00 : f32
    %72 = vector.broadcast %cst_36 : f32 to vector<256x128xf32>
    %73 = arith.maximumf %71, %72 : vector<256x128xf32>
    %74 = arith.truncf %73 : vector<256x128xf32> to vector<256x128xbf16>
    %c1_37 = arith.constant 1 : index
    %c0_38 = arith.constant 0 : index
    %c0_39 = arith.constant 0 : index
    %75 = vector.load %arg6[%c1_37, %c0_38, %c0_39] : memref<2x128x256xbf16, #tpu.memory_space<vmem>>, vector<1x128x256xbf16>
    %76 = vector.shape_cast %75 : vector<1x128x256xbf16> to vector<128x256xbf16>
    %cst_40 = arith.constant dense<0.000000e+00> : vector<256x256xf32>
    %77 = tpu.matmul %74, %76, %cst_40 {dimension_numbers = #tpu.dot_dimension_numbers<[1], [0], [0], [1], [0, 0, 1, 1], [], []>} : vector<256x128xbf16>, vector<128x256xbf16>, vector<256x256xf32> -> vector<256x256xf32>
    %c1_41 = arith.constant 1 : index
    %c0_42 = arith.constant 0 : index
    %c0_43 = arith.constant 0 : index
    %78 = vector.load %arg7[%c1_41, %c0_42, %c0_43] : memref<2x1x256xf32, #tpu.memory_space<vmem>>, vector<1x1x256xf32>
    %79 = vector.shape_cast %78 : vector<1x1x256xf32> to vector<1x256xf32>
    %80 = vector.broadcast %79 : vector<1x256xf32> to vector<256x256xf32>
    %81 = arith.addf %77, %80 : vector<256x256xf32>
    %82 = vector.extract_strided_slice %81 {offsets = [0, 0], sizes = [256, 128], strides = [1, 1]} : vector<256x256xf32> to vector<256x128xf32>
    %83 = vector.extract_strided_slice %81 {offsets = [0, 128], sizes = [256, 128], strides = [1, 1]} : vector<256x256xf32> to vector<256x128xf32>
    %cst_44 = arith.constant 0.000000e+00 : f32
    %84 = vector.broadcast %cst_44 : f32 to vector<256x128xf32>
    %85 = arith.maximumf %83, %84 : vector<256x128xf32>
    %86 = arith.truncf %85 : vector<256x128xf32> to vector<256x128xbf16>
    %c3 = arith.constant 3 : index
    %c0_45 = arith.constant 0 : index
    %c0_46 = arith.constant 0 : index
    %87 = vector.load %arg8[%c3, %c0_45, %c0_46] : memref<6x128x128xbf16, #tpu.memory_space<vmem>>, vector<1x128x128xbf16>
    %88 = vector.shape_cast %87 : vector<1x128x128xbf16> to vector<128x128xbf16>
    %cst_47 = arith.constant dense<0.000000e+00> : vector<256x128xf32>
    %89 = tpu.matmul %86, %88, %cst_47 {dimension_numbers = #tpu.dot_dimension_numbers<[1], [0], [0], [1], [0, 0, 1, 1], [], []>} : vector<256x128xbf16>, vector<128x128xbf16>, vector<256x128xf32> -> vector<256x128xf32>
    %c3_48 = arith.constant 3 : index
    %c0_49 = arith.constant 0 : index
    %c0_50 = arith.constant 0 : index
    %90 = vector.load %arg9[%c3_48, %c0_49, %c0_50] : memref<6x1x128xf32, #tpu.memory_space<vmem>>, vector<1x1x128xf32>
    %91 = vector.shape_cast %90 : vector<1x1x128xf32> to vector<1x128xf32>
    %92 = vector.broadcast %91 : vector<1x128xf32> to vector<256x128xf32>
    %93 = arith.addf %89, %92 : vector<256x128xf32>
    %c2_51 = arith.constant 2 : index
    %94 = memref.load %arg2[%c2_51] : memref<4xf32, #tpu.memory_space<smem>>
    %95 = vector.broadcast %94 : f32 to vector<256x128xf32>
    %96 = arith.mulf %95, %82 : vector<256x128xf32>
    %97 = arith.addf %93, %96 : vector<256x128xf32>
    %cst_52 = arith.constant 0.000000e+00 : f32
    %98 = vector.broadcast %cst_52 : f32 to vector<256x128xf32>
    %99 = arith.maximumf %97, %98 : vector<256x128xf32>
    %100 = arith.truncf %99 : vector<256x128xf32> to vector<256x128xbf16>
    %c4 = arith.constant 4 : index
    %c0_53 = arith.constant 0 : index
    %c0_54 = arith.constant 0 : index
    %101 = vector.load %arg8[%c4, %c0_53, %c0_54] : memref<6x128x128xbf16, #tpu.memory_space<vmem>>, vector<1x128x128xbf16>
    %102 = vector.shape_cast %101 : vector<1x128x128xbf16> to vector<128x128xbf16>
    %cst_55 = arith.constant dense<0.000000e+00> : vector<256x128xf32>
    %103 = tpu.matmul %100, %102, %cst_55 {dimension_numbers = #tpu.dot_dimension_numbers<[1], [0], [0], [1], [0, 0, 1, 1], [], []>} : vector<256x128xbf16>, vector<128x128xbf16>, vector<256x128xf32> -> vector<256x128xf32>
    %c4_56 = arith.constant 4 : index
    %c0_57 = arith.constant 0 : index
    %c0_58 = arith.constant 0 : index
    %104 = vector.load %arg9[%c4_56, %c0_57, %c0_58] : memref<6x1x128xf32, #tpu.memory_space<vmem>>, vector<1x1x128xf32>
    %105 = vector.shape_cast %104 : vector<1x1x128xf32> to vector<1x128xf32>
    %106 = vector.broadcast %105 : vector<1x128xf32> to vector<256x128xf32>
    %107 = arith.addf %103, %106 : vector<256x128xf32>
    %cst_59 = arith.constant 0.000000e+00 : f32
    %108 = vector.broadcast %cst_59 : f32 to vector<256x128xf32>
    %109 = arith.maximumf %107, %108 : vector<256x128xf32>
    %110 = arith.truncf %109 : vector<256x128xf32> to vector<256x128xbf16>
    %c5 = arith.constant 5 : index
    %c0_60 = arith.constant 0 : index
    %c0_61 = arith.constant 0 : index
    %111 = vector.load %arg8[%c5, %c0_60, %c0_61] : memref<6x128x128xbf16, #tpu.memory_space<vmem>>, vector<1x128x128xbf16>
    %112 = vector.shape_cast %111 : vector<1x128x128xbf16> to vector<128x128xbf16>
    %cst_62 = arith.constant dense<0.000000e+00> : vector<256x128xf32>
    %113 = tpu.matmul %110, %112, %cst_62 {dimension_numbers = #tpu.dot_dimension_numbers<[1], [0], [0], [1], [0, 0, 1, 1], [], []>} : vector<256x128xbf16>, vector<128x128xbf16>, vector<256x128xf32> -> vector<256x128xf32>
    %c5_63 = arith.constant 5 : index
    %c0_64 = arith.constant 0 : index
    %c0_65 = arith.constant 0 : index
    %114 = vector.load %arg9[%c5_63, %c0_64, %c0_65] : memref<6x1x128xf32, #tpu.memory_space<vmem>>, vector<1x1x128xf32>
    %115 = vector.shape_cast %114 : vector<1x1x128xf32> to vector<1x128xf32>
    %116 = vector.broadcast %115 : vector<1x128xf32> to vector<256x128xf32>
    %117 = arith.addf %113, %116 : vector<256x128xf32>
    %c3_66 = arith.constant 3 : index
    %118 = memref.load %arg2[%c3_66] : memref<4xf32, #tpu.memory_space<smem>>
    %119 = vector.broadcast %118 : f32 to vector<256x128xf32>
    %120 = arith.mulf %119, %99 : vector<256x128xf32>
    %121 = arith.addf %117, %120 : vector<256x128xf32>
    %cst_67 = arith.constant 0.000000e+00 : f32
    %122 = vector.broadcast %cst_67 : f32 to vector<256x128xf32>
    %123 = arith.maximumf %121, %122 : vector<256x128xf32>
    %124 = vector.extract_strided_slice %123 {offsets = [0, 0], sizes = [256, 64], strides = [1, 1]} : vector<256x128xf32> to vector<256x64xf32>
    %c0_68 = arith.constant 0 : index
    %c0_69 = arith.constant 0 : index
    %125 = vector.load %arg10[%c0_68, %c0_69] : memref<256x64xf32, #tpu.memory_space<vmem>>, vector<256x64xf32>
    tpu.vector_store %arg10[%c0_68, %c0_69], %124 {strides = array<i32>} : memref<256x64xf32, #tpu.memory_space<vmem>>, vector<256x64xf32>,
    %cst_70 = arith.constant dense<0.000000e+00> : vector<128xf32>
    %126 = vector.multi_reduction <add>, %123, %cst_70 [0] : vector<256x128xf32> to vector<128xf32>
    %127 = vector.shape_cast %126 : vector<128xf32> to vector<1x128xf32>
    %128 = vector.shape_cast %127 : vector<1x128xf32> to vector<1x1x128xf32>
    %129 = vector.shape_cast %128 : vector<1x1x128xf32> to vector<1x1x128xf32>
    %130 = vector.broadcast %129 : vector<1x1x128xf32> to vector<1x8x128xf32>
    %c0_71 = arith.constant 0 : index
    %c0_72 = arith.constant 0 : index
    %c0_73 = arith.constant 0 : index
    %131 = vector.load %arg11[%c0_71, %c0_72, %c0_73] : memref<1x8x128xf32, #tpu.memory_space<vmem>>, vector<1x8x128xf32>
    tpu.vector_store %arg11[%c0_71, %c0_72, %c0_73], %130 {strides = array<i32>} : memref<1x8x128xf32, #tpu.memory_space<vmem>>, vector<1x8x128xf32>,
    return
  }
  func.func @transform_0(%arg0: i32, %arg1: i32) -> i32 {
    %c0_i32 = arith.constant 0 : i32
    %c0_i32_0 = arith.constant 0 : i32
    return %c0_i32 : i32
  }
  func.func @transform_1(%arg0: i32, %arg1: i32) -> (i32, i32) {
    %c1_i32 = arith.constant 1 : i32
    %0 = arith.muli %arg0, %c1_i32 : i32
    %1 = arith.addi %0, %arg1 : i32
    %c0_i32 = arith.constant 0 : i32
    %c0_i32_0 = arith.constant 0 : i32
    return %1, %c0_i32 : i32, i32
  }
  func.func @transform_2(%arg0: i32, %arg1: i32) -> (i32, i32) {
    %c0_i32 = arith.constant 0 : i32
    %c0_i32_0 = arith.constant 0 : i32
    %c0_i32_1 = arith.constant 0 : i32
    return %c0_i32, %c0_i32_0 : i32, i32
  }
  func.func @transform_3(%arg0: i32, %arg1: i32) -> (i32, i32) {
    %c0_i32 = arith.constant 0 : i32
    %c0_i32_0 = arith.constant 0 : i32
    %c0_i32_1 = arith.constant 0 : i32
    return %c0_i32, %c0_i32_0 : i32, i32
  }
  func.func @transform_4(%arg0: i32, %arg1: i32) -> (i32, i32, i32) {
    %c0_i32 = arith.constant 0 : i32
    %c0_i32_0 = arith.constant 0 : i32
    %c0_i32_1 = arith.constant 0 : i32
    %c0_i32_2 = arith.constant 0 : i32
    return %c0_i32, %c0_i32_0, %c0_i32_1 : i32, i32, i32
  }
  func.func @transform_5(%arg0: i32, %arg1: i32) -> (i32, i32, i32) {
    %c0_i32 = arith.constant 0 : i32
    %c0_i32_0 = arith.constant 0 : i32
    %c0_i32_1 = arith.constant 0 : i32
    %c0_i32_2 = arith.constant 0 : i32
    return %c0_i32, %c0_i32_0, %c0_i32_1 : i32, i32, i32
  }
  func.func @transform_6(%arg0: i32, %arg1: i32) -> (i32, i32, i32) {
    %c0_i32 = arith.constant 0 : i32
    %c0_i32_0 = arith.constant 0 : i32
    %c0_i32_1 = arith.constant 0 : i32
    %c0_i32_2 = arith.constant 0 : i32
    return %c0_i32, %c0_i32_0, %c0_i32_1 : i32, i32, i32
  }
  func.func @transform_7(%arg0: i32, %arg1: i32) -> (i32, i32, i32) {
    %c0_i32 = arith.constant 0 : i32
    %c0_i32_0 = arith.constant 0 : i32
    %c0_i32_1 = arith.constant 0 : i32
    %c0_i32_2 = arith.constant 0 : i32
    return %c0_i32, %c0_i32_0, %c0_i32_1 : i32, i32, i32
  }
  func.func @transform_8(%arg0: i32, %arg1: i32) -> (i32, i32) {
    %c1_i32 = arith.constant 1 : i32
    %0 = arith.muli %arg0, %c1_i32 : i32
    %1 = arith.addi %0, %arg1 : i32
    %c0_i32 = arith.constant 0 : i32
    %c0_i32_0 = arith.constant 0 : i32
    return %1, %c0_i32 : i32, i32
  }
  func.func @transform_9(%arg0: i32, %arg1: i32) -> (i32, i32, i32) {
    %c1_i32 = arith.constant 1 : i32
    %0 = arith.muli %arg0, %c1_i32 : i32
    %1 = arith.addi %0, %arg1 : i32
    %c0_i32 = arith.constant 0 : i32
    %c0_i32_0 = arith.constant 0 : i32
    %c0_i32_1 = arith.constant 0 : i32
    return %1, %c0_i32, %c0_i32_0 : i32, i32, i32
  }
}

</mosaic_0001>

<bundles_post_ra>
// kernel: tpu_custom_call.1
= control target key start
LH: loop header
LB: loop body
LE: loop exit
PB: predicated region body
PF: predicated region fallthrough
CT: control target
= control target key end

     0   :  { %s6899_s0 = inlined_call_operand.vmem [shape: f32[4], index: 0, kind: input, shape index: {}]   ;;  %s6900_s1 = inlined_call_operand.vmem [shape: f32[512,3], index: 1, kind: input, shape index: {}]   ;;  %s6901_s2 = inlined_call_operand.vmem [shape: f32[3,128], index: 2, kind: input, shape index: {}]   ;;  %s6902_s3 = inlined_call_operand.vmem [shape: f32[1,128], index: 3, kind: input, shape index: {}]   ;;  %s6903_s4 = inlined_call_operand.hbm [shape: bf16[2,128,256], index: 4, kind: input, shape index: {}]   ;;  %s6904_s5 = inlined_call_operand.vmem [shape: f32[2,1,256], index: 5, kind: input, shape index: {}]   ;;  %s6905_s6 = inlined_call_operand.vmem [shape: bf16[6,128,128], index: 6, kind: input, shape index: {}]   ;;  %s6906_s7 = inlined_call_operand.vmem [shape: f32[6,1,128], index: 7, kind: input, shape index: {}]   ;;  %s6907_s8 = inlined_call_operand.vmem [shape: f32[512,64], index: 8, kind: output, shape index: {0}]   ;;  %s6908_s9 = inlined_call_operand.hbm [shape: f32[2,8,128], index: 9, kind: output, shape index: {1}]  }
   0x1   :  { %6957 = sst [smem:[#allocation11_spill]] %s6899_s0 }
   0x2   :  { %15 = vsyncpa [#allocation5], 0 }
   0x3   :  { %16 = vsyncpa [#allocation3], 0 }
   0x4   :  { %17 = vsyncpa [#allocation4], 0 }
   0x5   :  { %19 = vsyncpa [#allocation4 + $0x1], 0  ;;  %s5007_s30 = smov 0   ;;  %s5009_s10 = smov 0  }
   0x6   :  { %s5011_s11 = smov 0   ;;  %s5013_s12 = smov 0  }
   0x7   :  { %s5015_s13 = smov 0   ;;  %s5017_s14 = smov 0  }
   0x8 LB: > { %s3965_s15 = sadd.s32 4294967295, %s4947_s14   ;;  %s3966_s16 = sadd.s32 4294967294, %s4947_s14   ;;  %s4947_s14 = sphi %s5017_s14, %s25_s14   ;;  %s4943_s13 = sphi %s5015_s13, %s7016_s13   ;;  %s4939_s12 = sphi %s5013_s12, %s7015_s12   ;;  %s4935_s11 = sphi %s5011_s11, %s7014_s11   ;;  %s4931_s10 = sphi %s5009_s10, %s7013_s10   ;;  %s4927_s30 = sphi %s5007_s30, %s7012_s30  }
   0x9   : > { %s37_s17 = sadd.s32 1, %s4943_s13  ;;  %s249_s18 = sadd.s32 1, %s4935_s11 }
   0xa   : > { %p39_p0 = scmp.ge.s32.totalorder %s37_s17, 2  ;;  %p259_p1 = scmp.ne.s32.totalorder %s4935_s11, %s4931_s10 }
   0xb   : > { %p260_p2 = scmp.eq.s32.totalorder %s3965_s15, 1  ;;  %p265_p3 = scmp.ne.s32.totalorder %s4931_s10, %s4927_s30 }
   0xc   : > { %s7018_s17 = smov (%p39_p0, %s37_s17), 0  ;;  %p266_p5 = scmp.eq.s32.totalorder %s3966_s16, 1 }
   0xd   : > { %p5047_p4 = por %p260_p2, %p259_p1  ;;  %s246_s20 = ssub.s32 %s4943_s13, %s7018_s17 }
   0xe   : > { %p3967_p6 = scmp.ge.s32.totalorder %s4947_s14, 1  ;;  %p247_p7 = scmp.eq.s32.totalorder %s246_s20, 0 }
   0xf   : > { %s6958_s19 = scalar_select %p5047_p4, 1, 0 }
  0x10   : > { %p5054_p8 = por %p266_p5, %p265_p3  ;;  %p273_p9 = scmp.lt.s32.totalorder %s4947_s14, 3 }
  0x11   : > { %s5060_s22 = scalar_select %p247_p7, %s4935_s11, %s249_s18  }
  0x12   : > { %s6959_s21 = scalar_select %p5054_p8, 1, 0 }
  0x13   : > { %p5062_p10 = pnand %p3967_p6, %p273_p9  ;;  %p5066_p11 = scmp.eq.s32.totalorder %s3965_s15, 0 }
  0x14   : > { %s6962_s0 = sld [smem:[#allocation11_spill]]  ;;  %s4949_s29 = smov [#allocation6]  }
  0x15   : > { %s6960_s23 = scalar_select %p5062_p10, 1, 0 }
  0x16   : > { %s6961_s24 = scalar_select %p5066_p11, 1, 0 }
  0x17   : > { %p4601_p12 = pneg %p5062_p10  ;;  %s302_s16 = sshll.u32 %s4949_s29, 4  ;;  %s303_s16 = int_to_ptr.vmem [resolvable:$true] %s302_s16 }
  0x19   : > { %p5077_p13 = pnand %p5066_p11, %p4601_p12 }
  0x1a   : > { %s286_s27 = sshll.u32 %s6962_s0, 4  ;;  %s287_s27 = int_to_ptr.vmem [resolvable:$true] %s286_s27 }
  0x1b   : > { %s4822_s15 = scalar_lea.vmem %s287_s27, 16  ;;  %p4824_p1 = pneg %p5077_p13 }
  0x1c   : > { %p4823_p0 = scmp.ne.s32.totalorder %s287_s27, %s4822_s15  ;;  %p4830_p5 = scmp.lt.s32.totalorder %s287_s27, %s287_s27 }
  0x1d   : > { %p4831_p6 = scmp.lt.s32.totalorder %s4822_s15, %s4822_s15 }
  0x1e   : > { %p4825_p2 = pnand %p4824_p1, %p4823_p0 }
  0x1f   : > { %p4832_p7 = por %p4831_p6, %p4830_p5 }
  0x20   : > { %p4826_p3 = pneg %p4825_p2 }
  0x22   : > { %p4833_p9 = pnand %p4832_p7, %p4826_p3 }
  0x24   : > { %4836 = shalt.err (!%p4833_p9)
}
  0x25   : > { %s4950_s18 = smov [#allocation2]   ;;  %s4848_s20 = scalar_lea.vmem %s303_s16, 4096 }
  0x26   : > { %4604 = dma.vmem_to_smem (!%p5077_p13), %s287_s27, 16, %s4950_s18, [#allocation5]  }
  0x27   : > { %p4849_p12 = scmp.ne.s32.totalorder %s303_s16, %s4848_s20  ;;  %p4856_p11 = scmp.lt.s32.totalorder %s303_s16, %s303_s16 }
  0x28   : > { %p4857_p10 = scmp.lt.s32.totalorder %s4848_s20, %s4848_s20 }
  0x29   : > { %p4851_p8 = pnand %p4849_p12, %p4824_p1 }
  0x2a   : > { %p4858_p0 = por %p4857_p10, %p4856_p11 }
  0x2b   : > { %p4852_p4 = pneg %p4851_p8 }
  0x2d   : > { %p4859_p2 = pnand %p4858_p0, %p4852_p4 }
  0x2f   : > { %4862 = shalt.err (!%p4859_p2)
}
  0x30   : > { %s4951_s25 = smov 128   ;;  %s4952_s26 = smov 8  }
  0x31   : > { %4607 = dma.hbm_to_vmem [thread:$0]  (!%p5077_p13), %s6903_s4, 4096, %s303_s16, [#allocation3], %s4951_s25, %s4951_s25, %s4952_s26  }
  0x32   : > { %p6964_p3 = scmp.ne.s32.totalorder %s6960_s23, 0 }
  0x33   : > { %p6965_p5 = scmp.ne.s32.totalorder (!%p6964_p3), %s6961_s24, 0 }
  0x34   : > { %338 = sbr.rel (%p6964_p3) target bundleno = 2186 (0x88a), region = 52 }
  0x39   : > { %4914 = dma.done.wait (%p6965_p5), [#allocation5], 16  }
  0x3a   : > { %4916 = vsyncadd (%p6965_p5), [#allocation5], 4294967280 }
  0x3b   : > { %4918 = dma.done.wait (%p6965_p5), [#allocation3], 4096  }
  0x3c   : > { %4920 = vsyncadd (%p6965_p5), [#allocation3], 4294963200 }
  0x3d   : > { %348 = sfence }
  0x3e   : > { %s3975_s27 = sshll.u32 %s4939_s12, 5  ;;  %v4953_v0 = vmov 2   ;;  %v4954_v1 = vmov 1   ;;  %v4726_v2 = vld [vmem:[#allocation6 + $0x74] ss:$8 sps:$4 sm:$0xff]   ;;  %v4955_v4 = vmov 0   ;;  %v597_v47 = vlaneseq }
  0x3f   : > { %4673 = vset.pattern.permute.xlu0 %v4953_v0  ;;  %4672 = vset.pattern.permute.xlu1 %v4954_v1  ;;  %p388_p4 = scmp.lt.s32.totalorder %s3975_s27, 63  ;;  %v4728_v3 = vld [vmem:[#allocation6 + $0x70] ss:$8 sps:$4 sm:$0xff]   ;;  %v4729_v5 = vld [vmem:[#allocation6 + $0x64] ss:$8 sps:$4 sm:$0xff]   ;;  %s1693_s25 = sld [smem:[#allocation2]] }
  0x40   : > { %1252 = vmatprep.mubr.bf16.mxu0 %v4955_v4  ;;  %1220 = vmatprep.subr.bf16.mxu0 %v4726_v2  ;;  %v4731_v6 = vld [vmem:[#allocation6 + $0x60] ss:$8 sps:$4 sm:$0xff]   ;;  %v4732_v10 = vld [vmem:[#allocation6 + $0x54] ss:$8 sps:$4 sm:$0xff]   ;;  %v4734_v11 = vld [vmem:[#allocation6 + $0x50] ss:$8 sps:$4 sm:$0xff]  }
  0x41   : > { %s7020_s27 = smov (!%p388_p4, %s3975_s27), 63  ;;  %1221 = vmatpush1.bf16.msra.mxu0 %v4728_v3  ;;  %v4735_v13 = vld [vmem:[#allocation6 + $0x44] ss:$8 sps:$4 sm:$0xff]   ;;  %v4737_v14 = vld [vmem:[#allocation6 + $0x40] ss:$8 sps:$4 sm:$0xff]   ;;  %v598_v50 = vshrl.u32 %v597_v47, 7 }
  0x42   : > { %s3976_s23 = sshll.u32 %s7020_s27, 3  ;;  %1222 = vmatprep.subr.bf16.mxu0 %v4729_v5  ;;  %v4738_v15 = vld [vmem:[#allocation6 + $0x34] ss:$8 sps:$4 sm:$0xff]   ;;  %v4740_v16 = vld [vmem:[#allocation6 + $0x30] ss:$8 sps:$4 sm:$0xff]   ;;  %s4057_s15 = sld [smem:[#allocation2 + $0x1]] }
  0x43   : > { %s5112_s16 = scalar_lea.vmem %s6900_s1, %s3976_s23  ;;  %v4741_v17 = vld [vmem:[#allocation6 + $0x24] ss:$8 sps:$4 sm:$0xff]   ;;  %v4743_v18 = vld [vmem:[#allocation6 + $0x20] ss:$8 sps:$4 sm:$0xff]   ;;  %v4744_v19 = vld [vmem:[#allocation6 + $0x14] ss:$8 sps:$4 sm:$0xff]  }
  0x44   : > { %v404_v7 = vld [vmem:[%s5112_s16] sm:$0xff]  ;;  %v406_v8 = vld [vmem:[%s5112_s16 + $0x10] sm:$0xff]  ;;  %v405_v9 = vld [vmem:[%s5112_s16 + $0x8] sm:$0xff]  ;;  %v5214_v53 = vsub.s32 1, %v598_v50  ;;  %v5216_v54 = vsub.s32 0, %v598_v50  ;;  %v959_v56 = vsub.s32 2, %v598_v50 }
  0x45   : > { %830 = vperm.xlu0 %4673, %v404_v7   ;;  %634 = vperm.xlu1 %4672, %v404_v7   ;;  %v408_v12 = vld [vmem:[%s5112_s16 + $0x20] sm:$0xff]  ;;  %v407_v20 = vld [vmem:[%s5112_s16 + $0x18] sm:$0xff]  ;;  %v409_v22 = vld [vmem:[%s5112_s16 + $0x28] sm:$0xff]  ;;  %s4101_s24 = sld [smem:[#allocation2 + $0x2]]  ;;  %vm3750_vm0 = vcmask 523264   ;;  %s383_s27 = sand.u32 1, %s4931_s10  }
  0x46   : > { %1223 = vmatpush1.bf16.msra.mxu0 %v4731_v6  ;;  %v4746_v21 = vld [vmem:[#allocation6 + $0x10] ss:$8 sps:$4 sm:$0xff]   ;;  %v4747_v23 = vld [vmem:[#allocation6 + $0x4] ss:$8 sps:$4 sm:$0xff]   ;;  %v4749_v24 = vld [vmem:[#allocation6] ss:$8 sps:$4 sm:$0xff]  }
  0x47   : > { %1224 = vmatprep.subr.bf16.mxu0 %v4732_v10  ;;  %v411_v25 = vld [vmem:[%s5112_s16 + $0x38] sm:$0xff]  ;;  %v413_v26 = vld [vmem:[%s5112_s16 + $0x48] sm:$0xff]  ;;  %v410_v30 = vld [vmem:[%s5112_s16 + $0x30] sm:$0xff]  ;;  %s4154_s18 = sld [smem:[#allocation2 + $0x3]]  ;;  %s3828_s26 = scalar_lea.sflag [#allocation4], %s383_s27 }
  0x48   : > { %v415_v27 = vld [vmem:[%s5112_s16 + $0x58] sm:$0xff]  ;;  %v5130_v28 = vld [vmem:[%s5112_s16 + $0x68] sm:$0xff]  ;;  %v412_v31 = vld [vmem:[%s5112_s16 + $0x40] sm:$0xff]  ;;  %p7010_p10 = scmp.ne.s32.totalorder %s6958_s19, 0 }
  0x49   : > { %838 = vperm.xlu0 %4673, %v406_v8   ;;  %638 = vperm.xlu1 %4672, %v405_v9   ;;  %v5134_v29 = vld [vmem:[%s5112_s16 + $0x78] sm:$0xff]  ;;  %v414_v32 = vld [vmem:[%s5112_s16 + $0x50] sm:$0xff]  ;;  %v416_v33 = vld [vmem:[%s5112_s16 + $0x60] sm:$0xff] }
  0x4a   : > { %1225 = vmatpush1.bf16.msra.mxu0 %v4734_v11  ;;  %v5148_v34 = vld [vmem:[%s5112_s16 + $0x70] sm:$0xff]  ;;  %v5152_v35 = vld [vmem:[%s5112_s16 + $0x80] sm:$0xff]  ;;  %v5166_v38 = vld [vmem:[%s5112_s16 + $0x88] sm:$0xff] }
  0x4b   : > { %1226 = vmatprep.subr.bf16.mxu0 %v4735_v13  ;;  %v5157_v36 = vld [vmem:[%s5112_s16 + $0x90] sm:$0xff]  ;;  %v5162_v37 = vld [vmem:[%s5112_s16 + $0xa0] sm:$0xff]  ;;  %v5172_v39 = vld [vmem:[%s5112_s16 + $0x98] sm:$0xff] }
  0x4c   : > { %v5176_v40 = vld [vmem:[%s5112_s16 + $0xa8] sm:$0xff]  ;;  %v5181_v41 = vld [vmem:[%s5112_s16 + $0xb8] sm:$0xff]  ;;  %v5195_v44 = vld [vmem:[%s5112_s16 + $0xb0] sm:$0xff] }
  0x4d   : > { %846 = vperm.xlu0 %4673, %v408_v12   ;;  %4674 = vset.pattern.permute.xlu1 %v4953_v0  ;;  %v5186_v42 = vld [vmem:[%s5112_s16 + $0xc8] sm:$0xff]  ;;  %v5190_v43 = vld [vmem:[%s5112_s16 + $0xd8] sm:$0xff]  ;;  %v5201_v45 = vld [vmem:[%s5112_s16 + $0xc0] sm:$0xff] }
  0x4e   : > { %834 = vperm.xlu1 %4674, %v405_v9   ;;  %1227 = vmatpush1.bf16.msra.mxu0 %v4737_v14  ;;  %v5206_v46 = vld [vmem:[%s5112_s16 + $0xd0] sm:$0xff]  ;;  %v436_v55 = vld [vmem:[%s6901_s2] sm:$0x7] }
  0x4f   : > { %1228 = vmatprep.subr.bf16.mxu0 %v4738_v15  ;;  %v5225_v59 = vld [vmem:[%s5112_s16 + $0xe0] sm:$0xff]  ;;  %v5228_v60 = vrot.slane %v436_v55, %v5214_v53  ;;  %v5232_v61 = vrot.slane %v436_v55, %v5216_v54  ;;  %v5235_v62 = vrot.slane %v436_v55, %v959_v56 }
  0x50   : > { %v5252_v14 = vld [vmem:[%s6902_s3] ss:$0 sm:$0xff] }
  0x51   : > { %4680 = vset.pattern.permute.xlu0 %v4955_v4 }
  0x52   : > { %439 = vperm.xlu0 %4680, %v404_v7   ;;  %4675 = vset.pattern.permute.xlu1 %v4955_v4 }
  0x53   : > { %449 = vperm.xlu1 %4675, %v406_v8   ;;  %1229 = vmatpush1.bf16.msra.mxu0 %v4740_v16 }
  0x54   : > { %1230 = vmatprep.subr.bf16.mxu0 %v4741_v17 }
  0x56   : > { %444 = vperm.xlu0 %4680, %v405_v9  }
  0x57   : > { %4676 = vset.pattern.permute.xlu1 %v4954_v1  ;;  %1231 = vmatpush1.bf16.msra.mxu0 %v4743_v18 }
  0x58   : > { %642 = vperm.xlu1 %4676, %v406_v8   ;;  %1232 = vmatprep.subr.bf16.mxu0 %v4744_v19 }
  0x5a   : > { %454 = vperm.xlu0 %4680, %v407_v20  }
  0x5b   : > { %1233 = vmatpush1.bf16.msra.mxu0 %v4746_v21 }
  0x5c   : > { %646 = vperm.xlu1 %4676, %v407_v20   ;;  %1234 = vmatprep.subr.bf16.mxu0 %v4747_v23 }
  0x5e   : > { %464 = vperm.xlu0 %4680, %v409_v22  }
  0x5f   : > { %1235 = vmatpush1.bf16.msra.mxu0 %v4749_v24 }
  0x60   : > { %4677 = vset.pattern.permute.xlu1 %v4953_v0 }
  0x61   : > { %842 = vperm.xlu1 %4677, %v407_v20  }
  0x62   : > { %474 = vperm.xlu0 %4680, %v411_v25  }
  0x65   : > { %4678 = vset.pattern.permute.xlu1 %v4955_v4 }
  0x66   : > { %459 = vperm.xlu1 %4678, %v408_v12   ;;  %484 = vperm.xlu0 %4680, %v413_v26  }
  0x6a   : > { %4679 = vset.pattern.permute.xlu1 %v4954_v1  ;;  %494 = vperm.xlu0 %4680, %v415_v27  }
  0x6b   : > { %650 = vperm.xlu1 %4679, %v408_v12   ;;  %v5246_v12 = vld [vmem:[%s5112_s16 + $0xe8] sm:$0xff] }
  0x6e   : > { %504 = vperm.xlu0 %4680, %v5130_v28  }
  0x6f   : > { %654 = vperm.xlu1 %4679, %v409_v22  }
  0x72   : > { %514 = vperm.xlu0 %4680, %v5134_v29  }
  0x73   : > { %4681 = vset.pattern.permute.xlu1 %v4953_v0 }
  0x74   : > { %850 = vperm.xlu1 %4681, %v409_v22  }
  0x76   : > { %4695 = vset.pattern.permute.xlu0 %v4953_v0 }
  0x77   : > { %854 = vperm.xlu0 %4695, %v410_v30  }
  0x78   : > { %4682 = vset.pattern.permute.xlu1 %v4955_v4 }
  0x79   : > { %469 = vperm.xlu1 %4682, %v410_v30  }
  0x7b   : > { %862 = vperm.xlu0 %4695, %v412_v31  }
  0x7d   : > { %4683 = vset.pattern.permute.xlu1 %v4954_v1 }
  0x7e   : > { %658 = vperm.xlu1 %4683, %v410_v30  }
  0x7f   : > { %870 = vperm.xlu0 %4695, %v414_v32  }
  0x82   : > { %662 = vperm.xlu1 %4683, %v411_v25  }
  0x83   : > { %878 = vperm.xlu0 %4695, %v416_v33  }
  0x86   : > { %4684 = vset.pattern.permute.xlu1 %v4953_v0 }
  0x87   : > { %858 = vperm.xlu1 %4684, %v411_v25   ;;  %886 = vperm.xlu0 %4695, %v5148_v34  }
  0x8b   : > { %4685 = vset.pattern.permute.xlu1 %v4955_v4  ;;  %894 = vperm.xlu0 %4695, %v5152_v35  }
  0x8c   : > { %479 = vperm.xlu1 %4685, %v412_v31  }
  0x8f   : > { %902 = vperm.xlu0 %4695, %v5157_v36  }
  0x90   : > { %4686 = vset.pattern.permute.xlu1 %v4954_v1 }
  0x91   : > { %666 = vperm.xlu1 %4686, %v412_v31  }
  0x93   : > { %910 = vperm.xlu0 %4695, %v5162_v37  }
  0x95   : > { %670 = vperm.xlu1 %4686, %v413_v26  }
  0x97   : > { %4706 = vset.pattern.permute.xlu0 %v4955_v4 }
  0x98   : > { %524 = vperm.xlu0 %4706, %v5166_v38  }
  0x99   : > { %4687 = vset.pattern.permute.xlu1 %v4953_v0 }
  0x9a   : > { %866 = vperm.xlu1 %4687, %v413_v26  }
  0x9c   : > { %534 = vperm.xlu0 %4706, %v5172_v39  }
  0x9e   : > { %4688 = vset.pattern.permute.xlu1 %v4955_v4 }
  0x9f   : > { %489 = vperm.xlu1 %4688, %v414_v32  }
  0xa0   : > { %544 = vperm.xlu0 %4706, %v5176_v40  }
  0xa3   : > { %4689 = vset.pattern.permute.xlu1 %v4954_v1 }
  0xa4   : > { %674 = vperm.xlu1 %4689, %v414_v32   ;;  %554 = vperm.xlu0 %4706, %v5181_v41  }
  0xa8   : > { %678 = vperm.xlu1 %4689, %v415_v27   ;;  %564 = vperm.xlu0 %4706, %v5186_v42  }
  0xac   : > { %4690 = vset.pattern.permute.xlu1 %v4953_v0  ;;  %574 = vperm.xlu0 %4706, %v5190_v43  }
  0xad   : > { %874 = vperm.xlu1 %4690, %v415_v27  }
  0xb0   : > { %4715 = vset.pattern.permute.xlu0 %v4953_v0 }
  0xb1   : > { %4691 = vset.pattern.permute.xlu1 %v4955_v4  ;;  %918 = vperm.xlu0 %4715, %v5195_v44  }
  0xb2   : > { %499 = vperm.xlu1 %4691, %v416_v33  }
  0xb5   : > { %926 = vperm.xlu0 %4715, %v5201_v45  }
  0xb6   : > { %4692 = vset.pattern.permute.xlu1 %v4954_v1 }
  0xb7   : > { %682 = vperm.xlu1 %4692, %v416_v33  }
  0xb9   : > { %934 = vperm.xlu0 %4715, %v5206_v46  }
  0xbb   : > { %686 = vperm.xlu1 %4692, %v5130_v28  }
  0xbd   : > { %942 = vperm.xlu0 %4715, %v5225_v59  }
  0xbf   : > { %4693 = vset.pattern.permute.xlu1 %v4953_v0 }
  0xc0   : > { %882 = vperm.xlu1 %4693, %v5130_v28   ;;  %v635_v48 = vpop.permute.xlu1 %634  ;;  %v831_v49 = vpop.permute.xlu0 %830 }
  0xc1   : > { %v765_v2 = vmul.f32 %v5228_v60, %v635_v48  ;;  %v961_v3 = vmul.f32 %v5235_v62, %v831_v49  ;;  %4720 = vset.pattern.permute.xlu0 %v4955_v4  ;;  %v5269_v49 = vld [vmem:[%s5112_s16 + $0xf8] sm:$0xff] }
  0xc2   : > { %584 = vperm.xlu0 %4720, %v5246_v12  }
  0xc4   : > { %4694 = vset.pattern.permute.xlu1 %v4955_v4  ;;  %v639_v51 = vpop.permute.xlu1 %638  ;;  %v839_v52 = vpop.permute.xlu0 %838 }
  0xc5   : > { %509 = vperm.xlu1 %4694, %v5148_v34   ;;  %v766_v9 = vmul.f32 %v5228_v60, %v639_v51  ;;  %v963_v22 = vmul.f32 %v5235_v62, %v839_v52 }
  0xc6   : > { %594 = vperm.xlu0 %4720, %v5269_v49  }
  0xc8   : > { %v5221_v57 = vpop.permute.xlu0 %846 }
  0xc9   : > { %4696 = vset.pattern.permute.xlu1 %v4954_v1  ;;  %v835_v58 = vpop.permute.xlu1 %834 }
  0xca   : > { %690 = vperm.xlu1 %4696, %v5148_v34   ;;  %v962_v15 = vmul.f32 %v5235_v62, %v835_v58  ;;  %4724 = vset.pattern.permute.xlu0 %v4953_v0 }
  0xcd   : > { %v440_v63 = vpop.permute.xlu0 %439 }
  0xce   : > { %v601_v5 = vmul.f32 %v5232_v61, %v440_v63  ;;  %694 = vperm.xlu1 %4696, %v5134_v29   ;;  %v450_v6 = vpop.permute.xlu1 %449  ;;  %v5279_v63 = vld [vmem:[%s5112_s16 + $0xf0] sm:$0xff] }
  0xcf   : > { %v603_v18 = vmul.f32 %v5232_v61, %v450_v6  ;;  %950 = vperm.xlu0 %4724, %v5279_v63  }
  0xd0   : > { %v797_v7 = vadd.f32 %v765_v2, %v601_v5 }
  0xd1   : > { %v445_v8 = vpop.permute.xlu0 %444 }
  0xd2   : > { %v993_v10 = vadd.f32 %v961_v3, %v797_v7  ;;  %v602_v11 = vmul.f32 %v5232_v61, %v445_v8  ;;  %4697 = vset.pattern.permute.xlu1 %v4953_v0  ;;  %v965_v8 = vmul.f32 %v5235_v62, %v5221_v57 }
  0xd3   : > { %890 = vperm.xlu1 %4697, %v5134_v29   ;;  %v643_v13 = vpop.permute.xlu1 %642 }
  0xd4   : > { %v798_v16 = vadd.f32 %v766_v9, %v602_v11  ;;  %v767_v17 = vmul.f32 %v5228_v60, %v643_v13  ;;  %v1032_v21 = vadd.f32 %v5252_v14, %v993_v10 }
  0xd5   : > { %v455_v19 = vpop.permute.xlu0 %454 }
  0xd6   : > { %v994_v20 = vadd.f32 %v962_v15, %v798_v16  ;;  %v799_v23 = vadd.f32 %v767_v17, %v603_v18  ;;  %v604_v26 = vmul.f32 %v5232_v61, %v455_v19  ;;  %v1064_v29 = vmax.f32 %v1032_v21, 0.0 }
  0xd7   : > { %4698 = vset.pattern.permute.xlu1 %v4955_v4  ;;  %v647_v24 = vpop.permute.xlu1 %646 }
  0xd8   : > { %519 = vperm.xlu1 %4698, %v5152_v35   ;;  %v1033_v25 = vadd.f32 %v5252_v14, %v994_v20  ;;  %v768_v27 = vmul.f32 %v5228_v60, %v647_v24  ;;  %v995_v31 = vadd.f32 %v963_v22, %v799_v23 }
  0xd9   : > { %v465_v28 = vpop.permute.xlu0 %464 }
  0xda   : > { %v1065_v30 = vmax.f32 %v1033_v25, 0.0  ;;  %v800_v34 = vadd.f32 %v768_v27, %v604_v26  ;;  %v1034_v51 = vadd.f32 %v5252_v14, %v995_v31 }
  0xdc   : > { %4699 = vset.pattern.permute.xlu1 %v4954_v1  ;;  %v843_v32 = vpop.permute.xlu1 %842  ;;  %v1096_v33 = vpack.c.bf16 %v1065_v30, %v1064_v29  ;;  %v1066_v58 = vmax.f32 %v1034_v51, 0.0 }
  0xdd   : > { %v964_v47 = vmul.f32 %v5235_v62, %v843_v32  ;;  %698 = vperm.xlu1 %4699, %v5152_v35   ;;  %v475_v48 = vpop.permute.xlu0 %474 }
  0xde   : > { %1253 = vmatmul.mubr.bf16.vlgmr.msra.gmra.mxu0 %v1096_v33  ;;  %v608_v32 = vmul.f32 %v5232_v61, %v475_v48 }
  0xdf   : > { %v996_v50 = vadd.f32 %v964_v47, %v800_v34  ;;  %1262 = vmatprep.mubr.bf16.mxu0 %v4955_v4 }
  0xe1   : > { %v1035_v52 = vadd.f32 %v5252_v14, %v996_v50  ;;  %702 = vperm.xlu1 %4699, %v5166_v38   ;;  %v460_v55 = vpop.permute.xlu1 %459  ;;  %v5276_v56 = vpop.permute.xlu0 %484 }
  0xe2   : > { %v605_v6 = vmul.f32 %v5232_v61, %v460_v55 }
  0xe3   : > { %v1067_v35 = vmax.f32 %v1035_v52, 0.0 }
  0xe5   : > { %4700 = vset.pattern.permute.xlu1 %v4953_v0  ;;  %v1097_v2 = vpack.c.bf16 %v1067_v35, %v1066_v58  ;;  %v5287_v7 = vpop.permute.xlu0 %494 }
  0xe6   : > { %898 = vperm.xlu1 %4700, %v5166_v38   ;;  %v651_v3 = vpop.permute.xlu1 %650  ;;  %v606_v38 = vmul.f32 %v5232_v61, %v465_v28 }
  0xe7   : > { %v769_v5 = vmul.f32 %v5228_v60, %v651_v3  ;;  %1263 = vmatmul.mubr.bf16.gmra.mxu0 %v1097_v2 }
  0xe8   : > { %1272 = vmatprep.mubr.bf16.mxu0 %v4955_v4 }
  0xe9   : > { %v801_v9 = vadd.f32 %v769_v5, %v605_v6  ;;  %v5296_v15 = vpop.permute.xlu0 %504 }
  0xea   : > { %4701 = vset.pattern.permute.xlu1 %v4955_v4  ;;  %v655_v10 = vpop.permute.xlu1 %654 }
  0xeb   : > { %529 = vperm.xlu1 %4701, %v5157_v36   ;;  %v770_v11 = vmul.f32 %v5228_v60, %v655_v10  ;;  %v997_v13 = vadd.f32 %v965_v8, %v801_v9 }
  0xed   : > { %v802_v17 = vadd.f32 %v770_v11, %v606_v38  ;;  %v1036_v19 = vadd.f32 %v5252_v14, %v997_v13  ;;  %v5304_v22 = vpop.permute.xlu0 %514  ;;  %v4750_v11 = vld [vmem:[%s6905_s6 + $0x38] sm:$0xff]  }
  0xee   : > { %4303 = vmatprep.subr.bf16.mxu1 %v4750_v11 }
  0xef   : > { %4702 = vset.pattern.permute.xlu1 %v4954_v1  ;;  %v851_v16 = vpop.permute.xlu1 %850  ;;  %v1068_v23 = vmax.f32 %v1036_v19, 0.0  ;;  %4304 = vmatpush3.bf16.msra.mxu1 %v4750_v11 }
  0xf0   : > { %v966_v18 = vmul.f32 %v5235_v62, %v851_v16  ;;  %706 = vperm.xlu1 %4702, %v5157_v36  }
  0xf2   : > { %v998_v57 = vadd.f32 %v966_v18, %v802_v17  ;;  %v855_v27 = vpop.permute.xlu0 %854 }
  0xf3   : > { %v967_v30 = vmul.f32 %v5235_v62, %v855_v27 }
  0xf4   : > { %v1037_v20 = vadd.f32 %v5252_v14, %v998_v57  ;;  %710 = vperm.xlu1 %4702, %v5172_v39   ;;  %v470_v21 = vpop.permute.xlu1 %469 }
  0xf5   : > { %v607_v28 = vmul.f32 %v5232_v61, %v470_v21 }
  0xf6   : > { %v1069_v24 = vmax.f32 %v1037_v20, 0.0 }
  0xf8   : > { %4703 = vset.pattern.permute.xlu1 %v4953_v0  ;;  %v1098_v25 = vpack.c.bf16 %v1069_v24, %v1068_v23  ;;  %v4752_v23 = vld [vmem:[%s6905_s6 + $0x28] sm:$0xff]  }
  0xf9   : > { %906 = vperm.xlu1 %4703, %v5172_v39   ;;  %v659_v26 = vpop.permute.xlu1 %658 }
  0xfa   : > { %v771_v36 = vmul.f32 %v5228_v60, %v659_v26  ;;  %1273 = vmatmul.mubr.bf16.gmra.mxu0 %v1098_v25  ;;  %v4753_v26 = vld [vmem:[%s6905_s6 + $0x20] sm:$0xff]  }
  0xfb   : > { %1282 = vmatprep.mubr.bf16.mxu0 %v4955_v4 }
  0xfc   : > { %v803_v29 = vadd.f32 %v771_v36, %v607_v28 }
  0xfd   : > { %4704 = vset.pattern.permute.xlu1 %v4955_v4  ;;  %v663_v31 = vpop.permute.xlu1 %662 }
  0xfe   : > { %539 = vperm.xlu1 %4704, %v5162_v37   ;;  %v772_v39 = vmul.f32 %v5228_v60, %v663_v31  ;;  %v999_v33 = vadd.f32 %v967_v30, %v803_v29  ;;  %v4754_v30 = vld [vmem:[%s6905_s6 + $0x18] sm:$0xff]  }
 0x100   : > { %v804_v47 = vadd.f32 %v772_v39, %v608_v32  ;;  %v1038_v51 = vadd.f32 %v5252_v14, %v999_v33  ;;  %v612_v39 = vmul.f32 %v5232_v61, %v5287_v7  ;;  %v4756_v7 = vld [vmem:[%s6905_s6 + $0x8] sm:$0xff]  }
 0x102   : > { %4705 = vset.pattern.permute.xlu1 %v4954_v1  ;;  %v859_v34 = vpop.permute.xlu1 %858  ;;  %v1070_v48 = vmax.f32 %v1038_v51, 0.0 }
 0x103   : > { %v968_v50 = vmul.f32 %v5235_v62, %v859_v34  ;;  %714 = vperm.xlu1 %4705, %v5162_v37   ;;  %v863_v37 = vpop.permute.xlu0 %862  ;;  %v4755_v34 = vld [vmem:[%s6905_s6 + $0x10] sm:$0xff]  }
 0x104   : > { %v969_v9 = vmul.f32 %v5235_v62, %v863_v37 }
 0x105   : > { %v1000_v52 = vadd.f32 %v968_v50, %v804_v47 }
 0x107   : > { %v1039_v55 = vadd.f32 %v5252_v14, %v1000_v52  ;;  %718 = vperm.xlu1 %4705, %v5176_v40   ;;  %v480_v58 = vpop.permute.xlu1 %479  ;;  %v871_v28 = vpop.permute.xlu0 %870 }
 0x108   : > { %v609_v6 = vmul.f32 %v5232_v61, %v480_v58  ;;  %v971_v32 = vmul.f32 %v5235_v62, %v871_v28 }
 0x109   : > { %v1071_v35 = vmax.f32 %v1039_v55, 0.0 }
 0x10b   : > { %4707 = vset.pattern.permute.xlu1 %v4953_v0  ;;  %v1099_v2 = vpack.c.bf16 %v1071_v35, %v1070_v48 }
 0x10c   : > { %914 = vperm.xlu1 %4707, %v5176_v40   ;;  %v667_v3 = vpop.permute.xlu1 %666  ;;  %v610_v40 = vmul.f32 %v5232_v61, %v5276_v56  ;;  %v4751_v56 = vld [vmem:[%s6905_s6 + $0x30] sm:$0xff]  }
 0x10d   : > { %v773_v5 = vmul.f32 %v5228_v60, %v667_v3  ;;  %1283 = vmatmul.mubr.bf16.gmra.mxu0 %v1099_v2  ;;  %4305 = vmatprep.subr.bf16.mxu1 %v4751_v56  ;;  %v4757_v2 = vld [vmem:[%s6905_s6] sm:$0xff]  }
 0x10e   : > { %1292 = vmatprep.mubr.bf16.mxu0 %v4955_v4  ;;  %4306 = vmatpush3.bf16.msra.mxu1 %v4751_v56 }
 0x10f   : > { %v805_v8 = vadd.f32 %v773_v5, %v609_v6  ;;  %4307 = vmatprep.subr.bf16.mxu1 %v4752_v23 }
 0x110   : > { %4708 = vset.pattern.permute.xlu1 %v4955_v4  ;;  %v671_v10 = vpop.permute.xlu1 %670 }
 0x111   : > { %549 = vperm.xlu1 %4708, %v5195_v44   ;;  %v774_v38 = vmul.f32 %v5228_v60, %v671_v10  ;;  %v1001_v13 = vadd.f32 %v969_v9, %v805_v8  ;;  %v879_v8 = vpop.permute.xlu0 %878 }
 0x112   : > { %4308 = vmatpush3.bf16.msra.mxu1 %v4752_v23 }
 0x113   : > { %v806_v17 = vadd.f32 %v774_v38, %v610_v40  ;;  %v1040_v57 = vadd.f32 %v5252_v14, %v1001_v13  ;;  %4309 = vmatprep.subr.bf16.mxu1 %v4753_v26  ;;  %v973_v40 = vmul.f32 %v5235_v62, %v879_v8 }
 0x115   : > { %4709 = vset.pattern.permute.xlu1 %v4954_v1  ;;  %v867_v16 = vpop.permute.xlu1 %866  ;;  %v1072_v24 = vmax.f32 %v1040_v57, 0.0 }
 0x116   : > { %v970_v18 = vmul.f32 %v5235_v62, %v867_v16  ;;  %722 = vperm.xlu1 %4709, %v5195_v44   ;;  %4310 = vmatpush3.bf16.msra.mxu1 %v4753_v26 }
 0x117   : > { %4311 = vmatprep.subr.bf16.mxu1 %v4754_v30 }
 0x118   : > { %v1002_v19 = vadd.f32 %v970_v18, %v806_v17 }
 0x11a   : > { %v1041_v20 = vadd.f32 %v5252_v14, %v1002_v19  ;;  %726 = vperm.xlu1 %4709, %v5181_v41   ;;  %v490_v21 = vpop.permute.xlu1 %489  ;;  %4312 = vmatpush3.bf16.msra.mxu1 %v4754_v30 }
 0x11b   : > { %v611_v29 = vmul.f32 %v5232_v61, %v490_v21  ;;  %4313 = vmatprep.subr.bf16.mxu1 %v4755_v34 }
 0x11c   : > { %v1073_v44 = vmax.f32 %v1041_v20, 0.0 }
 0x11e   : > { %4710 = vset.pattern.permute.xlu1 %v4953_v0  ;;  %v1100_v25 = vpack.c.bf16 %v1073_v44, %v1072_v24  ;;  %4314 = vmatpush3.bf16.msra.mxu1 %v4755_v34  ;;  %v887_v44 = vpop.permute.xlu0 %886 }
 0x11f   : > { %922 = vperm.xlu1 %4710, %v5181_v41   ;;  %v675_v36 = vpop.permute.xlu1 %674  ;;  %4315 = vmatprep.subr.bf16.mxu1 %v4756_v7 }
 0x120   : > { %v775_v27 = vmul.f32 %v5228_v60, %v675_v36  ;;  %1293 = vmatmul.mubr.bf16.gmra.mxu0 %v1100_v25  ;;  %v975_v36 = vmul.f32 %v5235_v62, %v887_v44 }
 0x121   : > { %1302 = vmatprep.mubr.bf16.mxu0 %v4955_v4 }
 0x122   : > { %v807_v31 = vadd.f32 %v775_v27, %v611_v29  ;;  %4316 = vmatpush3.bf16.msra.mxu1 %v4756_v7  ;;  %v895_v28 = vpop.permute.xlu0 %894 }
 0x123   : > { %4711 = vset.pattern.permute.xlu1 %v4955_v4  ;;  %v679_v41 = vpop.permute.xlu1 %678  ;;  %4317 = vmatprep.subr.bf16.mxu1 %v4757_v2 }
 0x124   : > { %559 = vperm.xlu1 %4711, %v5201_v45   ;;  %v776_v33 = vmul.f32 %v5228_v60, %v679_v41  ;;  %v1003_v47 = vadd.f32 %v971_v32, %v807_v31 }
 0x126   : > { %v808_v51 = vadd.f32 %v776_v33, %v612_v39  ;;  %v1042_v55 = vadd.f32 %v5252_v14, %v1003_v47  ;;  %4318 = vmatpush3.bf16.msra.mxu1 %v4757_v2  ;;  %v903_v39 = vpop.permute.xlu0 %902 }
 0x128   : > { %4712 = vset.pattern.permute.xlu1 %v4954_v1  ;;  %v875_v50 = vpop.permute.xlu1 %874 }
 0x129   : > { %v972_v52 = vmul.f32 %v5235_v62, %v875_v50  ;;  %730 = vperm.xlu1 %4712, %v5201_v45   ;;  %v1074_v45 = vmax.f32 %v1042_v55, 0.0 }
 0x12b   : > { %v1004_v58 = vadd.f32 %v972_v52, %v808_v51  ;;  %v911_v52 = vpop.permute.xlu0 %910 }
 0x12d   : > { %v1043_v48 = vadd.f32 %v5252_v14, %v1004_v58  ;;  %734 = vperm.xlu1 %4712, %v5186_v42   ;;  %v500_v35 = vpop.permute.xlu1 %499 }
 0x12e   : > { %v613_v9 = vmul.f32 %v5232_v61, %v500_v35  ;;  %v977_v35 = vmul.f32 %v5235_v62, %v895_v28 }
 0x12f   : > { %v1075_v3 = vmax.f32 %v1043_v48, 0.0  ;;  %v525_v48 = vpop.permute.xlu0 %524 }
 0x131   : > { %4713 = vset.pattern.permute.xlu1 %v4953_v0  ;;  %v1101_v5 = vpack.c.bf16 %v1075_v3, %v1074_v45  ;;  %v618_v3 = vmul.f32 %v5232_v61, %v525_v48 }
 0x132   : > { %930 = vperm.xlu1 %4713, %v5186_v42   ;;  %v683_v37 = vpop.permute.xlu1 %682  ;;  %v614_v42 = vmul.f32 %v5232_v61, %v5296_v15 }
 0x133   : > { %v777_v6 = vmul.f32 %v5228_v60, %v683_v37  ;;  %1303 = vmatmul.mubr.bf16.gmra.mxu0 %v1101_v5 }
 0x134   : > { %1312 = vmatprep.mubr.bf16.mxu0 %v4955_v4 }
 0x135   : > { %v809_v10 = vadd.f32 %v777_v6, %v613_v9 }
 0x136   : > { %4714 = vset.pattern.permute.xlu1 %v4955_v4  ;;  %v687_v38 = vpop.permute.xlu1 %686 }
 0x137   : > { %569 = vperm.xlu1 %4714, %v5206_v46   ;;  %v778_v11 = vmul.f32 %v5228_v60, %v687_v38  ;;  %v1005_v13 = vadd.f32 %v973_v40, %v809_v10 }
 0x139   : > { %v810_v17 = vadd.f32 %v778_v11, %v614_v42  ;;  %v1044_v56 = vadd.f32 %v5252_v14, %v1005_v13 }
 0x13b   : > { %4716 = vset.pattern.permute.xlu1 %v4954_v1  ;;  %v883_v16 = vpop.permute.xlu1 %882  ;;  %v1076_v15 = vmax.f32 %v1044_v56, 0.0 }
 0x13c   : > { %v974_v18 = vmul.f32 %v5235_v62, %v883_v16  ;;  %738 = vperm.xlu1 %4716, %v5206_v46  }
 0x13e   : > { %v1006_v57 = vadd.f32 %v974_v18, %v810_v17  ;;  %v535_v17 = vpop.permute.xlu0 %534  ;;  %v979_v18 = vmul.f32 %v5235_v62, %v903_v39 }
 0x140   : > { %v1045_v19 = vadd.f32 %v5252_v14, %v1006_v57  ;;  %742 = vperm.xlu1 %4716, %v5190_v43   ;;  %v510_v20 = vpop.permute.xlu1 %509 }
 0x141   : > { %v615_v46 = vmul.f32 %v5232_v61, %v510_v20 }
 0x142   : > { %v1077_v21 = vmax.f32 %v1045_v19, 0.0  ;;  %v620_v19 = vmul.f32 %v5232_v61, %v535_v17 }
 0x144   : > { %4717 = vset.pattern.permute.xlu1 %v4953_v0  ;;  %v1102_v23 = vpack.c.bf16 %v1077_v21, %v1076_v15 }
 0x145   : > { %938 = vperm.xlu1 %4717, %v5190_v43   ;;  %v691_v24 = vpop.permute.xlu1 %690  ;;  %v616_v43 = vmul.f32 %v5232_v61, %v5304_v22 }
 0x146   : > { %v779_v25 = vmul.f32 %v5228_v60, %v691_v24  ;;  %1313 = vmatmul.mubr.bf16.gmra.mxu0 %v1102_v23 }
 0x147   : > { %1322 = vmatprep.mubr.bf16.mxu0 %v4955_v4 }
 0x148   : > { %v811_v26 = vadd.f32 %v779_v25, %v615_v46  ;;  %v545_v46 = vpop.permute.xlu0 %544 }
 0x149   : > { %4718 = vset.pattern.permute.xlu1 %v4955_v4  ;;  %v695_v27 = vpop.permute.xlu1 %694  ;;  %v622_v39 = vmul.f32 %v5232_v61, %v545_v46 }
 0x14a   : > { %579 = vperm.xlu1 %4718, %v5225_v59   ;;  %v780_v29 = vmul.f32 %v5228_v60, %v695_v27  ;;  %v1007_v30 = vadd.f32 %v975_v36, %v811_v26 }
 0x14c   : > { %v812_v32 = vadd.f32 %v780_v29, %v616_v43  ;;  %v1046_v33 = vadd.f32 %v5252_v14, %v1007_v30  ;;  %v555_v30 = vpop.permute.xlu0 %554 }
 0x14e   : > { %4719 = vset.pattern.permute.xlu1 %v4954_v1  ;;  %v891_v31 = vpop.permute.xlu1 %890  ;;  %v1078_v50 = vmax.f32 %v1046_v33, 0.0 }
 0x14f   : > { %v976_v41 = vmul.f32 %v5235_v62, %v891_v31  ;;  %746 = vperm.xlu1 %4719, %v5225_v59   ;;  %v981_v31 = vmul.f32 %v5235_v62, %v911_v52 }
 0x151   : > { %v1008_v34 = vadd.f32 %v976_v41, %v812_v32 }
 0x153   : > { %v1047_v47 = vadd.f32 %v5252_v14, %v1008_v34  ;;  %750 = vperm.xlu1 %4719, %v5246_v12   ;;  %v520_v22 = vpop.permute.xlu1 %519 }
 0x154   : > { %v617_v58 = vmul.f32 %v5232_v61, %v520_v22 }
 0x155   : > { %v1079_v51 = vmax.f32 %v1047_v47, 0.0  ;;  %v565_v47 = vpop.permute.xlu0 %564 }
 0x157   : > { %4721 = vset.pattern.permute.xlu1 %v4953_v0  ;;  %v1103_v7 = vpack.c.bf16 %v1079_v51, %v1078_v50 }
 0x158   : > { %946 = vperm.xlu1 %4721, %v5246_v12   ;;  %v699_v55 = vpop.permute.xlu1 %698 }
 0x159   : > { %v781_v59 = vmul.f32 %v5228_v60, %v699_v55  ;;  %1323 = vmatmul.mubr.bf16.gmra.mxu0 %v1103_v7  ;;  %v5450_v48 = vpop.permute.xlu0 %574 }
 0x15a   : > { %1332 = vmatprep.mubr.bf16.mxu0 %v4955_v4 }
 0x15b   : > { %v813_v2 = vadd.f32 %v781_v59, %v617_v58 }
 0x15c   : > { %4722 = vset.pattern.permute.xlu1 %v4955_v4  ;;  %v703_v45 = vpop.permute.xlu1 %702 }
 0x15d   : > { %589 = vperm.xlu1 %4722, %v5279_v63   ;;  %v782_v12 = vmul.f32 %v5228_v60, %v703_v45  ;;  %v1009_v5 = vadd.f32 %v977_v35, %v813_v2 }
 0x15f   : > { %v814_v6 = vadd.f32 %v782_v12, %v618_v3  ;;  %v1048_v10 = vadd.f32 %v5252_v14, %v1009_v5  ;;  %v919_v12 = vpop.permute.xlu0 %918 }
 0x161   : > { %4723 = vset.pattern.permute.xlu1 %v4954_v1  ;;  %v899_v37 = vpop.permute.xlu1 %898  ;;  %v1080_v11 = vmax.f32 %v1048_v10, 0.0 }
 0x162   : > { %v978_v8 = vmul.f32 %v5235_v62, %v899_v37  ;;  %754 = vperm.xlu1 %4723, %v5279_v63  }
 0x164   : > { %v1010_v9 = vadd.f32 %v978_v8, %v814_v6  ;;  %v983_v6 = vmul.f32 %v5235_v62, %v919_v12 }
 0x166   : > { %v1049_v40 = vadd.f32 %v5252_v14, %v1010_v9  ;;  %758 = vperm.xlu1 %4723, %v5269_v49   ;;  %v530_v38 = vpop.permute.xlu1 %529  ;;  %v624_v9 = vmul.f32 %v5232_v61, %v555_v30 }
 0x167   : > { %v619_v63 = vmul.f32 %v5232_v61, %v530_v38 }
 0x168   : > { %v1081_v42 = vmax.f32 %v1049_v40, 0.0 }
 0x16a   : > { %4725 = vset.pattern.permute.xlu1 %v4953_v0  ;;  %v1104_v13 = vpack.c.bf16 %v1081_v42, %v1080_v11 }
 0x16b   : > { %954 = vperm.xlu1 %4725, %v5269_v49   ;;  %v707_v1 = vpop.permute.xlu1 %706 }
 0x16c   : > { %v783_v16 = vmul.f32 %v5228_v60, %v707_v1  ;;  %1333 = vmatmul.mubr.bf16.gmra.mxu0 %v1104_v13 }
 0x16d   : > { %1342 = vmatprep.mubr.bf16.mxu0 %v4955_v4 }
 0x16e   : > { %v815_v56 = vadd.f32 %v783_v16, %v619_v63  ;;  %v5463_v16 = vld [vmem:[%s6904_s5] sm:$0x3] }
 0x16f   : > { %v711_v57 = vpop.permute.xlu1 %710 }
 0x170   : > { %v784_v0 = vmul.f32 %v5228_v60, %v711_v57  ;;  %v1011_v20 = vadd.f32 %v979_v18, %v815_v56  ;;  %v5470_v56 = vrot.slane %v5463_v16, %v5214_v53 }
 0x172   : > { %v816_v49 = vadd.f32 %v784_v0, %v620_v19  ;;  %v1050_v24 = vadd.f32 %v5252_v14, %v1011_v20 }
 0x174   : > { %v907_v15 = vpop.permute.xlu1 %906  ;;  %v1082_v36 = vmax.f32 %v1050_v24, 0.0 }
 0x175   : > { %v980_v21 = vmul.f32 %v5235_v62, %v907_v15 }
 0x177   : > { %v1012_v23 = vadd.f32 %v980_v21, %v816_v49 }
 0x179   : > { %v1051_v44 = vadd.f32 %v5252_v14, %v1012_v23  ;;  %v540_v25 = vpop.permute.xlu1 %539 }
 0x17a   : > { %v621_v29 = vmul.f32 %v5232_v61, %v540_v25  ;;  %v927_v25 = vpop.permute.xlu0 %926 }
 0x17b   : > { %v1083_v26 = vmax.f32 %v1051_v44, 0.0 }
 0x17d   : > { %v1105_v27 = vpack.c.bf16 %v1083_v26, %v1082_v36 }
 0x17e   : > { %v715_v28 = vpop.permute.xlu1 %714 }
 0x17f   : > { %v785_v43 = vmul.f32 %v5228_v60, %v715_v28  ;;  %1343 = vmatmul.mubr.bf16.gmra.mxu0 %v1105_v27 }
 0x180   : > { %1352 = vmatprep.mubr.bf16.mxu0 %v4955_v4 }
 0x181   : > { %v817_v32 = vadd.f32 %v785_v43, %v621_v29  ;;  %v985_v43 = vmul.f32 %v5235_v62, %v927_v25 }
 0x182   : > { %v719_v41 = vpop.permute.xlu1 %718 }
 0x183   : > { %v786_v33 = vmul.f32 %v5228_v60, %v719_v41  ;;  %v1013_v34 = vadd.f32 %v981_v31, %v817_v32  ;;  %v626_v32 = vmul.f32 %v5232_v61, %v565_v47 }
 0x185   : > { %v818_v50 = vadd.f32 %v786_v33, %v622_v39  ;;  %v1052_v55 = vadd.f32 %v5252_v14, %v1013_v34 }
 0x187   : > { %v915_v22 = vpop.permute.xlu1 %914  ;;  %v1084_v35 = vmax.f32 %v1052_v55, 0.0 }
 0x188   : > { %v982_v51 = vmul.f32 %v5235_v62, %v915_v22 }
 0x18a   : > { %v1014_v7 = vadd.f32 %v982_v51, %v818_v50 }
 0x18c   : > { %v1053_v59 = vadd.f32 %v5252_v14, %v1014_v7  ;;  %v550_v58 = vpop.permute.xlu1 %549 }
 0x18d   : > { %v623_v5 = vmul.f32 %v5232_v61, %v550_v58 }
 0x18e   : > { %v1085_v52 = vmax.f32 %v1053_v59, 0.0 }
 0x190   : > { %v1106_v2 = vpack.c.bf16 %v1085_v52, %v1084_v35 }
 0x191   : > { %v723_v45 = vpop.permute.xlu1 %722 }
 0x192   : > { %v787_v3 = vmul.f32 %v5228_v60, %v723_v45  ;;  %1353 = vmatmul.mubr.bf16.gmra.mxu0 %v1106_v2 }
 0x193   : > { %1362 = vmatprep.mubr.bf16.mxu0 %v4955_v4 }
 0x194   : > { %v819_v37 = vadd.f32 %v787_v3, %v623_v5 }
 0x195   : > { %v727_v8 = vpop.permute.xlu1 %726 }
 0x196   : > { %v788_v10 = vmul.f32 %v5228_v60, %v727_v8  ;;  %v1015_v40 = vadd.f32 %v983_v6, %v819_v37  ;;  %v935_v8 = vpop.permute.xlu0 %934 }
 0x198   : > { %v820_v42 = vadd.f32 %v788_v10, %v624_v9  ;;  %v1054_v13 = vadd.f32 %v5252_v14, %v1015_v40 }
 0x19a   : > { %v923_v38 = vpop.permute.xlu1 %922  ;;  %v1086_v19 = vmax.f32 %v1054_v13, 0.0 }
 0x19b   : > { %v984_v11 = vmul.f32 %v5235_v62, %v923_v38  ;;  %v987_v38 = vmul.f32 %v5235_v62, %v935_v8 }
 0x19d   : > { %v1016_v1 = vadd.f32 %v984_v11, %v820_v42 }
 0x19e   : > { %v5465_v63 = vpop.f32.mrf.mxu0 }
 0x19f   : > { %v1055_v17 = vadd.f32 %v5252_v14, %v1016_v1  ;;  %v560_v18 = vpop.permute.xlu1 %559 }
 0x1a0   : > { %v1256_v57 = vpop.f32.mrf.mxu0  ;;  %v625_v46 = vmul.f32 %v5232_v61, %v560_v18 }
 0x1a1   : > { %v1087_v0 = vmax.f32 %v1055_v17, 0.0  ;;  %v1257_v15 = vadd.f32 %v1256_v57, %v5470_v56  ;;  %v628_v17 = vmul.f32 %v5232_v61, %v5450_v48 }
 0x1a2   : > { %v5472_v20 = vpop.f32.mrf.mxu0 }
 0x1a3   : > { %v1107_v49 = vpack.c.bf16 %v1087_v0, %v1086_v19  ;;  %v1413_v26 = vmax.f32 %v1257_v15, 0.0 }
 0x1a4   : > { %v1260_v21 = vpop.f32.mrf.mxu0  ;;  %v731_v23 = vpop.permute.xlu1 %730 }
 0x1a5   : > { %v1261_v24 = vadd.f32 %v1260_v21, %v5470_v56  ;;  %v789_v44 = vmul.f32 %v5228_v60, %v731_v23  ;;  %1363 = vmatmul.mubr.bf16.gmra.mxu0 %v1107_v49 }
 0x1a6   : > { %1372 = vmatprep.mubr.bf16.mxu0 %v4955_v4 }
 0x1a7   : > { %v5479_v36 = vpop.f32.mrf.mxu0  ;;  %v1414_v27 = vmax.f32 %v1261_v24, 0.0  ;;  %v821_v28 = vadd.f32 %v789_v44, %v625_v46 }
 0x1a8   : > { %v735_v29 = vpop.permute.xlu1 %734 }
 0x1a9   : > { %v1266_v30 = vpop.f32.mrf.mxu0  ;;  %v1445_v31 = vpack.c.bf16 %v1414_v27, %v1413_v26  ;;  %v790_v41 = vmul.f32 %v5228_v60, %v735_v29  ;;  %v1017_v33 = vadd.f32 %v985_v43, %v821_v28  ;;  %v943_v43 = vpop.permute.xlu0 %942 }
 0x1aa   : > { %v1267_v34 = vadd.f32 %v1266_v30, %v5470_v56 }
 0x1ab   : > { %v5484_v39 = vpop.f32.mrf.mxu0  ;;  %4319 = vmatprep.mubr.bf16.mxu1 %v1445_v31  ;;  %v822_v51 = vadd.f32 %v790_v41, %v626_v32  ;;  %v1056_v59 = vadd.f32 %v5252_v14, %v1017_v33 }
 0x1ac   : > { %v1415_v58 = vmax.f32 %v1267_v34, 0.0 }
 0x1ad   : > { %v1270_v22 = vpop.f32.mrf.mxu0  ;;  %v931_v50 = vpop.permute.xlu1 %930  ;;  %v1088_v3 = vmax.f32 %v1056_v59, 0.0 }
 0x1ae   : > { %v1271_v7 = vadd.f32 %v1270_v22, %v5470_v56  ;;  %v986_v55 = vmul.f32 %v5235_v62, %v931_v50  ;;  %v585_v33 = vpop.permute.xlu0 %584 }
 0x1b0   : > { %v1416_v52 = vmax.f32 %v1271_v7, 0.0  ;;  %v1018_v47 = vadd.f32 %v986_v55, %v822_v51  ;;  %v989_v51 = vmul.f32 %v5235_v62, %v943_v43  ;;  %v630_v7 = vmul.f32 %v5232_v61, %v585_v33 }
 0x1b2   : > { %v1057_v35 = vadd.f32 %v5252_v14, %v1018_v47  ;;  %v570_v2 = vpop.permute.xlu1 %569  ;;  %v1446_v45 = vpack.c.bf16 %v1416_v52, %v1415_v58 }
 0x1b3   : > { %v627_v9 = vmul.f32 %v5232_v61, %v570_v2 }
 0x1b4   : > { %v1089_v12 = vmax.f32 %v1057_v35, 0.0  ;;  %4320 = vmatmul.mubr.bf16.vlgmr.msra.gmra.mxu1 %v1446_v45 }
 0x1b6   : > { %v1108_v5 = vpack.c.bf16 %v1089_v12, %v1088_v3 }
 0x1b7   : > { %v739_v37 = vpop.permute.xlu1 %738 }
 0x1b8   : > { %v791_v6 = vmul.f32 %v5228_v60, %v739_v37  ;;  %1373 = vmatmul.mubr.bf16.gmra.mxu0 %v1108_v5 }
 0x1b9   : > { %1382 = vmatprep.mubr.bf16.mxu0 %v4955_v4 }
 0x1ba   : > { %v5494_v10 = vpop.f32.mrf.mxu0  ;;  %v823_v40 = vadd.f32 %v791_v6, %v627_v9 }
 0x1bb   : > { %v743_v42 = vpop.permute.xlu1 %742 }
 0x1bc   : > { %v1276_v11 = vpop.f32.mrf.mxu0  ;;  %v792_v13 = vmul.f32 %v5228_v60, %v743_v42  ;;  %v1019_v18 = vadd.f32 %v987_v38, %v823_v40  ;;  %v595_v38 = vpop.permute.xlu0 %594 }
 0x1bd   : > { %v1277_v57 = vadd.f32 %v1276_v11, %v5470_v56 }
 0x1be   : > { %v5498_v1 = vpop.f32.mrf.mxu0  ;;  %v824_v15 = vadd.f32 %v792_v13, %v628_v17  ;;  %v1058_v23 = vadd.f32 %v5252_v14, %v1019_v18 }
 0x1bf   : > { %v1417_v24 = vmax.f32 %v1277_v57, 0.0 }
 0x1c0   : > { %v1280_v19 = vpop.f32.mrf.mxu0  ;;  %v939_v0 = vpop.permute.xlu1 %938  ;;  %v1090_v48 = vmax.f32 %v1058_v23, 0.0 }
 0x1c1   : > { %v1281_v49 = vadd.f32 %v1280_v19, %v5470_v56  ;;  %v988_v21 = vmul.f32 %v5235_v62, %v939_v0  ;;  %v951_v57 = vpop.permute.xlu0 %950 }
 0x1c3   : > { %v1418_v44 = vmax.f32 %v1281_v49, 0.0  ;;  %v1020_v25 = vadd.f32 %v988_v21, %v824_v15  ;;  %v991_v49 = vmul.f32 %v5235_v62, %v951_v57 }
 0x1c5   : > { %v1059_v46 = vadd.f32 %v5252_v14, %v1020_v25  ;;  %v580_v26 = vpop.permute.xlu1 %579  ;;  %v1447_v27 = vpack.c.bf16 %v1418_v44, %v1417_v24  ;;  %v632_v25 = vmul.f32 %v5232_v61, %v595_v38 }
 0x1c6   : > { %v629_v32 = vmul.f32 %v5232_v61, %v580_v26 }
 0x1c7   : > { %v1091_v28 = vmax.f32 %v1059_v46, 0.0  ;;  %4323 = vmatprep.mubr.bf16.mxu1 %v1447_v27 }
 0x1c9   : > { %v1109_v29 = vpack.c.bf16 %v1091_v28, %v1090_v48 }
 0x1ca   : > { %v747_v30 = vpop.permute.xlu1 %746 }
 0x1cb   : > { %v793_v31 = vmul.f32 %v5228_v60, %v747_v30  ;;  %1383 = vmatmul.mubr.bf16.gmra.mxu0 %v1109_v29 }
 0x1cc   : > { %1392 = vmatprep.mubr.bf16.mxu0 %v4955_v4 }
 0x1cd   : > { %v5510_v41 = vpop.f32.mrf.mxu0  ;;  %v825_v34 = vadd.f32 %v793_v31, %v629_v32 }
 0x1ce   : > { %v751_v22 = vpop.permute.xlu1 %750 }
 0x1cf   : > { %v1286_v50 = vpop.f32.mrf.mxu0  ;;  %v794_v55 = vmul.f32 %v5228_v60, %v751_v22  ;;  %v1021_v58 = vadd.f32 %v989_v51, %v825_v34 }
 0x1d0   : > { %v1287_v52 = vadd.f32 %v1286_v50, %v5470_v56 }
 0x1d1   : > { %v5515_v59 = vpop.f32.mrf.mxu0  ;;  %v826_v2 = vadd.f32 %v794_v55, %v630_v7  ;;  %v1060_v6 = vadd.f32 %v5252_v14, %v1021_v58 }
 0x1d2   : > { %v1419_v12 = vmax.f32 %v1287_v52, 0.0 }
 0x1d3   : > { %v1290_v47 = vpop.f32.mrf.mxu0  ;;  %v947_v35 = vpop.permute.xlu1 %946  ;;  %v1092_v11 = vmax.f32 %v1060_v6, 0.0 }
 0x1d4   : > { %v1291_v45 = vadd.f32 %v1290_v47, %v5470_v56  ;;  %v990_v3 = vmul.f32 %v5235_v62, %v947_v35 }
 0x1d6   : > { %v1420_v5 = vmax.f32 %v1291_v45, 0.0  ;;  %v1022_v37 = vadd.f32 %v990_v3, %v826_v2 }
 0x1d8   : > { %v1061_v8 = vadd.f32 %v5252_v14, %v1022_v37  ;;  %v590_v9 = vpop.permute.xlu1 %589  ;;  %v1448_v40 = vpack.c.bf16 %v1420_v5, %v1419_v12 }
 0x1d9   : > { %v631_v19 = vmul.f32 %v5232_v61, %v590_v9 }
 0x1da   : > { %v1093_v42 = vmax.f32 %v1061_v8, 0.0  ;;  %4324 = vmatmul.mubr.bf16.gmra.mxu1 %v1448_v40 }
 0x1dc   : > { %v1110_v13 = vpack.c.bf16 %v1093_v42, %v1092_v11 }
 0x1dd   : > { %v755_v17 = vpop.permute.xlu1 %754 }
 0x1de   : > { %v795_v18 = vmul.f32 %v5228_v60, %v755_v17  ;;  %1393 = vmatmul.mubr.bf16.gmra.mxu0 %v1110_v13 }
 0x1df   : > { %1402 = vmatprep.mubr.bf16.mxu0 %v4955_v4 }
 0x1e0   : > { %v5525_v0 = vpop.f32.mrf.mxu0  ;;  %v827_v15 = vadd.f32 %v795_v18, %v631_v19 }
 0x1e1   : > { %v759_v21 = vpop.permute.xlu1 %758 }
 0x1e2   : > { %v1296_v23 = vpop.f32.mrf.mxu0  ;;  %v796_v24 = vmul.f32 %v5228_v60, %v759_v21  ;;  %v1023_v46 = vadd.f32 %v991_v49, %v827_v15  ;;  %v4758_v15 = vld [vmem:[%s6905_s6 + $0x78] sm:$0xff]   ;;  %v4759_v49 = vld [vmem:[%s6905_s6 + $0x70] sm:$0xff]   ;;  %v4760_v21 = vld [vmem:[%s6905_s6 + $0x68] sm:$0xff]  }
 0x1e3   : > { %v1297_v26 = vadd.f32 %v1296_v23, %v5470_v56  ;;  %4351 = vmatprep.subr.bf16.mxu1 %v4758_v15 }
 0x1e4   : > { %v5529_v44 = vpop.f32.mrf.mxu0  ;;  %v828_v28 = vadd.f32 %v796_v24, %v632_v25  ;;  %v1062_v30 = vadd.f32 %v5252_v14, %v1023_v46  ;;  %4352 = vmatpush3.bf16.msra.mxu1 %v4758_v15 }
 0x1e5   : > { %v1421_v31 = vmax.f32 %v1297_v26, 0.0  ;;  %4353 = vmatprep.subr.bf16.mxu1 %v4759_v49  ;;  %v4761_v26 = vld [vmem:[%s6905_s6 + $0x60] sm:$0xff]  }
 0x1e6   : > { %v1300_v27 = vpop.f32.mrf.mxu0  ;;  %v955_v48 = vpop.permute.xlu1 %954  ;;  %v1094_v22 = vmax.f32 %v1062_v30, 0.0 }
 0x1e7   : > { %v1301_v43 = vadd.f32 %v1300_v27, %v5470_v56  ;;  %v992_v29 = vmul.f32 %v5235_v62, %v955_v48 }
 0x1e8   : > { %4354 = vmatpush3.bf16.msra.mxu1 %v4759_v49  ;;  %v5605_v49 = vrot.slane %v5463_v16, %v5216_v54  ;;  %v5619_v16 = vstv %s1693_s25 }
 0x1e9   : > { %v1422_v32 = vmax.f32 %v1301_v43, 0.0  ;;  %v1024_v33 = vadd.f32 %v992_v29, %v828_v28  ;;  %4355 = vmatprep.subr.bf16.mxu1 %v4760_v21  ;;  %v4762_v29 = vld [vmem:[%s6905_s6 + $0x58] sm:$0xff]  }
 0x1eb   : > { %v1063_v60 = vadd.f32 %v5252_v14, %v1024_v33  ;;  %v1449_v34 = vpack.c.bf16 %v1422_v32, %v1421_v31  ;;  %v4763_v31 = vld [vmem:[%s6905_s6 + $0x50] sm:$0xff]   ;;  %v4764_v32 = vld [vmem:[%s6905_s6 + $0x48] sm:$0xff]  }
 0x1ec   : > { %4356 = vmatpush3.bf16.msra.mxu1 %v4760_v21  ;;  %v5610_v21 = vld [vmem:[%s6906_s7] ss:$0 sm:$0xff] }
 0x1ed   : > { %v1095_v61 = vmax.f32 %v1063_v60, 0.0  ;;  %4327 = vmatprep.mubr.bf16.mxu1 %v1449_v34  ;;  %4357 = vmatprep.subr.bf16.mxu1 %v4761_v26  ;;  %v4765_v34 = vld [vmem:[%s6905_s6 + $0x40] sm:$0xff]  }
 0x1ef   : > { %v1111_v50 = vpack.c.bf16 %v1095_v61, %v1094_v22 }
 0x1f0   : > { %4358 = vmatpush3.bf16.msra.mxu1 %v4761_v26  ;;  %v1269_v26 = vadd.f32 %v5484_v39, %v5605_v49 }
 0x1f1   : > { %1403 = vmatmul.mubr.bf16.gmra.mxu0 %v1111_v50  ;;  %4359 = vmatprep.subr.bf16.mxu1 %v4762_v29 }
 0x1f2   : > { %v1698_v39 = vmul.f32 %v5619_v16, %v1269_v26 }
 0x1f3   : > { %v5537_v51 = vpop.f32.mrf.mxu0 }
 0x1f4   : > { %4360 = vmatpush3.bf16.msra.mxu1 %v4762_v29  ;;  %v1259_v29 = vadd.f32 %v5472_v20, %v5605_v49 }
 0x1f5   : > { %v1306_v7 = vpop.f32.mrf.mxu0  ;;  %4361 = vmatprep.subr.bf16.mxu1 %v4763_v31 }
 0x1f6   : > { %v1307_v62 = vadd.f32 %v1306_v7, %v5470_v56 }
 0x1f7   : > { %v5539_v55 = vpop.f32.mrf.mxu0 }
 0x1f8   : > { %v1423_v47 = vmax.f32 %v1307_v62, 0.0  ;;  %4362 = vmatpush3.bf16.msra.mxu1 %v4763_v31 }
 0x1f9   : > { %v1310_v58 = vpop.f32.mrf.mxu0  ;;  %4363 = vmatprep.subr.bf16.mxu1 %v4764_v32 }
 0x1fa   : > { %v1311_v52 = vadd.f32 %v1310_v58, %v5470_v56 }
 0x1fc   : > { %v1424_v35 = vmax.f32 %v1311_v52, 0.0  ;;  %4364 = vmatpush3.bf16.msra.mxu1 %v4764_v32 }
 0x1fd   : > { %4365 = vmatprep.subr.bf16.mxu1 %v4765_v34 }
 0x1fe   : > { %v1450_v2 = vpack.c.bf16 %v1424_v35, %v1423_v47 }
 0x200   : > { %4328 = vmatmul.mubr.bf16.gmra.mxu1 %v1450_v2 }
 0x201   : > { %4366 = vmatpush3.bf16.msra.mxu1 %v4765_v34 }
 0x206   : > { %v5543_v14 = vpop.f32.mrf.mxu0 }
 0x208   : > { %v1316_v45 = vpop.f32.mrf.mxu0 }
 0x209   : > { %v1317_v12 = vadd.f32 %v1316_v45, %v5470_v56 }
 0x20a   : > { %v5545_v3 = vpop.f32.mrf.mxu0 }
 0x20b   : > { %v1425_v6 = vmax.f32 %v1317_v12, 0.0 }
 0x20c   : > { %v1320_v5 = vpop.f32.mrf.mxu0 }
 0x20d   : > { %v1321_v37 = vadd.f32 %v1320_v5, %v5470_v56 }
 0x20f   : > { %v1426_v8 = vmax.f32 %v1321_v37, 0.0 }
 0x211   : > { %v1451_v9 = vpack.c.bf16 %v1426_v8, %v1425_v6 }
 0x213   : > { %4331 = vmatprep.mubr.bf16.mxu1 %v1451_v9 }
 0x219   : > { %v5549_v40 = vpop.f32.mrf.mxu0 }
 0x21b   : > { %v1326_v38 = vpop.f32.mrf.mxu0 }
 0x21c   : > { %v1327_v11 = vadd.f32 %v1326_v38, %v5470_v56 }
 0x21d   : > { %v5551_v42 = vpop.f32.mrf.mxu0 }
 0x21e   : > { %v1427_v18 = vmax.f32 %v1327_v11, 0.0 }
 0x21f   : > { %v1330_v13 = vpop.f32.mrf.mxu0 }
 0x220   : > { %v1331_v17 = vadd.f32 %v1330_v13, %v5470_v56 }
 0x222   : > { %v1428_v57 = vmax.f32 %v1331_v17, 0.0 }
 0x224   : > { %v1452_v19 = vpack.c.bf16 %v1428_v57, %v1427_v18 }
 0x226   : > { %4332 = vmatmul.mubr.bf16.gmra.mxu1 %v1452_v19 }
 0x22c   : > { %v5564_v23 = vpop.f32.mrf.mxu0 }
 0x22e   : > { %v1336_v24 = vpop.f32.mrf.mxu0 }
 0x22f   : > { %v1337_v46 = vadd.f32 %v1336_v24, %v5470_v56  ;;  %v1265_v24 = vadd.f32 %v5479_v36, %v5605_v49 }
 0x230   : > { %v5566_v25 = vpop.f32.mrf.mxu0 }
 0x231   : > { %v1429_v28 = vmax.f32 %v1337_v46, 0.0 }
 0x232   : > { %v1340_v27 = vpop.f32.mrf.mxu0 }
 0x233   : > { %v1341_v48 = vadd.f32 %v1340_v27, %v5470_v56 }
 0x235   : > { %v1430_v43 = vmax.f32 %v1341_v48, 0.0  ;;  %v1255_v48 = vadd.f32 %v5465_v63, %v5605_v49 }
 0x237   : > { %v1453_v30 = vpack.c.bf16 %v1430_v43, %v1429_v28  ;;  %v1697_v43 = vmul.f32 %v5619_v16, %v1265_v24  ;;  %v1695_v63 = vmul.f32 %v5619_v16, %v1255_v48 }
 0x239   : > { %4335 = vmatprep.mubr.bf16.mxu1 %v1453_v30 }
 0x23f   : > { %v5582_v33 = vpop.f32.mrf.mxu0 }
 0x241   : > { %v1346_v60 = vpop.f32.mrf.mxu0 }
 0x242   : > { %v1347_v61 = vadd.f32 %v1346_v60, %v5470_v56 }
 0x243   : > { %v5587_v22 = vpop.f32.mrf.mxu0 }
 0x244   : > { %v1431_v62 = vmax.f32 %v1347_v61, 0.0 }
 0x245   : > { %v1350_v50 = vpop.f32.mrf.mxu0 }
 0x246   : > { %v1351_v7 = vadd.f32 %v1350_v50, %v5470_v56 }
 0x248   : > { %v1432_v58 = vmax.f32 %v1351_v7, 0.0  ;;  %v1696_v7 = vmul.f32 %v5619_v16, %v1259_v29  ;;  %v1285_v29 = vadd.f32 %v5510_v41, %v5605_v49 }
 0x24a   : > { %v1454_v52 = vpack.c.bf16 %v1432_v58, %v1431_v62 }
 0x24c   : > { %4336 = vmatmul.mubr.bf16.gmra.mxu1 %v1454_v52 }
 0x252   : > { %v5591_v47 = vpop.f32.mrf.mxu0 }
 0x254   : > { %v1356_v35 = vpop.f32.mrf.mxu0 }
 0x255   : > { %v1357_v45 = vadd.f32 %v1356_v35, %v5470_v56 }
 0x256   : > { %v5593_v2 = vpop.f32.mrf.mxu0 }
 0x257   : > { %v1433_v37 = vmax.f32 %v1357_v45, 0.0 }
 0x258   : > { %v1360_v12 = vpop.f32.mrf.mxu0 }
 0x259   : > { %v1361_v5 = vadd.f32 %v1360_v12, %v5470_v56 }
 0x25b   : > { %v1434_v6 = vmax.f32 %v1361_v5, 0.0 }
 0x25d   : > { %v1455_v8 = vpack.c.bf16 %v1434_v6, %v1433_v37 }
 0x25f   : > { %4339 = vmatprep.mubr.bf16.mxu1 %v1455_v8 }
 0x265   : > { %v5597_v9 = vpop.f32.mrf.mxu0 }
 0x267   : > { %v1366_v38 = vpop.f32.mrf.mxu0 }
 0x268   : > { %v1367_v13 = vadd.f32 %v1366_v38, %v5470_v56 }
 0x269   : > { %v5599_v11 = vpop.f32.mrf.mxu0 }
 0x26a   : > { %v1435_v57 = vmax.f32 %v1367_v13, 0.0 }
 0x26b   : > { %v1370_v17 = vpop.f32.mrf.mxu0 }
 0x26c   : > { %v1371_v18 = vadd.f32 %v1370_v17, %v5470_v56 }
 0x26e   : > { %v1436_v19 = vmax.f32 %v1371_v18, 0.0 }
 0x270   : > { %v1456_v15 = vpack.c.bf16 %v1436_v19, %v1435_v57 }
 0x272   : > { %4340 = vmatmul.mubr.bf16.gmra.mxu1 %v1456_v15 }
 0x274   : > { %v4321_v46 = vpop.f32.mrf.mxu1 }
 0x275   : > { %v1575_v27 = vadd.f32 %v4321_v46, %v5610_v21 }
 0x276   : > { %v1566_v28 = vpop.f32.mrf.mxu1 }
 0x277   : > { %v1567_v30 = vadd.f32 %v5610_v21, %v1566_v28  ;;  %v5628_v32 = vadd.f32 %v1697_v43, %v1575_v27 }
 0x278   : > { %v5625_v36 = vpop.f32.mrf.mxu0  ;;  %v4322_v31 = vpop.f32.mrf.mxu1 }
 0x279   : > { %v1578_v60 = vadd.f32 %v4322_v31, %v5610_v21  ;;  %v5635_v20 = vadd.f32 %v1695_v63, %v1567_v30  ;;  %v1761_v52 = vmax.f32 %v5628_v32, 0.0  ;;  %v1289_v31 = vadd.f32 %v5515_v59, %v5605_v49 }
 0x27a   : > { %v1376_v34 = vpop.f32.mrf.mxu0  ;;  %v1569_v61 = vpop.f32.mrf.mxu1 }
 0x27b   : > { %v5632_v50 = vadd.f32 %v1698_v39, %v1578_v60  ;;  %v1570_v62 = vadd.f32 %v5610_v21, %v1569_v61  ;;  %v1377_v45 = vadd.f32 %v1376_v34, %v5470_v56  ;;  %v1759_v8 = vmax.f32 %v5635_v20, 0.0 }
 0x27c   : > { %v5638_v58 = vpop.f32.mrf.mxu0  ;;  %v1275_v60 = vadd.f32 %v5494_v10, %v5605_v49  ;;  %v1701_v34 = vmul.f32 %v5619_v16, %v1285_v29  ;;  %v1279_v61 = vadd.f32 %v5498_v1, %v5605_v49 }
 0x27d   : > { %v1762_v35 = vmax.f32 %v5632_v50, 0.0  ;;  %v5643_v12 = vadd.f32 %v1696_v7, %v1570_v62  ;;  %v1437_v13 = vmax.f32 %v1377_v45, 0.0  ;;  %v1702_v45 = vmul.f32 %v5619_v16, %v1289_v31 }
 0x27e   : > { %v1380_v5 = vpop.f32.mrf.mxu0 }
 0x27f   : > { %v5649_v37 = vpack.c.bf16 %v1762_v35, %v1761_v52  ;;  %v1381_v6 = vadd.f32 %v1380_v5, %v5470_v56  ;;  %v1760_v38 = vmax.f32 %v5643_v12, 0.0 }
 0x281   : > { %v1438_v17 = vmax.f32 %v1381_v6, 0.0  ;;  %v1791_v18 = vpack.c.bf16 %v1760_v38, %v1759_v8  ;;  %v1699_v6 = vmul.f32 %v5619_v16, %v1275_v60 }
 0x283   : > { %v1457_v57 = vpack.c.bf16 %v1438_v17, %v1437_v13 }
 0x285   : > { %4343 = vmatprep.mubr.bf16.mxu1 %v1457_v57  ;;  %v1700_v57 = vmul.f32 %v5619_v16, %v1279_v61 }
 0x28b   : > { %v5658_v19 = vpop.f32.mrf.mxu0 }
 0x28d   : > { %v1386_v15 = vpop.f32.mrf.mxu0 }
 0x28e   : > { %v1387_v46 = vadd.f32 %v1386_v15, %v5470_v56 }
 0x28f   : > { %v5660_v24 = vpop.f32.mrf.mxu0 }
 0x290   : > { %v1439_v48 = vmax.f32 %v1387_v46, 0.0 }
 0x291   : > { %v1390_v26 = vpop.f32.mrf.mxu0 }
 0x292   : > { %v1391_v27 = vadd.f32 %v1390_v26, %v5470_v56 }
 0x294   : > { %v1440_v28 = vmax.f32 %v1391_v27, 0.0 }
 0x296   : > { %v1458_v43 = vpack.c.bf16 %v1440_v28, %v1439_v48 }
 0x298   : > { %4344 = vmatmul.mubr.bf16.gmra.mxu1 %v1458_v43 }
 0x29a   : > { %v4325_v30 = vpop.f32.mrf.mxu1 }
 0x29b   : > { %v1591_v39 = vadd.f32 %v4325_v30, %v5610_v21 }
 0x29c   : > { %v1582_v63 = vpop.f32.mrf.mxu1 }
 0x29d   : > { %v1583_v7 = vadd.f32 %v5610_v21, %v1582_v63  ;;  %v5678_v5 = vadd.f32 %v1701_v34, %v1591_v39 }
 0x29e   : > { %v5675_v62 = vpop.f32.mrf.mxu0  ;;  %v4326_v41 = vpop.f32.mrf.mxu1 }
 0x29f   : > { %v1594_v59 = vadd.f32 %v4326_v41, %v5610_v21  ;;  %v5685_v1 = vadd.f32 %v1699_v6, %v1583_v7  ;;  %v1765_v26 = vmax.f32 %v5678_v5, 0.0 }
 0x2a0   : > { %v1396_v10 = vpop.f32.mrf.mxu0  ;;  %v1585_v13 = vpop.f32.mrf.mxu1 }
 0x2a1   : > { %v5682_v17 = vadd.f32 %v1702_v45, %v1594_v59  ;;  %v1586_v15 = vadd.f32 %v5610_v21, %v1585_v13  ;;  %v1397_v48 = vadd.f32 %v1396_v10, %v5470_v56  ;;  %v1763_v31 = vmax.f32 %v5685_v1, 0.0 }
 0x2a2   : > { %v5688_v46 = vpop.f32.mrf.mxu0 }
 0x2a3   : > { %v1766_v27 = vmax.f32 %v5682_v17, 0.0  ;;  %v5693_v28 = vadd.f32 %v1700_v57, %v1586_v15  ;;  %v1441_v60 = vmax.f32 %v1397_v48, 0.0  ;;  %v1305_v48 = vadd.f32 %v5537_v51, %v5605_v49 }
 0x2a4   : > { %v1400_v43 = vpop.f32.mrf.mxu0 }
 0x2a5   : > { %v1401_v29 = vadd.f32 %v1400_v43, %v5470_v56  ;;  %v1794_v30 = vpack.c.bf16 %v1766_v27, %v1765_v26  ;;  %v1764_v39 = vmax.f32 %v5693_v28, 0.0 }
 0x2a7   : > { %v1442_v63 = vmax.f32 %v1401_v29, 0.0  ;;  %v1793_v34 = vpack.c.bf16 %v1764_v39, %v1763_v31  ;;  %v1295_v29 = vadd.f32 %v5525_v0, %v5605_v49 }
 0x2a9   : > { %v1459_v61 = vpack.c.bf16 %v1442_v63, %v1441_v60  ;;  %v1309_v60 = vadd.f32 %v5539_v55, %v5605_v49  ;;  %v1703_v51 = vmul.f32 %v5619_v16, %v1295_v29 }
 0x2ab   : > { %4347 = vmatprep.mubr.bf16.mxu1 %v1459_v61 }
 0x2b1   : > { %v5706_v7 = vpop.f32.mrf.mxu0 }
 0x2b3   : > { %v1406_v41 = vpop.f32.mrf.mxu0 }
 0x2b4   : > { %v1407_v59 = vadd.f32 %v1406_v41, %v5470_v56  ;;  %v1705_v41 = vmul.f32 %v5619_v16, %v1305_v48 }
 0x2b5   : > { %v5708_v45 = vpop.f32.mrf.mxu0 }
 0x2b6   : > { %v1443_v13 = vmax.f32 %v1407_v59, 0.0 }
 0x2b7   : > { %v1410_v6 = vpop.f32.mrf.mxu0 }
 0x2b8   : > { %v1411_v10 = vadd.f32 %v1410_v6, %v5470_v56  ;;  %v1299_v56 = vadd.f32 %v5529_v44, %v5605_v49 }
 0x2ba   : > { %v1444_v57 = vmax.f32 %v1411_v10, 0.0 }
 0x2bc   : > { %v1460_v15 = vpack.c.bf16 %v1444_v57, %v1443_v13  ;;  %v1704_v13 = vmul.f32 %v5619_v16, %v1299_v56 }
 0x2be   : > { %4348 = vmatmul.mubr.bf16.gmra.mxu1 %v1460_v15 }
 0x2bf   : > { %4367 = vmatprep.mubr.bf16.mxu1 %v1791_v18  ;;  %v1706_v18 = vmul.f32 %v5619_v16, %v1309_v60 }
 0x2c0   : > { %v4329_v43 = vpop.f32.mrf.mxu1 }
 0x2c1   : > { %v1607_v63 = vadd.f32 %v4329_v43, %v5610_v21 }
 0x2c2   : > { %v1598_v61 = vpop.f32.mrf.mxu1 }
 0x2c3   : > { %v1599_v59 = vadd.f32 %v5610_v21, %v1598_v61  ;;  %v5725_v10 = vadd.f32 %v1705_v41, %v1607_v63  ;;  %v1325_v61 = vadd.f32 %v5549_v40, %v5605_v49  ;;  %v1315_v41 = vadd.f32 %v5543_v14, %v5605_v49 }
 0x2c4   : > { %v4330_v6 = vpop.f32.mrf.mxu1  ;;  %v1319_v40 = vadd.f32 %v5545_v3, %v5605_v49  ;;  %v4768_v3 = vld [vmem:[%s6905_s6 + $0xa8] sm:$0xff]  }
 0x2c5   : > { %v1610_v0 = vadd.f32 %v4330_v6, %v5610_v21  ;;  %v5730_v57 = vadd.f32 %v1703_v51, %v1599_v59  ;;  %v6936_v48 = vmax.f32 %v5725_v10, 0.0  ;;  %v1329_v59 = vadd.f32 %v5551_v42, %v5605_v49 }
 0x2c6   : > { %v1601_v55 = vpop.f32.mrf.mxu1  ;;  %4368 = vmatmul.mubr.bf16.vlgmr.msra.gmra.mxu1 %v5649_v37  ;;  %v1707_v42 = vmul.f32 %v5619_v16, %v1315_v41 }
 0x2c7   : > { %v5732_v44 = vadd.f32 %v1706_v18, %v1610_v0  ;;  %v1602_v15 = vadd.f32 %v5610_v21, %v1601_v55  ;;  %4371 = vmatprep.mubr.bf16.mxu1 %v1793_v34  ;;  %v6933_v60 = vmax.f32 %v5730_v57, 0.0  ;;  %v4766_v18 = vld [vmem:[%s6905_s6 + $0xb8] sm:$0xff]   ;;  %v1709_v0 = vmul.f32 %v5619_v16, %v1325_v61 }
 0x2c8   : > { %4399 = vmatprep.subr.bf16.mxu0 %v4766_v18  ;;  %v1708_v61 = vmul.f32 %v5619_v16, %v1319_v40 }
 0x2c9   : > { %v6932_v43 = vmax.f32 %v5732_v44, 0.0  ;;  %v5737_v29 = vadd.f32 %v1704_v13, %v1602_v15  ;;  %v1710_v13 = vmul.f32 %v5619_v16, %v1329_v59  ;;  %4400 = vmatpush3.bf16.msra.mxu0 %v4766_v18 }
 0x2cb   : > { %v6931_v63 = vmax.f32 %v5737_v29, 0.0  ;;  %v1796_v37 = vpack.c.bf16 %v6932_v43, %v6936_v48 }
 0x2cd   : > { %v1795_v34 = vpack.c.bf16 %v6931_v63, %v6933_v60 }
 0x2ce   : > { %4372 = vmatmul.mubr.bf16.gmra.mxu1 %v1794_v30  ;;  %v4767_v30 = vld [vmem:[%s6905_s6 + $0xb0] sm:$0xff]  }
 0x2cf   : > { %4375 = vmatprep.mubr.bf16.mxu1 %v1795_v34  ;;  %4401 = vmatprep.subr.bf16.mxu0 %v4767_v30 }
 0x2d0   : > { %4402 = vmatpush3.bf16.msra.mxu0 %v4767_v30  ;;  %v4769_v30 = vld [vmem:[%s6905_s6 + $0xa0] sm:$0xff]  }
 0x2d1   : > { %4403 = vmatprep.subr.bf16.mxu0 %v4768_v3 }
 0x2d4   : > { %4404 = vmatpush3.bf16.msra.mxu0 %v4768_v3 }
 0x2d5   : > { %4405 = vmatprep.subr.bf16.mxu0 %v4769_v30 }
 0x2d6   : > { %4376 = vmatmul.mubr.bf16.gmra.mxu1 %v1796_v37 }
 0x2d8   : > { %4406 = vmatpush3.bf16.msra.mxu0 %v4769_v30  ;;  %v1339_v30 = vadd.f32 %v5566_v25, %v5605_v49 }
 0x2da   : > { %v1712_v25 = vmul.f32 %v5619_v16, %v1339_v30 }
 0x2e6   : > { %v4333_v56 = vpop.f32.mrf.mxu1 }
 0x2e7   : > { %v1623_v6 = vadd.f32 %v4333_v56, %v5610_v21 }
 0x2e8   : > { %v1614_v51 = vpop.f32.mrf.mxu1 }
 0x2e9   : > { %v1615_v14 = vadd.f32 %v5610_v21, %v1614_v51  ;;  %v5768_v15 = vadd.f32 %v1709_v0, %v1623_v6 }
 0x2ea   : > { %v4334_v55 = vpop.f32.mrf.mxu1 }
 0x2eb   : > { %v1626_v37 = vadd.f32 %v4334_v55, %v5610_v21  ;;  %v5775_v56 = vadd.f32 %v1707_v42, %v1615_v14  ;;  %v6916_v59 = vmax.f32 %v5768_v15, 0.0  ;;  %v4770_v42 = vld [vmem:[%s6905_s6 + $0x98] sm:$0xff]  }
 0x2ec   : > { %v1617_v34 = vpop.f32.mrf.mxu1  ;;  %4407 = vmatprep.subr.bf16.mxu0 %v4770_v42 }
 0x2ed   : > { %v5777_v51 = vadd.f32 %v1710_v13, %v1626_v37  ;;  %v1618_v41 = vadd.f32 %v5610_v21, %v1617_v34  ;;  %v6915_v18 = vmax.f32 %v5775_v56, 0.0  ;;  %4408 = vmatpush3.bf16.msra.mxu0 %v4770_v42  ;;  %v4771_v13 = vld [vmem:[%s6905_s6 + $0x90] sm:$0xff]   ;;  %v1345_v37 = vadd.f32 %v5582_v33, %v5605_v49  ;;  %v4772_v34 = vld [vmem:[%s6905_s6 + $0x88] sm:$0xff]  }
 0x2ee   : > { %4409 = vmatprep.subr.bf16.mxu0 %v4771_v13 }
 0x2ef   : > { %v6914_v6 = vmax.f32 %v5777_v51, 0.0  ;;  %v5782_v0 = vadd.f32 %v1708_v61, %v1618_v41  ;;  %v1335_v61 = vadd.f32 %v5564_v23, %v5605_v49  ;;  %v1349_v41 = vadd.f32 %v5587_v22, %v5605_v49 }
 0x2f0   : > { %v1713_v33 = vmul.f32 %v5619_v16, %v1345_v37 }
 0x2f1   : > { %v6913_v55 = vmax.f32 %v5782_v0, 0.0  ;;  %v1798_v40 = vpack.c.bf16 %v6914_v6, %v6916_v59  ;;  %4410 = vmatpush3.bf16.msra.mxu0 %v4771_v13  ;;  %v4773_v13 = vld [vmem:[%s6905_s6 + $0x80] sm:$0xff]   ;;  %v1714_v22 = vmul.f32 %v5619_v16, %v1349_v41 }
 0x2f2   : > { %4411 = vmatprep.subr.bf16.mxu0 %v4772_v34 }
 0x2f3   : > { %v1797_v14 = vpack.c.bf16 %v6913_v55, %v6915_v18  ;;  %v1711_v55 = vmul.f32 %v5619_v16, %v1335_v61 }
 0x2f5   : > { %4379 = vmatprep.mubr.bf16.mxu1 %v1797_v14  ;;  %4412 = vmatpush3.bf16.msra.mxu0 %v4772_v34 }
 0x2f6   : > { %4380 = vmatmul.mubr.bf16.gmra.mxu1 %v1798_v40  ;;  %4413 = vmatprep.subr.bf16.mxu0 %v4773_v13 }
 0x2f9   : > { %4414 = vmatpush3.bf16.msra.mxu0 %v4773_v13  ;;  %v1369_v13 = vadd.f32 %v5599_v11, %v5605_v49 }
 0x30c   : > { %v4337_v3 = vpop.f32.mrf.mxu1 }
 0x30d   : > { %v1639_v40 = vadd.f32 %v4337_v3, %v5610_v21 }
 0x30e   : > { %v1630_v14 = vpop.f32.mrf.mxu1 }
 0x30f   : > { %v1631_v42 = vadd.f32 %v5610_v21, %v1630_v14  ;;  %v5822_v3 = vadd.f32 %v1713_v33, %v1639_v40 }
 0x310   : > { %v4338_v23 = vpop.f32.mrf.mxu1 }
 0x311   : > { %v1642_v34 = vadd.f32 %v4338_v23, %v5610_v21  ;;  %v5826_v37 = vadd.f32 %v1711_v55, %v1631_v42  ;;  %v6920_v59 = vmax.f32 %v5822_v3, 0.0  ;;  %v1355_v42 = vadd.f32 %v5591_v47, %v5605_v49 }
 0x312   : > { %v1633_v6 = vpop.f32.mrf.mxu1 }
 0x313   : > { %v5828_v14 = vadd.f32 %v1714_v22, %v1642_v34  ;;  %v1634_v18 = vadd.f32 %v5610_v21, %v1633_v6  ;;  %v6919_v40 = vmax.f32 %v5826_v37, 0.0  ;;  %v1359_v34 = vadd.f32 %v5593_v2, %v5605_v49 }
 0x315   : > { %v6918_v61 = vmax.f32 %v5828_v14, 0.0  ;;  %v5833_v41 = vadd.f32 %v1712_v25, %v1634_v18  ;;  %v1365_v18 = vadd.f32 %v5597_v9, %v5605_v49  ;;  %v1715_v9 = vmul.f32 %v5619_v16, %v1355_v42 }
 0x317   : > { %v6917_v33 = vmax.f32 %v5833_v41, 0.0  ;;  %v1800_v55 = vpack.c.bf16 %v6918_v61, %v6920_v59  ;;  %v1717_v25 = vmul.f32 %v5619_v16, %v1365_v18 }
 0x319   : > { %v1799_v6 = vpack.c.bf16 %v6917_v33, %v6919_v40  ;;  %v1718_v33 = vmul.f32 %v5619_v16, %v1369_v13 }
 0x31b   : > { %4383 = vmatprep.mubr.bf16.mxu1 %v1799_v6 }
 0x31c   : > { %4384 = vmatmul.mubr.bf16.gmra.mxu1 %v1800_v55 }
 0x332   : > { %v4341_v30 = vpop.f32.mrf.mxu1 }
 0x333   : > { %v1655_v23 = vadd.f32 %v4341_v30, %v5610_v21  ;;  %v1716_v30 = vmul.f32 %v5619_v16, %v1359_v34 }
 0x334   : > { %v1646_v22 = vpop.f32.mrf.mxu1 }
 0x335   : > { %v1647_v55 = vadd.f32 %v5610_v21, %v1646_v22  ;;  %v5858_v61 = vadd.f32 %v1717_v25, %v1655_v23  ;;  %v1385_v25 = vadd.f32 %v5658_v19, %v5605_v49 }
 0x336   : > { %v4342_v6 = vpop.f32.mrf.mxu1 }
 0x337   : > { %v1658_v47 = vadd.f32 %v4342_v6, %v5610_v21  ;;  %v5862_v40 = vadd.f32 %v1715_v9, %v1647_v55  ;;  %v6924_v18 = vmax.f32 %v5858_v61, 0.0  ;;  %v1375_v6 = vadd.f32 %v5625_v36, %v5605_v49 }
 0x338   : > { %v1649_v11 = vpop.f32.mrf.mxu1  ;;  %v1389_v9 = vadd.f32 %v5660_v24, %v5605_v49 }
 0x339   : > { %v5864_v59 = vadd.f32 %v1718_v33, %v1658_v47  ;;  %v1650_v2 = vadd.f32 %v5610_v21, %v1649_v11  ;;  %v6923_v13 = vmax.f32 %v5862_v40, 0.0  ;;  %v1719_v19 = vmul.f32 %v5619_v16, %v1375_v6 }
 0x33b   : > { %v6922_v22 = vmax.f32 %v5864_v59, 0.0  ;;  %v5869_v42 = vadd.f32 %v1716_v30, %v1650_v2  ;;  %v1379_v30 = vadd.f32 %v5638_v58, %v5605_v49  ;;  %v1721_v2 = vmul.f32 %v5619_v16, %v1385_v25 }
 0x33d   : > { %v6921_v23 = vmax.f32 %v5869_v42, 0.0  ;;  %v1802_v34 = vpack.c.bf16 %v6922_v22, %v6924_v18 }
 0x33f   : > { %v1801_v33 = vpack.c.bf16 %v6921_v23, %v6923_v13  ;;  %v1722_v23 = vmul.f32 %v5619_v16, %v1389_v9 }
 0x341   : > { %4387 = vmatprep.mubr.bf16.mxu1 %v1801_v33 }
 0x342   : > { %4388 = vmatmul.mubr.bf16.gmra.mxu1 %v1802_v34 }
 0x358   : > { %v4345_v55 = vpop.f32.mrf.mxu1 }
 0x359   : > { %v1671_v47 = vadd.f32 %v4345_v55, %v5610_v21  ;;  %v1720_v55 = vmul.f32 %v5619_v16, %v1379_v30 }
 0x35a   : > { %v1662_v11 = vpop.f32.mrf.mxu1 }
 0x35b   : > { %v1663_v34 = vadd.f32 %v5610_v21, %v1662_v11  ;;  %v5894_v22 = vadd.f32 %v1721_v2, %v1671_v47  ;;  %v1405_v2 = vadd.f32 %v5706_v7, %v5605_v49 }
 0x35c   : > { %v4346_v33 = vpop.f32.mrf.mxu1 }
 0x35d   : > { %v1674_v36 = vadd.f32 %v4346_v33, %v5610_v21  ;;  %v5898_v13 = vadd.f32 %v1719_v19, %v1663_v34  ;;  %v6928_v25 = vmax.f32 %v5894_v22, 0.0  ;;  %v1395_v33 = vadd.f32 %v5675_v62, %v5605_v49 }
 0x35e   : > { %v1665_v24 = vpop.f32.mrf.mxu1  ;;  %v1409_v19 = vadd.f32 %v5708_v45, %v5605_v49 }
 0x35f   : > { %v5900_v18 = vadd.f32 %v1722_v23, %v1674_v36  ;;  %v1666_v58 = vadd.f32 %v5610_v21, %v1665_v24  ;;  %v6927_v9 = vmax.f32 %v5898_v13, 0.0  ;;  %v1723_v7 = vmul.f32 %v5619_v16, %v1395_v33 }
 0x361   : > { %v6926_v11 = vmax.f32 %v5900_v18, 0.0  ;;  %v5905_v6 = vadd.f32 %v1720_v55, %v1666_v58  ;;  %v1399_v55 = vadd.f32 %v5688_v46, %v5605_v49  ;;  %v1725_v58 = vmul.f32 %v5619_v16, %v1405_v2 }
 0x363   : > { %v6925_v47 = vmax.f32 %v5905_v6, 0.0  ;;  %v1804_v30 = vpack.c.bf16 %v6926_v11, %v6928_v25 }
 0x365   : > { %v1803_v23 = vpack.c.bf16 %v6925_v47, %v6927_v9  ;;  %v1726_v47 = vmul.f32 %v5619_v16, %v1409_v19 }
 0x367   : > { %4391 = vmatprep.mubr.bf16.mxu1 %v1803_v23 }
 0x368   : > { %4392 = vmatmul.mubr.bf16.gmra.mxu1 %v1804_v30 }
 0x37e   : > { %v4349_v34 = vpop.f32.mrf.mxu1 }
 0x37f   : > { %v1687_v36 = vadd.f32 %v4349_v34, %v5610_v21  ;;  %v1724_v34 = vmul.f32 %v5619_v16, %v1399_v55  ;;  %v5948_v16 = vld [vmem:[%s6906_s7 + $0x1] ss:$0 sm:$0xff] }
 0x380   : > { %v1678_v24 = vpop.f32.mrf.mxu1 }
 0x381   : > { %v1679_v30 = vadd.f32 %v5610_v21, %v1678_v24  ;;  %v5930_v11 = vadd.f32 %v1725_v58, %v1687_v36 }
 0x382   : > { %v4350_v23 = vpop.f32.mrf.mxu1 }
 0x383   : > { %v1690_v62 = vadd.f32 %v4350_v23, %v5610_v21  ;;  %v5934_v9 = vadd.f32 %v1723_v7, %v1679_v30  ;;  %v6930_v2 = vmax.f32 %v5930_v11, 0.0 }
 0x384   : > { %v1681_v45 = vpop.f32.mrf.mxu1 }
 0x385   : > { %v5936_v25 = vadd.f32 %v1726_v47, %v1690_v62  ;;  %v1682_v49 = vadd.f32 %v5610_v21, %v1681_v45  ;;  %v6935_v36 = vmax.f32 %v5934_v9, 0.0 }
 0x386   : > { %v4369_v46 = vpop.f32.mrf.mxu1 }
 0x387   : > { %v6929_v33 = vmax.f32 %v5936_v25, 0.0  ;;  %v5941_v24 = vadd.f32 %v1724_v34, %v1682_v49  ;;  %v1923_v7 = vadd.f32 %v4369_v46, %v5948_v16 }
 0x388   : > { %v1914_v19 = vpop.f32.mrf.mxu1 }
 0x389   : > { %v6934_v58 = vmax.f32 %v5941_v24, 0.0  ;;  %v1806_v21 = vpack.c.bf16 %v6929_v33, %v6930_v2  ;;  %v1915_v55 = vadd.f32 %v5948_v16, %v1914_v19  ;;  %v2043_v19 = vmax.f32 %v1923_v7, 0.0 }
 0x38a   : > { %v4370_v47 = vpop.f32.mrf.mxu1 }
 0x38b   : > { %v1926_v30 = vadd.f32 %v4370_v47, %v5948_v16  ;;  %v1805_v23 = vpack.c.bf16 %v6934_v58, %v6935_v36  ;;  %v2041_v33 = vmax.f32 %v1915_v55, 0.0 }
 0x38c   : > { %v1917_v62 = vpop.f32.mrf.mxu1 }
 0x38d   : > { %v1918_v45 = vadd.f32 %v5948_v16, %v1917_v62  ;;  %4395 = vmatprep.mubr.bf16.mxu1 %v1805_v23  ;;  %v2044_v34 = vmax.f32 %v1926_v30, 0.0 }
 0x38e   : > { %v4373_v49 = vpop.f32.mrf.mxu1  ;;  %4396 = vmatmul.mubr.bf16.gmra.mxu1 %v1806_v21 }
 0x38f   : > { %v2042_v2 = vmax.f32 %v1918_v45, 0.0  ;;  %2579 = vmatprep.mubr.bf16.mxu1 %v4955_v4  ;;  %v2074_v43 = vpack.c.bf16 %v2044_v34, %v2043_v19  ;;  %v1939_v62 = vadd.f32 %v4373_v49, %v5948_v16 }
 0x390   : > { %v1930_v47 = vpop.f32.mrf.mxu1 }
 0x391   : > { %v2073_v63 = vpack.c.bf16 %v2042_v2, %v2041_v33  ;;  %v1931_v58 = vadd.f32 %v5948_v16, %v1930_v47  ;;  %v2047_v7 = vmax.f32 %v1939_v62, 0.0 }
 0x392   : > { %v4374_v60 = vpop.f32.mrf.mxu1 }
 0x393   : > { %v1942_v46 = vadd.f32 %v4374_v60, %v5948_v16  ;;  %4415 = vmatprep.mubr.bf16.mxu0 %v2073_v63  ;;  %v2045_v45 = vmax.f32 %v1931_v58, 0.0 }
 0x394   : > { %v1933_v23 = vpop.f32.mrf.mxu1  ;;  %4416 = vmatmul.mubr.bf16.vlgmr.msra.gmra.mxu0 %v2074_v43 }
 0x395   : > { %v1934_v21 = vadd.f32 %v5948_v16, %v1933_v23  ;;  %v2048_v55 = vmax.f32 %v1942_v46, 0.0 }
 0x396   : > { %v4377_v30 = vpop.f32.mrf.mxu1 }
 0x397   : > { %v2046_v36 = vmax.f32 %v1934_v21, 0.0  ;;  %v2076_v33 = vpack.c.bf16 %v2048_v55, %v2047_v7  ;;  %v1955_v63 = vadd.f32 %v4377_v30, %v5948_v16  ;;  %v4774_v55 = vld [vmem:[#allocation6 + $0xf0] ss:$8 sps:$4 sm:$0xff]   ;;  %v4777_v30 = vld [vmem:[#allocation6 + $0xe0] ss:$8 sps:$4 sm:$0xff]  }
 0x398   : > { %v1946_v48 = vpop.f32.mrf.mxu1 }
 0x399   : > { %v2075_v2 = vpack.c.bf16 %v2046_v36, %v2045_v45  ;;  %v1947_v19 = vadd.f32 %v5948_v16, %v1946_v48  ;;  %v2051_v23 = vmax.f32 %v1955_v63, 0.0  ;;  %v4776_v48 = vld [vmem:[#allocation6 + $0xf4] ss:$8 sps:$4 sm:$0xff]   ;;  %v4779_v45 = vld [vmem:[#allocation6 + $0xe4] ss:$8 sps:$4 sm:$0xff]  }
 0x39a   : > { %v4378_v34 = vpop.f32.mrf.mxu1  ;;  %2547 = vmatprep.subr.bf16.mxu1 %v4776_v48  ;;  %v4783_v48 = vld [vmem:[#allocation6 + $0xc0] ss:$8 sps:$4 sm:$0xff]  }
 0x39b   : > { %v1958_v60 = vadd.f32 %v4378_v34, %v5948_v16  ;;  %4419 = vmatprep.mubr.bf16.mxu0 %v2075_v2  ;;  %v2049_v46 = vmax.f32 %v1947_v19, 0.0  ;;  %2548 = vmatpush1.bf16.msra.mxu1 %v4774_v55  ;;  %v4785_v55 = vld [vmem:[#allocation6 + $0xc4] ss:$8 sps:$4 sm:$0xff]  }
 0x39c   : > { %v1949_v49 = vpop.f32.mrf.mxu1  ;;  %4420 = vmatmul.mubr.bf16.gmra.mxu0 %v2076_v33  ;;  %2549 = vmatprep.subr.bf16.mxu1 %v4779_v45  ;;  %v4782_v33 = vld [vmem:[#allocation6 + $0xd4] ss:$8 sps:$4 sm:$0xff]   ;;  %v4786_v45 = vld [vmem:[#allocation6 + $0xb0] ss:$8 sps:$4 sm:$0xff]  }
 0x39d   : > { %v1950_v43 = vadd.f32 %v5948_v16, %v1949_v49  ;;  %v2052_v47 = vmax.f32 %v1958_v60, 0.0 }
 0x39f   : > { %v2050_v58 = vmax.f32 %v1950_v43, 0.0  ;;  %v2078_v21 = vpack.c.bf16 %v2052_v47, %v2051_v23  ;;  %2550 = vmatpush1.bf16.msra.mxu1 %v4777_v30  ;;  %v4780_v43 = vld [vmem:[#allocation6 + $0xd0] ss:$8 sps:$4 sm:$0xff]   ;;  %v4789_v30 = vld [vmem:[#allocation6 + $0xa0] ss:$8 sps:$4 sm:$0xff]  }
 0x3a0   : > { %2551 = vmatprep.subr.bf16.mxu1 %v4782_v33  ;;  %v4792_v33 = vld [vmem:[#allocation6 + $0x90] ss:$8 sps:$4 sm:$0xff]  }
 0x3a1   : > { %v2077_v62 = vpack.c.bf16 %v2050_v58, %v2049_v46 }
 0x3a3   : > { %4423 = vmatprep.mubr.bf16.mxu0 %v2077_v62  ;;  %2552 = vmatpush1.bf16.msra.mxu1 %v4780_v43 }
 0x3a4   : > { %4424 = vmatmul.mubr.bf16.gmra.mxu0 %v2078_v21  ;;  %2553 = vmatprep.subr.bf16.mxu1 %v4785_v55 }
 0x3a7   : > { %2554 = vmatpush1.bf16.msra.mxu1 %v4783_v48 }
 0x3b6   : > { %v4381_v36 = vpop.f32.mrf.mxu1 }
 0x3b7   : > { %v1971_v60 = vadd.f32 %v4381_v36, %v5948_v16  ;;  %v4788_v36 = vld [vmem:[#allocation6 + $0xb4] ss:$8 sps:$4 sm:$0xff]  }
 0x3b8   : > { %v1962_v7 = vpop.f32.mrf.mxu1  ;;  %2555 = vmatprep.subr.bf16.mxu1 %v4788_v36 }
 0x3b9   : > { %v1963_v34 = vadd.f32 %v5948_v16, %v1962_v7  ;;  %v2055_v23 = vmax.f32 %v1971_v60, 0.0  ;;  %2556 = vmatpush1.bf16.msra.mxu1 %v4786_v45  ;;  %v4791_v7 = vld [vmem:[#allocation6 + $0xa4] ss:$8 sps:$4 sm:$0xff]  }
 0x3ba   : > { %v4382_v2 = vpop.f32.mrf.mxu1  ;;  %2557 = vmatprep.subr.bf16.mxu1 %v4791_v7  ;;  %v4797_v60 = vld [vmem:[#allocation6 + $0x84] ss:$8 sps:$4 sm:$0xff]  }
 0x3bb   : > { %v1974_v19 = vadd.f32 %v4382_v2, %v5948_v16  ;;  %v2053_v46 = vmax.f32 %v1963_v34, 0.0  ;;  %v4794_v2 = vld [vmem:[#allocation6 + $0x94] ss:$8 sps:$4 sm:$0xff]  }
 0x3bc   : > { %v1965_v63 = vpop.f32.mrf.mxu1 }
 0x3bd   : > { %v1966_v49 = vadd.f32 %v5948_v16, %v1965_v63  ;;  %v2056_v47 = vmax.f32 %v1974_v19, 0.0  ;;  %2558 = vmatpush1.bf16.msra.mxu1 %v4789_v30  ;;  %v4795_v63 = vld [vmem:[#allocation6 + $0x80] ss:$8 sps:$4 sm:$0xff]  }
 0x3be   : > { %2559 = vmatprep.subr.bf16.mxu1 %v4794_v2 }
 0x3bf   : > { %v2054_v58 = vmax.f32 %v1966_v49, 0.0  ;;  %v2080_v21 = vpack.c.bf16 %v2056_v47, %v2055_v23 }
 0x3c1   : > { %v2079_v62 = vpack.c.bf16 %v2054_v58, %v2053_v46  ;;  %2560 = vmatpush1.bf16.msra.mxu1 %v4792_v33 }
 0x3c2   : > { %2561 = vmatprep.subr.bf16.mxu1 %v4797_v60 }
 0x3c3   : > { %4427 = vmatprep.mubr.bf16.mxu0 %v2079_v62 }
 0x3c4   : > { %4428 = vmatmul.mubr.bf16.gmra.mxu0 %v2080_v21 }
 0x3c5   : > { %2562 = vmatpush1.bf16.msra.mxu1 %v4795_v63 }
 0x3dc   : > { %v4385_v34 = vpop.f32.mrf.mxu1 }
 0x3dd   : > { %v1987_v46 = vadd.f32 %v4385_v34, %v5948_v16 }
 0x3de   : > { %v1978_v19 = vpop.f32.mrf.mxu1 }
 0x3df   : > { %v1979_v43 = vadd.f32 %v5948_v16, %v1978_v19  ;;  %v2059_v48 = vmax.f32 %v1987_v46, 0.0 }
 0x3e0   : > { %v4386_v49 = vpop.f32.mrf.mxu1 }
 0x3e1   : > { %v1990_v47 = vadd.f32 %v4386_v49, %v5948_v16  ;;  %v2057_v21 = vmax.f32 %v1979_v43, 0.0 }
 0x3e2   : > { %v1981_v58 = vpop.f32.mrf.mxu1 }
 0x3e3   : > { %v1982_v23 = vadd.f32 %v5948_v16, %v1981_v58  ;;  %v2060_v62 = vmax.f32 %v1990_v47, 0.0 }
 0x3e5   : > { %v2058_v55 = vmax.f32 %v1982_v23, 0.0  ;;  %v2082_v45 = vpack.c.bf16 %v2060_v62, %v2059_v48 }
 0x3e7   : > { %v2081_v36 = vpack.c.bf16 %v2058_v55, %v2057_v21 }
 0x3e9   : > { %4431 = vmatprep.mubr.bf16.mxu0 %v2081_v36 }
 0x3ea   : > { %4432 = vmatmul.mubr.bf16.gmra.mxu0 %v2082_v45 }
 0x402   : > { %v4389_v7 = vpop.f32.mrf.mxu1 }
 0x403   : > { %v2003_v34 = vadd.f32 %v4389_v7, %v5948_v16 }
 0x404   : > { %v1994_v30 = vpop.f32.mrf.mxu1 }
 0x405   : > { %v1995_v33 = vadd.f32 %v5948_v16, %v1994_v30  ;;  %v2063_v46 = vmax.f32 %v2003_v34, 0.0 }
 0x406   : > { %v4390_v2 = vpop.f32.mrf.mxu1 }
 0x407   : > { %v2006_v19 = vadd.f32 %v4390_v2, %v5948_v16  ;;  %v2061_v43 = vmax.f32 %v1995_v33, 0.0 }
 0x408   : > { %v1997_v60 = vpop.f32.mrf.mxu1 }
 0x409   : > { %v1998_v63 = vadd.f32 %v5948_v16, %v1997_v60  ;;  %v2064_v49 = vmax.f32 %v2006_v19, 0.0 }
 0x40b   : > { %v2062_v47 = vmax.f32 %v1998_v63, 0.0  ;;  %v2084_v23 = vpack.c.bf16 %v2064_v49, %v2063_v46  ;;  %v5990_v46 = vld [vmem:[%s6906_s7 + $0x2] ss:$0 sm:$0xff] }
 0x40d   : > { %v2083_v58 = vpack.c.bf16 %v2062_v47, %v2061_v43 }
 0x40f   : > { %4435 = vmatprep.mubr.bf16.mxu0 %v2083_v58 }
 0x410   : > { %4436 = vmatmul.mubr.bf16.gmra.mxu0 %v2084_v23 }
 0x428   : > { %v4393_v62 = vpop.f32.mrf.mxu1 }
 0x429   : > { %v2019_v45 = vadd.f32 %v4393_v62, %v5948_v16 }
 0x42a   : > { %v2010_v21 = vpop.f32.mrf.mxu1 }
 0x42b   : > { %v2011_v48 = vadd.f32 %v5948_v16, %v2010_v21  ;;  %v2067_v34 = vmax.f32 %v2019_v45, 0.0 }
 0x42c   : > { %v4394_v55 = vpop.f32.mrf.mxu1 }
 0x42d   : > { %v2022_v36 = vadd.f32 %v4394_v55, %v5948_v16  ;;  %v2065_v33 = vmax.f32 %v2011_v48, 0.0  ;;  %v5995_v48 = vstv %s4057_s15  ;;  %s6674_s15 = scalar_lea.vmem %s6907_s8, %s3976_s23  ;;  %s3974_s23 = sshll.u32 %s383_s27, 3 }
 0x42e   : > { %v2013_v7 = vpop.f32.mrf.mxu1  ;;  %v2326_v20 = vmul.f32 %v5995_v48, %v1760_v38  ;;  %v2329_v38 = vmul.f32 %v5995_v48, %v1763_v31  ;;  %v2332_v5 = vmul.f32 %v5995_v48, %v1766_v27  ;;  %v2330_v1 = vmul.f32 %v5995_v48, %v1764_v39  ;;  %s385_s28 = scalar_lea.vmem [#allocation7], %s3974_s23 }
 0x42f   : > { %v2014_v30 = vadd.f32 %v5948_v16, %v2013_v7  ;;  %v2068_v2 = vmax.f32 %v2022_v36, 0.0  ;;  %v6966_v27 = vmax.f32 %v5725_v10, 0.0  ;;  %v6967_v39 = vmax.f32 %v5730_v57, 0.0  ;;  %s3847_s16 = sshll.u32 %s385_s28, 4  ;;  %s3848_s16 = int_to_ptr.vmem [resolvable:$true] %s3847_s16 }
 0x430   : > { %s4863_s29 = scalar_lea.vmem %s3848_s16, 128 }
 0x431   : > { %v2066_v19 = vmax.f32 %v2014_v30, 0.0  ;;  %v2086_v63 = vpack.c.bf16 %v2068_v2, %v2067_v34  ;;  %p4864_p8 = scmp.ne.s32.totalorder %s3848_s16, %s4863_s29 }
 0x433   : > { %v2085_v60 = vpack.c.bf16 %v2066_v19, %v2065_v33  ;;  %v2327_v19 = vmul.f32 %v5995_v48, %v1761_v52  ;;  %p4865_p11 = pnand %p4864_p8, %p7010_p10 }
 0x435   : > { %4439 = vmatprep.mubr.bf16.mxu0 %v2085_v60  ;;  %p4866_p13 = pneg %p4865_p11 }
 0x436   : > { %4440 = vmatmul.mubr.bf16.gmra.mxu0 %v2086_v63  ;;  %v2325_v63 = vmul.f32 %v5995_v48, %v1759_v8 }
 0x44e   : > { %v4397_v49 = vpop.f32.mrf.mxu1 }
 0x44f   : > { %v2035_v62 = vadd.f32 %v4397_v49, %v5948_v16 }
 0x450   : > { %v2026_v43 = vpop.f32.mrf.mxu1 }
 0x451   : > { %v2027_v58 = vadd.f32 %v5948_v16, %v2026_v43  ;;  %v2071_v60 = vmax.f32 %v2035_v62, 0.0 }
 0x452   : > { %v4398_v47 = vpop.f32.mrf.mxu1 }
 0x453   : > { %v2038_v23 = vadd.f32 %v4398_v47, %v5948_v16  ;;  %v2069_v2 = vmax.f32 %v2027_v58, 0.0  ;;  %v2328_v58 = vmul.f32 %v5995_v48, %v1762_v35  ;;  %v2331_v35 = vmul.f32 %v5995_v48, %v1765_v26 }
 0x454   : > { %v2029_v21 = vpop.f32.mrf.mxu1  ;;  %v4417_v55 = vpop.f32.mrf.mxu0 }
 0x455   : > { %v2030_v36 = vadd.f32 %v5948_v16, %v2029_v21  ;;  %v2205_v45 = vadd.f32 %v4417_v55, %v5990_v46  ;;  %v2072_v7 = vmax.f32 %v2038_v23, 0.0 }
 0x456   : > { %v2196_v30 = vpop.f32.mrf.mxu0 }
 0x457   : > { %v2070_v33 = vmax.f32 %v2030_v36, 0.0  ;;  %v2197_v34 = vadd.f32 %v5990_v46, %v2196_v30  ;;  %v2359_v16 = vadd.f32 %v2327_v19, %v2205_v45  ;;  %v2088_v23 = vpack.c.bf16 %v2072_v7, %v2071_v60 }
 0x458   : > { %v4418_v49 = vpop.f32.mrf.mxu0 }
 0x459   : > { %v2087_v43 = vpack.c.bf16 %v2070_v33, %v2069_v2  ;;  %v2208_v47 = vadd.f32 %v4418_v49, %v5990_v46  ;;  %v2357_v21 = vadd.f32 %v2325_v63, %v2197_v34  ;;  %v2391_v62 = vmax.f32 %v2359_v16, 0.0 }
 0x45a   : > { %v2199_v32 = vpop.f32.mrf.mxu0 }
 0x45b   : > { %v2360_v52 = vadd.f32 %v2328_v58, %v2208_v47  ;;  %v2200_v55 = vadd.f32 %v5990_v46, %v2199_v32  ;;  %4443 = vmatprep.mubr.bf16.mxu0 %v2087_v43  ;;  %v2389_v30 = vmax.f32 %v2357_v21, 0.0  ;;  %v2335_v32 = vmul.f32 %v5995_v48, %v6966_v27 }
 0x45c   : > { %v4421_v8 = vpop.f32.mrf.mxu0  ;;  %4444 = vmatmul.mubr.bf16.gmra.mxu0 %v2088_v23  ;;  %v6972_v27 = vmax.f32 %v5777_v51, 0.0  ;;  %v4798_v51 = vld [vmem:[%s6905_s6 + $0xf8] sm:$0xff]  }
 0x45d   : > { %v2392_v36 = vmax.f32 %v2360_v52, 0.0  ;;  %v2358_v45 = vadd.f32 %v2326_v20, %v2200_v55  ;;  %v2221_v50 = vadd.f32 %v4421_v8, %v5990_v46  ;;  %v2333_v8 = vmul.f32 %v5995_v48, %v6967_v39  ;;  %4447 = vmatprep.subr.bf16.mxu0 %v4798_v51 }
 0x45e   : > { %v2212_v7 = vpop.f32.mrf.mxu0  ;;  %4448 = vmatpush3.bf16.msra.mxu0 %v4798_v51 }
 0x45f   : > { %v2390_v2 = vmax.f32 %v2358_v45, 0.0  ;;  %v2213_v33 = vadd.f32 %v5990_v46, %v2212_v7  ;;  %v2422_v12 = vpack.c.bf16 %v2392_v36, %v2391_v62  ;;  %v2363_v60 = vadd.f32 %v2331_v35, %v2221_v50 }
 0x460   : > { %v4422_v19 = vpop.f32.mrf.mxu0  ;;  %v6968_v50 = vmax.f32 %v5732_v44, 0.0 }
 0x461   : > { %v2421_v34 = vpack.c.bf16 %v2390_v2, %v2389_v30  ;;  %v2224_v63 = vadd.f32 %v4422_v19, %v5990_v46  ;;  %v2361_v49 = vadd.f32 %v2329_v38, %v2213_v33  ;;  %v2395_v47 = vmax.f32 %v2363_v60, 0.0 }
 0x462   : > { %v2215_v26 = vpop.f32.mrf.mxu0  ;;  %v2336_v10 = vmul.f32 %v5995_v48, %v6968_v50  ;;  %v6969_v38 = vmax.f32 %v5737_v29, 0.0 }
 0x463   : > { %v2364_v43 = vadd.f32 %v2332_v5, %v2224_v63  ;;  %v2216_v16 = vadd.f32 %v5990_v46, %v2215_v26  ;;  %2580 = vmatmul.mubr.bf16.vlgmr.msra.gmra.mxu1 %v2421_v34  ;;  %v2393_v52 = vmax.f32 %v2361_v49, 0.0 }
 0x464   : > { %v4425_v31 = vpop.f32.mrf.mxu0  ;;  %2589 = vmatprep.mubr.bf16.mxu1 %v4955_v4  ;;  %v2334_v57 = vmul.f32 %v5995_v48, %v6969_v38 }
 0x465   : > { %v2396_v58 = vmax.f32 %v2364_v43, 0.0  ;;  %v2362_v23 = vadd.f32 %v2330_v1, %v2216_v16  ;;  %v2237_v17 = vadd.f32 %v4425_v31, %v5990_v46  ;;  %v6970_v43 = vmax.f32 %v5768_v15, 0.0 }
 0x466   : > { %v2228_v21 = vpop.f32.mrf.mxu0 }
 0x467   : > { %v2394_v55 = vmax.f32 %v2362_v23, 0.0  ;;  %v2229_v28 = vadd.f32 %v5990_v46, %v2228_v21  ;;  %v2424_v20 = vpack.c.bf16 %v2396_v58, %v2395_v47  ;;  %v2367_v36 = vadd.f32 %v2335_v32, %v2237_v17 }
 0x468   : > { %v4426_v62 = vpop.f32.mrf.mxu0  ;;  %v2339_v16 = vmul.f32 %v5995_v48, %v6970_v43  ;;  %v6971_v58 = vmax.f32 %v5775_v56, 0.0  ;;  %v2340_v32 = vmul.f32 %v5995_v48, %v6972_v27 }
 0x469   : > { %v2240_v45 = vadd.f32 %v4426_v62, %v5990_v46  ;;  %v2423_v35 = vpack.c.bf16 %v2394_v55, %v2393_v52  ;;  %v2365_v30 = vadd.f32 %v2333_v8, %v2229_v28  ;;  %v2399_v19 = vmax.f32 %v2367_v36, 0.0 }
 0x46a   : > { %v2231_v7 = vpop.f32.mrf.mxu0  ;;  %v2337_v23 = vmul.f32 %v5995_v48, %v6971_v58  ;;  %v6973_v28 = vmax.f32 %v5782_v0, 0.0  ;;  %v4799_v0 = vld [vmem:[%s6905_s6 + $0xf0] sm:$0xff]  }
 0x46b   : > { %v2368_v2 = vadd.f32 %v2336_v10, %v2240_v45  ;;  %v2232_v33 = vadd.f32 %v5990_v46, %v2231_v7  ;;  %2590 = vmatmul.mubr.bf16.gmra.mxu1 %v2422_v12  ;;  %v2397_v63 = vmax.f32 %v2365_v30, 0.0  ;;  %4449 = vmatprep.subr.bf16.mxu0 %v4799_v0  ;;  %v4800_v10 = vld [vmem:[%s6905_s6 + $0xe8] sm:$0xff]   ;;  %v4802_v7 = vld [vmem:[%s6905_s6 + $0xd8] sm:$0xff]  }
 0x46c   : > { %2599 = vmatprep.mubr.bf16.mxu1 %v4955_v4  ;;  %4450 = vmatpush3.bf16.msra.mxu0 %v4799_v0 }
 0x46d   : > { %v2400_v34 = vmax.f32 %v2368_v2, 0.0  ;;  %v2366_v60 = vadd.f32 %v2334_v57, %v2232_v33  ;;  %4451 = vmatprep.subr.bf16.mxu0 %v4800_v10  ;;  %v4803_v33 = vld [vmem:[%s6905_s6 + $0xd0] sm:$0xff]   ;;  %v6974_v57 = vmax.f32 %v5822_v3, 0.0  ;;  %v4804_v3 = vld [vmem:[%s6905_s6 + $0xc8] sm:$0xff]  }
 0x46f   : > { %v2398_v44 = vmax.f32 %v2366_v60, 0.0  ;;  %v2426_v5 = vpack.c.bf16 %v2400_v34, %v2399_v19  ;;  %v2343_v19 = vmul.f32 %v5995_v48, %v6974_v57 }
 0x470   : > { %4452 = vmatpush3.bf16.msra.mxu0 %v4800_v10 }
 0x471   : > { %v2425_v26 = vpack.c.bf16 %v2398_v44, %v2397_v63  ;;  %v6975_v44 = vmax.f32 %v5826_v37, 0.0 }
 0x473   : > { %2600 = vmatmul.mubr.bf16.gmra.mxu1 %v2423_v35  ;;  %v4801_v35 = vld [vmem:[%s6905_s6 + $0xe0] sm:$0xff]  }
 0x474   : > { %2609 = vmatprep.mubr.bf16.mxu1 %v4955_v4  ;;  %4453 = vmatprep.subr.bf16.mxu0 %v4801_v35 }
 0x475   : > { %4454 = vmatpush3.bf16.msra.mxu0 %v4801_v35  ;;  %v6981_v35 = vmax.f32 %v5869_v42, 0.0  ;;  %v6982_v42 = vmax.f32 %v5894_v22, 0.0 }
 0x476   : > { %4455 = vmatprep.subr.bf16.mxu0 %v4802_v7 }
 0x479   : > { %4456 = vmatpush3.bf16.msra.mxu0 %v4802_v7  ;;  %v2346_v7 = vmul.f32 %v5995_v48, %v6981_v35 }
 0x47a   : > { %4457 = vmatprep.subr.bf16.mxu0 %v4803_v33 }
 0x47b   : > { %2610 = vmatmul.mubr.bf16.gmra.mxu1 %v2424_v20  ;;  %v2338_v20 = vmul.f32 %v5995_v48, %v6973_v28 }
 0x47c   : > { %2619 = vmatprep.mubr.bf16.mxu1 %v4955_v4 }
 0x47d   : > { %4458 = vmatpush3.bf16.msra.mxu0 %v4803_v33 }
 0x47e   : > { %4459 = vmatprep.subr.bf16.mxu0 %v4804_v3 }
 0x481   : > { %4460 = vmatpush3.bf16.msra.mxu0 %v4804_v3 }
 0x483   : > { %2620 = vmatmul.mubr.bf16.gmra.mxu1 %v2425_v26 }
 0x484   : > { %v4429_v29 = vpop.f32.mrf.mxu0  ;;  %2629 = vmatprep.mubr.bf16.mxu1 %v4955_v4 }
 0x485   : > { %v2253_v12 = vadd.f32 %v4429_v29, %v5990_v46  ;;  %v6976_v29 = vmax.f32 %v5828_v14, 0.0 }
 0x486   : > { %v2244_v49 = vpop.f32.mrf.mxu0 }
 0x487   : > { %v2245_v1 = vadd.f32 %v5990_v46, %v2244_v49  ;;  %v2371_v47 = vadd.f32 %v2339_v16, %v2253_v12  ;;  %v2344_v12 = vmul.f32 %v5995_v48, %v6976_v29  ;;  %v6983_v29 = vmax.f32 %v5898_v13, 0.0 }
 0x488   : > { %v4430_v31 = vpop.f32.mrf.mxu0 }
 0x489   : > { %v2256_v17 = vadd.f32 %v4430_v31, %v5990_v46  ;;  %v2369_v52 = vadd.f32 %v2337_v23, %v2245_v1  ;;  %v2403_v56 = vmax.f32 %v2371_v47, 0.0  ;;  %v6977_v31 = vmax.f32 %v5833_v41, 0.0  ;;  %v4805_v23 = vld [vmem:[%s6905_s6 + $0xc0] sm:$0xff]  }
 0x48a   : > { %v2247_v21 = vpop.f32.mrf.mxu0  ;;  %4461 = vmatprep.subr.bf16.mxu0 %v4805_v23 }
 0x48b   : > { %v2372_v55 = vadd.f32 %v2340_v32, %v2256_v17  ;;  %v2248_v15 = vadd.f32 %v5990_v46, %v2247_v21  ;;  %2630 = vmatmul.mubr.bf16.gmra.mxu1 %v2426_v5  ;;  %v2401_v62 = vmax.f32 %v2369_v52, 0.0  ;;  %v2341_v5 = vmul.f32 %v5995_v48, %v6975_v44  ;;  %4462 = vmatpush3.bf16.msra.mxu0 %v4805_v23 }
 0x48c   : > { %2639 = vmatprep.mubr.bf16.mxu1 %v4955_v4  ;;  %v2342_v37 = vmul.f32 %v5995_v48, %v6977_v31 }
 0x48d   : > { %v2404_v39 = vmax.f32 %v2372_v55, 0.0  ;;  %v2370_v8 = vadd.f32 %v2338_v20, %v2248_v15  ;;  %v6978_v15 = vmax.f32 %v5858_v61, 0.0 }
 0x48f   : > { %v2402_v36 = vmax.f32 %v2370_v8, 0.0  ;;  %v2428_v45 = vpack.c.bf16 %v2404_v39, %v2403_v56  ;;  %v2347_v28 = vmul.f32 %v5995_v48, %v6978_v15  ;;  %v6979_v8 = vmax.f32 %v5862_v40, 0.0 }
 0x491   : > { %v2427_v50 = vpack.c.bf16 %v2402_v36, %v2401_v62  ;;  %v2345_v51 = vmul.f32 %v5995_v48, %v6979_v8  ;;  %v6980_v36 = vmax.f32 %v5864_v59, 0.0  ;;  %v6988_v8 = vmax.f32 %v5936_v25, 0.0 }
 0x493   : > { %2640 = vmatmul.mubr.bf16.gmra.mxu1 %v2427_v50 }
 0x494   : > { %2649 = vmatprep.mubr.bf16.mxu1 %v4955_v4 }
 0x49b   : > { %2650 = vmatmul.mubr.bf16.gmra.mxu1 %v2428_v45  ;;  %v2348_v45 = vmul.f32 %v5995_v48, %v6980_v36 }
 0x49c   : > { %2659 = vmatprep.mubr.bf16.mxu1 %v4955_v4 }
 0x4aa   : > { %v4433_v30 = vpop.f32.mrf.mxu0 }
 0x4ab   : > { %v2269_v2 = vadd.f32 %v4433_v30, %v5990_v46 }
 0x4ac   : > { %v2260_v38 = vpop.f32.mrf.mxu0 }
 0x4ad   : > { %v2261_v34 = vadd.f32 %v5990_v46, %v2260_v38  ;;  %v2375_v63 = vadd.f32 %v2343_v19, %v2269_v2 }
 0x4ae   : > { %v4434_v60 = vpop.f32.mrf.mxu0 }
 0x4af   : > { %v2272_v26 = vadd.f32 %v4434_v60, %v5990_v46  ;;  %v2373_v43 = vadd.f32 %v2341_v5, %v2261_v34  ;;  %v2407_v47 = vmax.f32 %v2375_v63, 0.0  ;;  %v2351_v63 = vmul.f32 %v5995_v48, %v6982_v42 }
 0x4b0   : > { %v2263_v49 = vpop.f32.mrf.mxu0 }
 0x4b1   : > { %v2376_v16 = vadd.f32 %v2344_v12, %v2272_v26  ;;  %v2264_v1 = vadd.f32 %v5990_v46, %v2263_v49  ;;  %v2405_v17 = vmax.f32 %v2373_v43, 0.0  ;;  %v2349_v12 = vmul.f32 %v5995_v48, %v6983_v29 }
 0x4b2   : > { %v6984_v49 = vmax.f32 %v5900_v18, 0.0 }
 0x4b3   : > { %v2408_v58 = vmax.f32 %v2376_v16, 0.0  ;;  %v2374_v14 = vadd.f32 %v2342_v37, %v2264_v1  ;;  %v6985_v37 = vmax.f32 %v5905_v6, 0.0  ;;  %v6986_v6 = vmax.f32 %v5930_v11, 0.0 }
 0x4b4   : > { %v2352_v43 = vmul.f32 %v5995_v48, %v6984_v49 }
 0x4b5   : > { %v2406_v27 = vmax.f32 %v2374_v14, 0.0  ;;  %v2430_v32 = vpack.c.bf16 %v2408_v58, %v2407_v47  ;;  %v2350_v47 = vmul.f32 %v5995_v48, %v6985_v37 }
 0x4b7   : > { %v2429_v21 = vpack.c.bf16 %v2406_v27, %v2405_v17 }
 0x4b9   : > { %2660 = vmatmul.mubr.bf16.gmra.mxu1 %v2429_v21 }
 0x4ba   : > { %2669 = vmatprep.mubr.bf16.mxu1 %v4955_v4 }
 0x4c1   : > { %2670 = vmatmul.mubr.bf16.gmra.mxu1 %v2430_v32 }
 0x4c2   : > { %2679 = vmatprep.mubr.bf16.mxu1 %v4955_v4 }
 0x4d0   : > { %v4437_v41 = vpop.f32.mrf.mxu0 }
 0x4d1   : > { %v2285_v52 = vadd.f32 %v4437_v41, %v5990_v46 }
 0x4d2   : > { %v2276_v55 = vpop.f32.mrf.mxu0 }
 0x4d3   : > { %v2277_v20 = vadd.f32 %v5990_v46, %v2276_v55  ;;  %v2379_v39 = vadd.f32 %v2347_v28, %v2285_v52  ;;  %v2355_v52 = vmul.f32 %v5995_v48, %v6986_v6 }
 0x4d4   : > { %v4438_v56 = vpop.f32.mrf.mxu0 }
 0x4d5   : > { %v2288_v62 = vadd.f32 %v4438_v56, %v5990_v46  ;;  %v2377_v0 = vadd.f32 %v2345_v51, %v2277_v20  ;;  %v2411_v30 = vmax.f32 %v2379_v39, 0.0  ;;  %v6987_v20 = vmax.f32 %v5934_v9, 0.0  ;;  %v6167_v9 = vld [vmem:[%s6904_s5 + $0x2] sm:$0x3] }
 0x4d6   : > { %v2279_v50 = vpop.f32.mrf.mxu0  ;;  %v2356_v51 = vmul.f32 %v5995_v48, %v6988_v8  ;;  %v6173_v25 = vrot.slane %v6167_v9, %v5214_v53 }
 0x4d7   : > { %v2380_v10 = vadd.f32 %v2348_v45, %v2288_v62  ;;  %v2280_v61 = vadd.f32 %v5990_v46, %v2279_v50  ;;  %v2409_v33 = vmax.f32 %v2377_v0, 0.0  ;;  %v2353_v56 = vmul.f32 %v5995_v48, %v6987_v20 }
 0x4d8   : > { %v6989_v50 = vmax.f32 %v5941_v24, 0.0 }
 0x4d9   : > { %v2412_v2 = vmax.f32 %v2380_v10, 0.0  ;;  %v2378_v40 = vadd.f32 %v2346_v7, %v2280_v61 }
 0x4da   : > { %v2354_v0 = vmul.f32 %v5995_v48, %v6989_v50 }
 0x4db   : > { %v2410_v38 = vmax.f32 %v2378_v40, 0.0  ;;  %v2432_v57 = vpack.c.bf16 %v2412_v2, %v2411_v30 }
 0x4dd   : > { %v2431_v19 = vpack.c.bf16 %v2410_v38, %v2409_v33 }
 0x4df   : > { %2680 = vmatmul.mubr.bf16.gmra.mxu1 %v2431_v19 }
 0x4e0   : > { %2689 = vmatprep.mubr.bf16.mxu1 %v4955_v4 }
 0x4e7   : > { %2690 = vmatmul.mubr.bf16.gmra.mxu1 %v2432_v57 }
 0x4e8   : > { %2699 = vmatprep.mubr.bf16.mxu1 %v4955_v4 }
 0x4f6   : > { %v4441_v59 = vpop.f32.mrf.mxu0 }
 0x4f7   : > { %v2301_v34 = vadd.f32 %v4441_v59, %v5990_v46 }
 0x4f8   : > { %v2292_v60 = vpop.f32.mrf.mxu0 }
 0x4f9   : > { %v2293_v44 = vadd.f32 %v5990_v46, %v2292_v60  ;;  %v2383_v26 = vadd.f32 %v2351_v63, %v2301_v34 }
 0x4fa   : > { %v4442_v5 = vpop.f32.mrf.mxu0 }
 0x4fb   : > { %v2304_v3 = vadd.f32 %v4442_v5, %v5990_v46  ;;  %v2381_v1 = vadd.f32 %v2349_v12, %v2293_v44  ;;  %v2415_v58 = vmax.f32 %v2383_v26, 0.0 }
 0x4fc   : > { %v2295_v16 = vpop.f32.mrf.mxu0 }
 0x4fd   : > { %v2384_v31 = vadd.f32 %v2352_v43, %v2304_v3  ;;  %v2296_v22 = vadd.f32 %v5990_v46, %v2295_v16  ;;  %v2413_v23 = vmax.f32 %v2381_v1, 0.0 }
 0x4ff   : > { %v2416_v14 = vmax.f32 %v2384_v31, 0.0  ;;  %v2382_v13 = vadd.f32 %v2350_v47, %v2296_v22 }
 0x501   : > { %v2434_v17 = vpack.c.bf16 %v2416_v14, %v2415_v58  ;;  %v2414_v27 = vmax.f32 %v2382_v13, 0.0 }
 0x503   : > { %v2433_v32 = vpack.c.bf16 %v2414_v27, %v2413_v23 }
 0x505   : > { %2700 = vmatmul.mubr.bf16.gmra.mxu1 %v2433_v32 }
 0x506   : > { %2709 = vmatprep.mubr.bf16.mxu1 %v4955_v4 }
 0x50d   : > { %2710 = vmatmul.mubr.bf16.gmra.mxu1 %v2434_v17 }
 0x50e   : > { %2719 = vmatprep.mubr.bf16.mxu1 %v4955_v4 }
 0x51c   : > { %v4445_v18 = vpop.f32.mrf.mxu0 }
 0x51d   : > { %v2317_v21 = vadd.f32 %v4445_v18, %v5990_v46 }
 0x51e   : > { %v2308_v41 = vpop.f32.mrf.mxu0 }
 0x51f   : > { %v2309_v55 = vadd.f32 %v5990_v46, %v2308_v41  ;;  %v2387_v28 = vadd.f32 %v2355_v52, %v2317_v21 }
 0x520   : > { %v4446_v15 = vpop.f32.mrf.mxu0 }
 0x521   : > { %v2320_v39 = vadd.f32 %v4446_v15, %v5990_v46  ;;  %v2385_v36 = vadd.f32 %v2353_v56, %v2309_v55  ;;  %v2419_v61 = vmax.f32 %v2387_v28, 0.0 }
 0x522   : > { %v2311_v62 = vpop.f32.mrf.mxu0 }
 0x523   : > { %v2388_v45 = vadd.f32 %v2356_v51, %v2320_v39  ;;  %v2312_v11 = vadd.f32 %v5990_v46, %v2311_v62  ;;  %v6169_v10 = vpop.f32.mrf.mxu1  ;;  %v2417_v46 = vmax.f32 %v2385_v36, 0.0 }
 0x525   : > { %v2420_v35 = vmax.f32 %v2388_v45, 0.0  ;;  %v2386_v7 = vadd.f32 %v2354_v0, %v2312_v11  ;;  %v2583_v30 = vpop.f32.mrf.mxu1 }
 0x526   : > { %v2584_v48 = vadd.f32 %v2583_v30, %v6173_v25 }
 0x527   : > { %v2436_v2 = vpack.c.bf16 %v2420_v35, %v2419_v61  ;;  %v2418_v24 = vmax.f32 %v2386_v7, 0.0  ;;  %v6175_v40 = vpop.f32.mrf.mxu1 }
 0x528   : > { %v2740_v53 = vmax.f32 %v2584_v48, 0.0 }
 0x529   : > { %v2435_v33 = vpack.c.bf16 %v2418_v24, %v2417_v46  ;;  %v2587_v38 = vpop.f32.mrf.mxu1  ;;  %v4806_v24 = vld [vmem:[%s6905_s6 + $0x138] sm:$0xff]  }
 0x52a   : > { %v2588_v57 = vadd.f32 %v2587_v38, %v6173_v25  ;;  %4495 = vmatprep.subr.bf16.mxu0 %v4806_v24 }
 0x52b   : > { %v6179_v19 = vpop.f32.mrf.mxu1  ;;  %2720 = vmatmul.mubr.bf16.gmra.mxu1 %v2435_v33 }
 0x52c   : > { %v2741_v59 = vmax.f32 %v2588_v57, 0.0  ;;  %2729 = vmatprep.mubr.bf16.mxu1 %v4955_v4 }
 0x52d   : > { %v2593_v34 = vpop.f32.mrf.mxu1 }
 0x52e   : > { %v2772_v60 = vpack.c.bf16 %v2741_v59, %v2740_v53  ;;  %v2594_v63 = vadd.f32 %v2593_v34, %v6173_v25 }
 0x52f   : > { %v6182_v42 = vpop.f32.mrf.mxu1 }
 0x530   : > { %4463 = vmatprep.mubr.bf16.mxu0 %v2772_v60  ;;  %v2742_v29 = vmax.f32 %v2594_v63, 0.0 }
 0x531   : > { %v2597_v44 = vpop.f32.mrf.mxu1 }
 0x532   : > { %v2598_v5 = vadd.f32 %v2597_v44, %v6173_v25 }
 0x533   : > { %v6186_v26 = vpop.f32.mrf.mxu1  ;;  %2730 = vmatmul.mubr.bf16.gmra.mxu1 %v2436_v2 }
 0x534   : > { %v2743_v12 = vmax.f32 %v2598_v5, 0.0 }
 0x535   : > { %v2603_v3 = vpop.f32.mrf.mxu1 }
 0x536   : > { %v2773_v49 = vpack.c.bf16 %v2743_v12, %v2742_v29  ;;  %v2604_v4 = vadd.f32 %v2603_v3, %v6173_v25  ;;  %v4807_v12 = vld [vmem:[%s6905_s6 + $0x130] sm:$0xff]   ;;  %v4808_v3 = vld [vmem:[%s6905_s6 + $0x128] sm:$0xff]  }
 0x537   : > { %v6188_v43 = vpop.f32.mrf.mxu1 }
 0x538   : > { %4464 = vmatmul.mubr.bf16.vlgmr.msra.gmra.mxu0 %v2773_v49  ;;  %v2744_v22 = vmax.f32 %v2604_v4, 0.0  ;;  %v4809_v49 = vld [vmem:[%s6905_s6 + $0x120] sm:$0xff]   ;;  %v4810_v4 = vld [vmem:[%s6905_s6 + $0x118] sm:$0xff]  }
 0x539   : > { %v2607_v16 = vpop.f32.mrf.mxu1  ;;  %4496 = vmatpush3.bf16.msra.mxu0 %v4806_v24 }
 0x53a   : > { %v2608_v1 = vadd.f32 %v2607_v16, %v6173_v25  ;;  %4497 = vmatprep.subr.bf16.mxu0 %v4807_v12 }
 0x53b   : > { %v6192_v31 = vpop.f32.mrf.mxu1 }
 0x53c   : > { %v2745_v37 = vmax.f32 %v2608_v1, 0.0 }
 0x53d   : > { %v2613_v47 = vpop.f32.mrf.mxu1  ;;  %4498 = vmatpush3.bf16.msra.mxu0 %v4807_v12 }
 0x53e   : > { %v2774_v58 = vpack.c.bf16 %v2745_v37, %v2744_v22  ;;  %v2614_v13 = vadd.f32 %v2613_v47, %v6173_v25  ;;  %4499 = vmatprep.subr.bf16.mxu0 %v4808_v3  ;;  %v4811_v22 = vld [vmem:[%s6905_s6 + $0x110] sm:$0xff]  }
 0x53f   : > { %v6194_v14 = vpop.f32.mrf.mxu1 }
 0x540   : > { %4467 = vmatprep.mubr.bf16.mxu0 %v2774_v58  ;;  %v2746_v32 = vmax.f32 %v2614_v13, 0.0  ;;  %v4812_v13 = vld [vmem:[%s6905_s6 + $0x108] sm:$0xff]  }
 0x541   : > { %v2617_v23 = vpop.f32.mrf.mxu1  ;;  %4500 = vmatpush3.bf16.msra.mxu0 %v4808_v3 }
 0x542   : > { %v2618_v17 = vadd.f32 %v2617_v23, %v6173_v25  ;;  %4501 = vmatprep.subr.bf16.mxu0 %v4809_v49 }
 0x543   : > { %v6198_v27 = vpop.f32.mrf.mxu1 }
 0x544   : > { %v2747_v18 = vmax.f32 %v2618_v17, 0.0 }
 0x545   : > { %v2623_v21 = vpop.f32.mrf.mxu1  ;;  %4502 = vmatpush3.bf16.msra.mxu0 %v4809_v49 }
 0x546   : > { %v2775_v41 = vpack.c.bf16 %v2747_v18, %v2746_v32  ;;  %v2624_v52 = vadd.f32 %v2623_v21, %v6173_v25  ;;  %4503 = vmatprep.subr.bf16.mxu0 %v4810_v4 }
 0x547   : > { %v6200_v6 = vpop.f32.mrf.mxu1 }
 0x548   : > { %4468 = vmatmul.mubr.bf16.gmra.mxu0 %v2775_v41  ;;  %v2748_v20 = vmax.f32 %v2624_v52, 0.0  ;;  %v4813_v41 = vld [vmem:[%s6905_s6 + $0x100] sm:$0xff]  }
 0x549   : > { %v2627_v55 = vpop.f32.mrf.mxu1  ;;  %4504 = vmatpush3.bf16.msra.mxu0 %v4810_v4 }
 0x54a   : > { %v2628_v15 = vadd.f32 %v2627_v55, %v6173_v25  ;;  %4505 = vmatprep.subr.bf16.mxu0 %v4811_v22 }
 0x54b   : > { %v6204_v28 = vpop.f32.mrf.mxu1 }
 0x54c   : > { %v2749_v56 = vmax.f32 %v2628_v15, 0.0 }
 0x54d   : > { %v2633_v39 = vpop.f32.mrf.mxu1  ;;  %4506 = vmatpush3.bf16.msra.mxu0 %v4811_v22 }
 0x54e   : > { %v2776_v8 = vpack.c.bf16 %v2749_v56, %v2748_v20  ;;  %v2634_v62 = vadd.f32 %v2633_v39, %v6173_v25  ;;  %4507 = vmatprep.subr.bf16.mxu0 %v4812_v13 }
 0x54f   : > { %v6206_v51 = vpop.f32.mrf.mxu1 }
 0x550   : > { %4471 = vmatprep.mubr.bf16.mxu0 %v2776_v8  ;;  %v2750_v50 = vmax.f32 %v2634_v62, 0.0 }
 0x551   : > { %v2637_v36 = vpop.f32.mrf.mxu1  ;;  %4508 = vmatpush3.bf16.msra.mxu0 %v4812_v13 }
 0x552   : > { %v2638_v45 = vadd.f32 %v2637_v36, %v6173_v25  ;;  %4509 = vmatprep.subr.bf16.mxu0 %v4813_v41 }
 0x553   : > { %v6210_v11 = vpop.f32.mrf.mxu1 }
 0x554   : > { %v2751_v0 = vmax.f32 %v2638_v45, 0.0 }
 0x555   : > { %v2643_v61 = vpop.f32.mrf.mxu1  ;;  %4510 = vmatpush3.bf16.msra.mxu0 %v4813_v41 }
 0x556   : > { %v2777_v35 = vpack.c.bf16 %v2751_v0, %v2750_v50  ;;  %v2644_v30 = vadd.f32 %v2643_v61, %v6173_v25 }
 0x557   : > { %v6212_v7 = vpop.f32.mrf.mxu1 }
 0x558   : > { %4472 = vmatmul.mubr.bf16.gmra.mxu0 %v2777_v35  ;;  %v2752_v33 = vmax.f32 %v2644_v30, 0.0 }
 0x559   : > { %v2647_v46 = vpop.f32.mrf.mxu1 }
 0x55a   : > { %v2648_v2 = vadd.f32 %v2647_v46, %v6173_v25 }
 0x55b   : > { %v6219_v48 = vpop.f32.mrf.mxu1 }
 0x55c   : > { %v2753_v38 = vmax.f32 %v2648_v2, 0.0 }
 0x55d   : > { %v2653_v57 = vpop.f32.mrf.mxu1 }
 0x55e   : > { %v2778_v53 = vpack.c.bf16 %v2753_v38, %v2752_v33  ;;  %v2654_v34 = vadd.f32 %v2653_v57, %v6173_v25 }
 0x55f   : > { %v6221_v59 = vpop.f32.mrf.mxu1 }
 0x560   : > { %4475 = vmatprep.mubr.bf16.mxu0 %v2778_v53  ;;  %v2754_v44 = vmax.f32 %v2654_v34, 0.0 }
 0x561   : > { %v2657_v60 = vpop.f32.mrf.mxu1 }
 0x562   : > { %v2658_v63 = vadd.f32 %v2657_v60, %v6173_v25 }
 0x564   : > { %v2755_v5 = vmax.f32 %v2658_v63, 0.0 }
 0x566   : > { %v2779_v29 = vpack.c.bf16 %v2755_v5, %v2754_v44 }
 0x568   : > { %4476 = vmatmul.mubr.bf16.gmra.mxu0 %v2779_v29 }
 0x579   : > { %v6237_v16 = vpop.f32.mrf.mxu1 }
 0x57b   : > { %v2663_v1 = vpop.f32.mrf.mxu1 }
 0x57c   : > { %v2664_v47 = vadd.f32 %v2663_v1, %v6173_v25 }
 0x57d   : > { %v6242_v37 = vpop.f32.mrf.mxu1 }
 0x57e   : > { %v2756_v32 = vmax.f32 %v2664_v47, 0.0 }
 0x57f   : > { %v2667_v58 = vpop.f32.mrf.mxu1 }
 0x580   : > { %v2668_v23 = vadd.f32 %v2667_v58, %v6173_v25 }
 0x581   : > { %v6249_v17 = vpop.f32.mrf.mxu1 }
 0x582   : > { %v2757_v18 = vmax.f32 %v2668_v23, 0.0 }
 0x583   : > { %v2673_v21 = vpop.f32.mrf.mxu1 }
 0x584   : > { %v2780_v52 = vpack.c.bf16 %v2757_v18, %v2756_v32  ;;  %v2674_v15 = vadd.f32 %v2673_v21, %v6173_v25 }
 0x585   : > { %v6254_v55 = vpop.f32.mrf.mxu1 }
 0x586   : > { %4479 = vmatprep.mubr.bf16.mxu0 %v2780_v52  ;;  %v2758_v39 = vmax.f32 %v2674_v15, 0.0 }
 0x587   : > { %v2677_v20 = vpop.f32.mrf.mxu1 }
 0x588   : > { %v2678_v56 = vadd.f32 %v2677_v20, %v6173_v25 }
 0x58a   : > { %v2759_v8 = vmax.f32 %v2678_v56, 0.0 }
 0x58c   : > { %v2781_v62 = vpack.c.bf16 %v2759_v8, %v2758_v39 }
 0x58e   : > { %4480 = vmatmul.mubr.bf16.gmra.mxu0 %v2781_v62 }
 0x59f   : > { %v6258_v36 = vpop.f32.mrf.mxu1 }
 0x5a1   : > { %v2683_v45 = vpop.f32.mrf.mxu1 }
 0x5a2   : > { %v2684_v0 = vadd.f32 %v2683_v45, %v6173_v25 }
 0x5a3   : > { %v6260_v50 = vpop.f32.mrf.mxu1 }
 0x5a4   : > { %v2760_v46 = vmax.f32 %v2684_v0, 0.0 }
 0x5a5   : > { %v2687_v61 = vpop.f32.mrf.mxu1 }
 0x5a6   : > { %v2688_v35 = vadd.f32 %v2687_v61, %v6173_v25 }
 0x5a7   : > { %v6264_v30 = vpop.f32.mrf.mxu1 }
 0x5a8   : > { %v2761_v2 = vmax.f32 %v2688_v35, 0.0 }
 0x5a9   : > { %v2693_v24 = vpop.f32.mrf.mxu1 }
 0x5aa   : > { %v2782_v33 = vpack.c.bf16 %v2761_v2, %v2760_v46  ;;  %v2694_v57 = vadd.f32 %v2693_v24, %v6173_v25  ;;  %v6292_v46 = vrot.slane %v6167_v9, %v5216_v54 }
 0x5ab   : > { %v6266_v38 = vpop.f32.mrf.mxu1 }
 0x5ac   : > { %4483 = vmatprep.mubr.bf16.mxu0 %v2782_v33  ;;  %v2762_v60 = vmax.f32 %v2694_v57, 0.0  ;;  %v6297_v33 = vld [vmem:[%s6906_s7 + $0x3] ss:$0 sm:$0xff]  ;;  %v2592_v57 = vadd.f32 %v6179_v19, %v6292_v46  ;;  %v2582_v54 = vadd.f32 %v6169_v10, %v6292_v46  ;;  %v2596_v9 = vadd.f32 %v6182_v42, %v6292_v46 }
 0x5ad   : > { %v2697_v53 = vpop.f32.mrf.mxu1 }
 0x5ae   : > { %v2698_v34 = vadd.f32 %v2697_v53, %v6173_v25 }
 0x5b0   : > { %v2763_v63 = vmax.f32 %v2698_v34, 0.0 }
 0x5b2   : > { %v2783_v44 = vpack.c.bf16 %v2763_v63, %v2762_v60 }
 0x5b4   : > { %4484 = vmatmul.mubr.bf16.gmra.mxu0 %v2783_v44 }
 0x5c5   : > { %v6270_v5 = vpop.f32.mrf.mxu1 }
 0x5c7   : > { %v2703_v29 = vpop.f32.mrf.mxu1 }
 0x5c8   : > { %v2704_v3 = vadd.f32 %v2703_v29, %v6173_v25  ;;  %v6309_v29 = vstv %s4101_s24  ;;  %s4156_s24 = sshll.u32 %s4939_s12, 7 }
 0x5c9   : > { %v6272_v12 = vpop.f32.mrf.mxu1  ;;  %v3024_v42 = vmul.f32 %v6309_v29, %v2582_v54  ;;  %s3845_s25 = scalar_lea.hbm %s6908_s9, %s4156_s24 }
 0x5ca   : > { %v2764_v22 = vmax.f32 %v2704_v3, 0.0 }
 0x5cb   : > { %v2707_v49 = vpop.f32.mrf.mxu1 }
 0x5cc   : > { %v2708_v4 = vadd.f32 %v2707_v49, %v6173_v25  ;;  %v2586_v49 = vadd.f32 %v6175_v40, %v6292_v46 }
 0x5cd   : > { %v6276_v1 = vpop.f32.mrf.mxu1 }
 0x5ce   : > { %v2765_v47 = vmax.f32 %v2708_v4, 0.0  ;;  %v3026_v4 = vmul.f32 %v6309_v29, %v2592_v57 }
 0x5cf   : > { %v2713_v58 = vpop.f32.mrf.mxu1 }
 0x5d0   : > { %v2784_v13 = vpack.c.bf16 %v2765_v47, %v2764_v22  ;;  %v2714_v32 = vadd.f32 %v2713_v58, %v6173_v25 }
 0x5d1   : > { %v6278_v23 = vpop.f32.mrf.mxu1 }
 0x5d2   : > { %4487 = vmatprep.mubr.bf16.mxu0 %v2784_v13  ;;  %v2766_v41 = vmax.f32 %v2714_v32, 0.0  ;;  %v3027_v13 = vmul.f32 %v6309_v29, %v2596_v9 }
 0x5d3   : > { %v2717_v18 = vpop.f32.mrf.mxu1 }
 0x5d4   : > { %v2718_v21 = vadd.f32 %v2717_v18, %v6173_v25 }
 0x5d6   : > { %v2767_v52 = vmax.f32 %v2718_v21, 0.0 }
 0x5d8   : > { %v2785_v15 = vpack.c.bf16 %v2767_v52, %v2766_v41  ;;  %v3025_v41 = vmul.f32 %v6309_v29, %v2586_v49 }
 0x5da   : > { %4488 = vmatmul.mubr.bf16.gmra.mxu0 %v2785_v15 }
 0x5eb   : > { %v6282_v20 = vpop.f32.mrf.mxu1 }
 0x5ed   : > { %v2723_v56 = vpop.f32.mrf.mxu1 }
 0x5ee   : > { %v2724_v8 = vadd.f32 %v2723_v56, %v6173_v25 }
 0x5ef   : > { %v6284_v39 = vpop.f32.mrf.mxu1 }
 0x5f0   : > { %v2768_v61 = vmax.f32 %v2724_v8, 0.0 }
 0x5f1   : > { %v2727_v62 = vpop.f32.mrf.mxu1 }
 0x5f2   : > { %v2728_v45 = vadd.f32 %v2727_v62, %v6173_v25 }
 0x5f3   : > { %v6288_v0 = vpop.f32.mrf.mxu1 }
 0x5f4   : > { %v2769_v35 = vmax.f32 %v2728_v45, 0.0 }
 0x5f5   : > { %v2733_v2 = vpop.f32.mrf.mxu1 }
 0x5f6   : > { %v2786_v24 = vpack.c.bf16 %v2769_v35, %v2768_v61  ;;  %v2734_v34 = vadd.f32 %v2733_v2, %v6173_v25 }
 0x5f7   : > { %v6301_v53 = vpop.f32.mrf.mxu1 }
 0x5f8   : > { %v4465_v60 = vpop.f32.mrf.mxu0  ;;  %4491 = vmatprep.mubr.bf16.mxu0 %v2786_v24  ;;  %v2770_v47 = vmax.f32 %v2734_v34, 0.0  ;;  %v2612_v24 = vadd.f32 %v6192_v31, %v6292_v46  ;;  %v2602_v34 = vadd.f32 %v6186_v26, %v6292_v46 }
 0x5f9   : > { %v2904_v63 = vadd.f32 %v4465_v60, %v6297_v33  ;;  %v2737_v44 = vpop.f32.mrf.mxu1  ;;  %v2616_v60 = vadd.f32 %v6194_v14, %v6292_v46 }
 0x5fa   : > { %v2738_v3 = vadd.f32 %v2737_v44, %v6173_v25  ;;  %v2895_v19 = vpop.f32.mrf.mxu0  ;;  %v3030_v44 = vmul.f32 %v6309_v29, %v2612_v24  ;;  %v2636_v24 = vadd.f32 %v6206_v51, %v6292_v46 }
 0x5fb   : > { %v2896_v22 = vadd.f32 %v6297_v33, %v2895_v19  ;;  %v6318_v32 = vadd.f32 %v3026_v4, %v2904_v63  ;;  %v2606_v63 = vadd.f32 %v6188_v43, %v6292_v46  ;;  %v3028_v19 = vmul.f32 %v6309_v29, %v2602_v34 }
 0x5fc   : > { %v2771_v10 = vmax.f32 %v2738_v3, 0.0  ;;  %v4466_v58 = vpop.f32.mrf.mxu0  ;;  %v3031_v49 = vmul.f32 %v6309_v29, %v2616_v60  ;;  %v2626_v60 = vadd.f32 %v6200_v6, %v6292_v46 }
 0x5fd   : > { %v2907_v18 = vadd.f32 %v4466_v58, %v6297_v33  ;;  %v6322_v40 = vadd.f32 %v3024_v42, %v2896_v22  ;;  %v3090_v56 = vmax.f32 %v6318_v32, 0.0  ;;  %v3029_v22 = vmul.f32 %v6309_v29, %v2606_v63 }
 0x5fe   : > { %v2787_v25 = vpack.c.bf16 %v2771_v10, %v2770_v47  ;;  %v2898_v21 = vpop.f32.mrf.mxu0 }
 0x5ff   : > { %v6324_v52 = vadd.f32 %v3027_v13, %v2907_v18  ;;  %v2899_v15 = vadd.f32 %v6297_v33, %v2898_v21  ;;  %v3088_v45 = vmax.f32 %v6322_v40, 0.0 }
 0x600   : > { %4492 = vmatmul.mubr.bf16.gmra.mxu0 %v2787_v25 }
 0x601   : > { %v3091_v8 = vmax.f32 %v6324_v52, 0.0  ;;  %v6329_v62 = vadd.f32 %v3025_v41, %v2899_v15  ;;  %v2632_v15 = vadd.f32 %v6204_v28, %v6292_v46 }
 0x603   : > { %v3121_v61 = vpack.c.bf16 %v3091_v8, %v3090_v56  ;;  %v3089_v35 = vmax.f32 %v6329_v62, 0.0 }
 0x605   : > { %v3120_v2 = vpack.c.bf16 %v3089_v35, %v3088_v45 }
 0x607   : > { %4511 = vmatprep.mubr.bf16.mxu0 %v3120_v2  ;;  %v2622_v2 = vadd.f32 %v6198_v27, %v6292_v46 }
 0x608   : > { %v4469_v57 = vpop.f32.mrf.mxu0  ;;  %4512 = vmatmul.mubr.bf16.vlgmr.msra.gmra.mxu0 %v3121_v61 }
 0x609   : > { %v2920_v54 = vadd.f32 %v4469_v57, %v6297_v33  ;;  %v3032_v63 = vmul.f32 %v6309_v29, %v2622_v2 }
 0x60a   : > { %v2911_v9 = vpop.f32.mrf.mxu0 }
 0x60b   : > { %v2912_v3 = vadd.f32 %v6297_v33, %v2911_v9  ;;  %v6354_v4 = vadd.f32 %v3030_v44, %v2920_v54  ;;  %v3034_v54 = vmul.f32 %v6309_v29, %v2632_v15  ;;  %v3035_v44 = vmul.f32 %v6309_v29, %v2636_v24 }
 0x60c   : > { %v4470_v31 = vpop.f32.mrf.mxu0  ;;  %v2642_v24 = vadd.f32 %v6210_v11, %v6292_v46 }
 0x60d   : > { %v2923_v26 = vadd.f32 %v4470_v31, %v6297_v33  ;;  %v6358_v47 = vadd.f32 %v3028_v19, %v2912_v3  ;;  %v3094_v58 = vmax.f32 %v6354_v4, 0.0  ;;  %v3033_v31 = vmul.f32 %v6309_v29, %v2626_v60 }
 0x60e   : > { %v2914_v14 = vpop.f32.mrf.mxu0 }
 0x60f   : > { %v6360_v10 = vadd.f32 %v3031_v49, %v2923_v26  ;;  %v2915_v43 = vadd.f32 %v6297_v33, %v2914_v14  ;;  %v3092_v18 = vmax.f32 %v6358_v47, 0.0 }
 0x611   : > { %v3095_v42 = vmax.f32 %v6360_v10, 0.0  ;;  %v6365_v13 = vadd.f32 %v3029_v22, %v2915_v43 }
 0x613   : > { %v3123_v25 = vpack.c.bf16 %v3095_v42, %v3094_v58  ;;  %v3093_v21 = vmax.f32 %v6365_v13, 0.0 }
 0x615   : > { %v3122_v41 = vpack.c.bf16 %v3093_v21, %v3092_v18 }
 0x617   : > { %4515 = vmatprep.mubr.bf16.mxu0 %v3122_v41 }
 0x618   : > { %v4473_v61 = vpop.f32.mrf.mxu0  ;;  %4516 = vmatmul.mubr.bf16.gmra.mxu0 %v3123_v25 }
 0x619   : > { %v2936_v57 = vadd.f32 %v4473_v61, %v6297_v33  ;;  %v2652_v61 = vadd.f32 %v6219_v48, %v6292_v46  ;;  %v4815_v48 = vld [vmem:[%s6905_s6 + $0x170] sm:$0xff]  }
 0x61a   : > { %v2927_v34 = vpop.f32.mrf.mxu0 }
 0x61b   : > { %v2928_v9 = vadd.f32 %v6297_v33, %v2927_v34  ;;  %v6390_v3 = vadd.f32 %v3034_v54, %v2936_v57  ;;  %v2656_v57 = vadd.f32 %v6221_v59, %v6292_v46  ;;  %v4814_v54 = vld [vmem:[%s6905_s6 + $0x178] sm:$0xff]   ;;  %v3036_v59 = vmul.f32 %v6309_v29, %v2642_v24 }
 0x61c   : > { %v4474_v28 = vpop.f32.mrf.mxu0  ;;  %4543 = vmatprep.subr.bf16.mxu1 %v4814_v54 }
 0x61d   : > { %v2939_v27 = vadd.f32 %v4474_v28, %v6297_v33  ;;  %v6394_v19 = vadd.f32 %v3032_v63, %v2928_v9  ;;  %v3098_v26 = vmax.f32 %v6390_v3, 0.0  ;;  %v2646_v9 = vadd.f32 %v6212_v7, %v6292_v46  ;;  %4544 = vmatpush3.bf16.msra.mxu1 %v4814_v54  ;;  %v4816_v7 = vld [vmem:[%s6905_s6 + $0x168] sm:$0xff]  }
 0x61e   : > { %v2930_v51 = vpop.f32.mrf.mxu0  ;;  %v3038_v28 = vmul.f32 %v6309_v29, %v2652_v61  ;;  %4545 = vmatprep.subr.bf16.mxu1 %v4815_v48 }
 0x61f   : > { %v6396_v49 = vadd.f32 %v3035_v44, %v2939_v27  ;;  %v2931_v6 = vadd.f32 %v6297_v33, %v2930_v51  ;;  %v3096_v43 = vmax.f32 %v6394_v19, 0.0  ;;  %v3039_v44 = vmul.f32 %v6309_v29, %v2656_v57 }
 0x621   : > { %v3099_v14 = vmax.f32 %v6396_v49, 0.0  ;;  %v6401_v22 = vadd.f32 %v3033_v31, %v2931_v6  ;;  %v3037_v6 = vmul.f32 %v6309_v29, %v2646_v9  ;;  %4546 = vmatpush3.bf16.msra.mxu1 %v4815_v48  ;;  %v4817_v48 = vld [vmem:[%s6905_s6 + $0x160] sm:$0xff]  }
 0x622   : > { %4547 = vmatprep.subr.bf16.mxu1 %v4816_v7 }
 0x623   : > { %v3125_v25 = vpack.c.bf16 %v3099_v14, %v3098_v26  ;;  %v3097_v41 = vmax.f32 %v6401_v22, 0.0 }
 0x625   : > { %v3124_v15 = vpack.c.bf16 %v3097_v41, %v3096_v43  ;;  %4548 = vmatpush3.bf16.msra.mxu1 %v4816_v7 }
 0x626   : > { %4549 = vmatprep.subr.bf16.mxu1 %v4817_v48 }
 0x627   : > { %4519 = vmatprep.mubr.bf16.mxu0 %v3124_v15 }
 0x628   : > { %v4477_v2 = vpop.f32.mrf.mxu0  ;;  %4520 = vmatmul.mubr.bf16.gmra.mxu0 %v3125_v25 }
 0x629   : > { %v2952_v34 = vadd.f32 %v4477_v2, %v6297_v33  ;;  %4550 = vmatpush3.bf16.msra.mxu1 %v4817_v48 }
 0x62a   : > { %v2943_v60 = vpop.f32.mrf.mxu0 }
 0x62b   : > { %v2944_v11 = vadd.f32 %v6297_v33, %v2943_v60  ;;  %v6432_v27 = vadd.f32 %v3038_v28, %v2952_v34  ;;  %v4818_v28 = vld [vmem:[%s6905_s6 + $0x158] sm:$0xff]  }
 0x62c   : > { %v4478_v63 = vpop.f32.mrf.mxu0  ;;  %4551 = vmatprep.subr.bf16.mxu1 %v4818_v28 }
 0x62d   : > { %v2955_v51 = vadd.f32 %v4478_v63, %v6297_v33  ;;  %v6439_v25 = vadd.f32 %v3036_v59, %v2944_v11  ;;  %v6954_v2 = vmax.f32 %v6432_v27, 0.0  ;;  %4552 = vmatpush3.bf16.msra.mxu1 %v4818_v28  ;;  %v4819_v11 = vld [vmem:[%s6905_s6 + $0x150] sm:$0xff]   ;;  %v2672_v63 = vadd.f32 %v6249_v17, %v6292_v46  ;;  %v4820_v59 = vld [vmem:[%s6905_s6 + $0x148] sm:$0xff]  }
 0x62e   : > { %v2946_v31 = vpop.f32.mrf.mxu0  ;;  %4553 = vmatprep.subr.bf16.mxu1 %v4819_v11  ;;  %v6990_v22 = vmax.f32 %v6432_v27, 0.0 }
 0x62f   : > { %v6441_v15 = vadd.f32 %v3039_v44, %v2955_v51  ;;  %v2947_v61 = vadd.f32 %v6297_v33, %v2946_v31  ;;  %v6953_v34 = vmax.f32 %v6439_v25, 0.0  ;;  %v2662_v51 = vadd.f32 %v6237_v16, %v6292_v46 }
 0x630   : > { %v2676_v31 = vadd.f32 %v6254_v55, %v6292_v46  ;;  %v3042_v17 = vmul.f32 %v6309_v29, %v2672_v63 }
 0x631   : > { %v6952_v24 = vmax.f32 %v6441_v15, 0.0  ;;  %v6446_v57 = vadd.f32 %v3037_v6, %v2947_v61  ;;  %4554 = vmatpush3.bf16.msra.mxu1 %v4819_v11  ;;  %v2666_v61 = vadd.f32 %v6242_v37, %v6292_v46  ;;  %v3040_v48 = vmul.f32 %v6309_v29, %v2662_v51 }
 0x632   : > { %4555 = vmatprep.subr.bf16.mxu1 %v4820_v59  ;;  %v3043_v55 = vmul.f32 %v6309_v29, %v2676_v31  ;;  %v6992_v27 = vmax.f32 %v6441_v15, 0.0 }
 0x633   : > { %v3127_v60 = vpack.c.bf16 %v6952_v24, %v6954_v2  ;;  %v6937_v54 = vmax.f32 %v6446_v57, 0.0  ;;  %v3041_v37 = vmul.f32 %v6309_v29, %v2666_v61 }
 0x635   : > { %v3126_v9 = vpack.c.bf16 %v6937_v54, %v6953_v34  ;;  %4556 = vmatpush3.bf16.msra.mxu1 %v4820_v59 }
 0x637   : > { %4523 = vmatprep.mubr.bf16.mxu0 %v3126_v9  ;;  %v4821_v9 = vld [vmem:[%s6905_s6 + $0x140] sm:$0xff]  }
 0x638   : > { %4524 = vmatmul.mubr.bf16.gmra.mxu0 %v3127_v60  ;;  %4557 = vmatprep.subr.bf16.mxu1 %v4821_v9 }
 0x639   : > { %4558 = vmatpush3.bf16.msra.mxu1 %v4821_v9  ;;  %v2692_v9 = vadd.f32 %v6264_v30, %v6292_v46 }
 0x64e   : > { %v4481_v44 = vpop.f32.mrf.mxu0 }
 0x64f   : > { %v2968_v7 = vadd.f32 %v4481_v44, %v6297_v33 }
 0x650   : > { %v2959_v6 = vpop.f32.mrf.mxu0 }
 0x651   : > { %v2960_v60 = vadd.f32 %v6297_v33, %v2959_v6  ;;  %v6486_v28 = vadd.f32 %v3042_v17, %v2968_v7 }
 0x652   : > { %v4482_v16 = vpop.f32.mrf.mxu0 }
 0x653   : > { %v2971_v11 = vadd.f32 %v4482_v16, %v6297_v33  ;;  %v6490_v63 = vadd.f32 %v3040_v48, %v2960_v60  ;;  %v6941_v54 = vmax.f32 %v6486_v28, 0.0  ;;  %v2682_v48 = vadd.f32 %v6258_v36, %v6292_v46 }
 0x654   : > { %v2962_v59 = vpop.f32.mrf.mxu0 }
 0x655   : > { %v6492_v44 = vadd.f32 %v3043_v55, %v2971_v11  ;;  %v2963_v6 = vadd.f32 %v6297_v33, %v2962_v59  ;;  %v6940_v7 = vmax.f32 %v6490_v63, 0.0  ;;  %v2696_v55 = vadd.f32 %v6266_v38, %v6292_v46 }
 0x656   : > { %v3044_v30 = vmul.f32 %v6309_v29, %v2682_v48 }
 0x657   : > { %v6939_v51 = vmax.f32 %v6492_v44, 0.0  ;;  %v6497_v31 = vadd.f32 %v3041_v37, %v2963_v6  ;;  %v2686_v37 = vadd.f32 %v6260_v50, %v6292_v46  ;;  %v3046_v6 = vmul.f32 %v6309_v29, %v2692_v9 }
 0x659   : > { %v3129_v17 = vpack.c.bf16 %v6939_v51, %v6941_v54  ;;  %v6938_v61 = vmax.f32 %v6497_v31, 0.0 }
 0x65b   : > { %v3128_v60 = vpack.c.bf16 %v6938_v61, %v6940_v7  ;;  %v3047_v61 = vmul.f32 %v6309_v29, %v2696_v55 }
 0x65d   : > { %4527 = vmatprep.mubr.bf16.mxu0 %v3128_v60 }
 0x65e   : > { %4528 = vmatmul.mubr.bf16.gmra.mxu0 %v3129_v17 }
 0x674   : > { %v4485_v16 = vpop.f32.mrf.mxu0 }
 0x675   : > { %v2984_v11 = vadd.f32 %v4485_v16, %v6297_v33  ;;  %v3045_v16 = vmul.f32 %v6309_v29, %v2686_v37 }
 0x676   : > { %v2975_v59 = vpop.f32.mrf.mxu0 }
 0x677   : > { %v2976_v17 = vadd.f32 %v6297_v33, %v2975_v59  ;;  %v6522_v51 = vadd.f32 %v3046_v6, %v2984_v11  ;;  %v2712_v6 = vadd.f32 %v6276_v1, %v6292_v46 }
 0x678   : > { %v4486_v60 = vpop.f32.mrf.mxu0 }
 0x679   : > { %v2987_v36 = vadd.f32 %v4486_v60, %v6297_v33  ;;  %v6526_v7 = vadd.f32 %v3044_v30, %v2976_v17  ;;  %v6945_v9 = vmax.f32 %v6522_v51, 0.0  ;;  %v2702_v60 = vadd.f32 %v6270_v5, %v6292_v46 }
 0x67a   : > { %v2978_v38 = vpop.f32.mrf.mxu0  ;;  %v2716_v30 = vadd.f32 %v6278_v23, %v6292_v46 }
 0x67b   : > { %v6528_v54 = vadd.f32 %v3047_v61, %v2987_v36  ;;  %v2979_v50 = vadd.f32 %v6297_v33, %v2978_v38  ;;  %v6944_v55 = vmax.f32 %v6526_v7, 0.0  ;;  %v3048_v1 = vmul.f32 %v6309_v29, %v2702_v60 }
 0x67d   : > { %v6943_v59 = vmax.f32 %v6528_v54, 0.0  ;;  %v6533_v48 = vadd.f32 %v3045_v16, %v2979_v50  ;;  %v2706_v16 = vadd.f32 %v6272_v12, %v6292_v46  ;;  %v3050_v50 = vmul.f32 %v6309_v29, %v2712_v6 }
 0x67f   : > { %v3131_v11 = vpack.c.bf16 %v6943_v59, %v6945_v9  ;;  %v6942_v37 = vmax.f32 %v6533_v48, 0.0 }
 0x681   : > { %v3130_v61 = vpack.c.bf16 %v6942_v37, %v6944_v55  ;;  %v3051_v37 = vmul.f32 %v6309_v29, %v2716_v30 }
 0x683   : > { %4531 = vmatprep.mubr.bf16.mxu0 %v3130_v61 }
 0x684   : > { %4532 = vmatmul.mubr.bf16.gmra.mxu0 %v3131_v11 }
 0x69a   : > { %v4489_v17 = vpop.f32.mrf.mxu0 }
 0x69b   : > { %v3000_v36 = vadd.f32 %v4489_v17, %v6297_v33  ;;  %v3049_v17 = vmul.f32 %v6309_v29, %v2706_v16 }
 0x69c   : > { %v2991_v38 = vpop.f32.mrf.mxu0 }
 0x69d   : > { %v2992_v11 = vadd.f32 %v6297_v33, %v2991_v38  ;;  %v6558_v59 = vadd.f32 %v3050_v50, %v3000_v36  ;;  %v2732_v50 = vadd.f32 %v6288_v0, %v6292_v46 }
 0x69e   : > { %v4490_v61 = vpop.f32.mrf.mxu0 }
 0x69f   : > { %v3003_v5 = vadd.f32 %v4490_v61, %v6297_v33  ;;  %v6562_v55 = vadd.f32 %v3048_v1, %v2992_v11  ;;  %v6949_v6 = vmax.f32 %v6558_v59, 0.0  ;;  %v2722_v61 = vadd.f32 %v6282_v20, %v6292_v46 }
 0x6a0   : > { %v2994_v23 = vpop.f32.mrf.mxu0  ;;  %v2736_v1 = vadd.f32 %v6301_v53, %v6292_v46 }
 0x6a1   : > { %v6564_v9 = vadd.f32 %v3051_v37, %v3003_v5  ;;  %v2995_v12 = vadd.f32 %v6297_v33, %v2994_v23  ;;  %v6948_v30 = vmax.f32 %v6562_v55, 0.0  ;;  %v3052_v0 = vmul.f32 %v6309_v29, %v2722_v61 }
 0x6a3   : > { %v6947_v38 = vmax.f32 %v6564_v9, 0.0  ;;  %v6569_v60 = vadd.f32 %v3049_v17, %v2995_v12  ;;  %v2726_v17 = vadd.f32 %v6284_v39, %v6292_v46  ;;  %v3054_v12 = vmul.f32 %v6309_v29, %v2732_v50 }
 0x6a5   : > { %v3133_v36 = vpack.c.bf16 %v6947_v38, %v6949_v6  ;;  %v6946_v16 = vmax.f32 %v6569_v60, 0.0 }
 0x6a7   : > { %v3132_v37 = vpack.c.bf16 %v6946_v16, %v6948_v30  ;;  %v3055_v16 = vmul.f32 %v6309_v29, %v2736_v1 }
 0x6a9   : > { %4535 = vmatprep.mubr.bf16.mxu0 %v3132_v37 }
 0x6aa   : > { %4536 = vmatmul.mubr.bf16.gmra.mxu0 %v3133_v36 }
 0x6c0   : > { %v4493_v11 = vpop.f32.mrf.mxu0 }
 0x6c1   : > { %v3016_v5 = vadd.f32 %v4493_v11, %v6297_v33  ;;  %v3053_v11 = vmul.f32 %v6309_v29, %v2726_v17 }
 0x6c2   : > { %v3007_v23 = vpop.f32.mrf.mxu0 }
 0x6c3   : > { %v3008_v36 = vadd.f32 %v6297_v33, %v3007_v23  ;;  %v6594_v38 = vadd.f32 %v3054_v12, %v3016_v5 }
 0x6c4   : > { %v4494_v37 = vpop.f32.mrf.mxu0 }
 0x6c5   : > { %v3019_v20 = vadd.f32 %v4494_v37, %v6297_v33  ;;  %v6598_v30 = vadd.f32 %v3052_v0, %v3008_v36  ;;  %v6951_v50 = vmax.f32 %v6594_v38, 0.0 }
 0x6c6   : > { %v3010_v53 = vpop.f32.mrf.mxu0 }
 0x6c7   : > { %v6600_v6 = vadd.f32 %v3055_v16, %v3019_v20  ;;  %v3011_v39 = vadd.f32 %v6297_v33, %v3010_v53  ;;  %v6956_v5 = vmax.f32 %v6598_v30, 0.0  ;;  %v6616_v33 = vld [vmem:[%s6906_s7 + $0x4] ss:$0 sm:$0xff] }
 0x6c8   : > { %v4513_v46 = vpop.f32.mrf.mxu0 }
 0x6c9   : > { %v6950_v61 = vmax.f32 %v6600_v6, 0.0  ;;  %v6605_v23 = vadd.f32 %v3053_v11, %v3011_v39  ;;  %v3252_v0 = vadd.f32 %v4513_v46, %v6616_v33 }
 0x6ca   : > { %v3243_v1 = vpop.f32.mrf.mxu0 }
 0x6cb   : > { %v3135_v29 = vpack.c.bf16 %v6950_v61, %v6951_v50  ;;  %v6955_v16 = vmax.f32 %v6605_v23, 0.0  ;;  %v3244_v12 = vadd.f32 %v6616_v33, %v3243_v1  ;;  %v3372_v50 = vmax.f32 %v3252_v0, 0.0 }
 0x6cc   : > { %v4514_v17 = vpop.f32.mrf.mxu0 }
 0x6cd   : > { %v3255_v36 = vadd.f32 %v4514_v17, %v6616_v33  ;;  %v3134_v37 = vpack.c.bf16 %v6955_v16, %v6956_v5  ;;  %v3370_v39 = vmax.f32 %v3244_v12, 0.0 }
 0x6ce   : > { %v3246_v20 = vpop.f32.mrf.mxu0 }
 0x6cf   : > { %v3247_v53 = vadd.f32 %v6616_v33, %v3246_v20  ;;  %4539 = vmatprep.mubr.bf16.mxu0 %v3134_v37  ;;  %v3373_v11 = vmax.f32 %v3255_v36, 0.0 }
 0x6d0   : > { %4540 = vmatmul.mubr.bf16.gmra.mxu0 %v3135_v29 }
 0x6d1   : > { %v3371_v61 = vmax.f32 %v3247_v53, 0.0  ;;  %v3403_v1 = vpack.c.bf16 %v3373_v11, %v3372_v50 }
 0x6d3   : > { %v3402_v24 = vpack.c.bf16 %v3371_v61, %v3370_v39 }
 0x6d5   : > { %4559 = vmatprep.mubr.bf16.mxu1 %v3402_v24 }
 0x6d6   : > { %4560 = vmatmul.mubr.bf16.vlgmr.msra.gmra.mxu1 %v3403_v1 }
 0x6d8   : > { %v4517_v17 = vpop.f32.mrf.mxu0 }
 0x6d9   : > { %v3268_v5 = vadd.f32 %v4517_v17, %v6616_v33 }
 0x6da   : > { %v3259_v34 = vpop.f32.mrf.mxu0 }
 0x6db   : > { %v3260_v16 = vadd.f32 %v6616_v33, %v3259_v34  ;;  %v3376_v0 = vmax.f32 %v3268_v5, 0.0 }
 0x6dc   : > { %v4518_v2 = vpop.f32.mrf.mxu0 }
 0x6dd   : > { %v3271_v46 = vadd.f32 %v4518_v2, %v6616_v33  ;;  %v3374_v12 = vmax.f32 %v3260_v16, 0.0 }
 0x6de   : > { %v3262_v20 = vpop.f32.mrf.mxu0 }
 0x6df   : > { %v3263_v36 = vadd.f32 %v6616_v33, %v3262_v20  ;;  %v3377_v29 = vmax.f32 %v3271_v46, 0.0 }
 0x6e1   : > { %v3375_v37 = vmax.f32 %v3263_v36, 0.0  ;;  %v3405_v50 = vpack.c.bf16 %v3377_v29, %v3376_v0 }
 0x6e3   : > { %v3404_v61 = vpack.c.bf16 %v3375_v37, %v3374_v12 }
 0x6e5   : > { %4563 = vmatprep.mubr.bf16.mxu1 %v3404_v61 }
 0x6e6   : > { %4564 = vmatmul.mubr.bf16.gmra.mxu1 %v3405_v50 }
 0x6e8   : > { %v4521_v24 = vpop.f32.mrf.mxu0 }
 0x6e9   : > { %v3284_v39 = vadd.f32 %v4521_v24, %v6616_v33 }
 0x6ea   : > { %v3275_v53 = vpop.f32.mrf.mxu0 }
 0x6eb   : > { %v3276_v34 = vadd.f32 %v6616_v33, %v3275_v53  ;;  %v3380_v5 = vmax.f32 %v3284_v39, 0.0 }
 0x6ec   : > { %v4522_v11 = vpop.f32.mrf.mxu0 }
 0x6ed   : > { %v3287_v2 = vadd.f32 %v4522_v11, %v6616_v33  ;;  %v3378_v16 = vmax.f32 %v3276_v34, 0.0 }
 0x6ee   : > { %v3278_v1 = vpop.f32.mrf.mxu0 }
 0x6ef   : > { %v3279_v17 = vadd.f32 %v6616_v33, %v3278_v1  ;;  %v3381_v46 = vmax.f32 %v3287_v2, 0.0 }
 0x6f1   : > { %v3379_v20 = vmax.f32 %v3279_v17, 0.0  ;;  %v3407_v29 = vpack.c.bf16 %v3381_v46, %v3380_v5 }
 0x6f3   : > { %v3406_v36 = vpack.c.bf16 %v3379_v20, %v3378_v16 }
 0x6f5   : > { %4567 = vmatprep.mubr.bf16.mxu1 %v3406_v36 }
 0x6f6   : > { %4568 = vmatmul.mubr.bf16.gmra.mxu1 %v3407_v29 }
 0x6f8   : > { %v4525_v12 = vpop.f32.mrf.mxu0 }
 0x6f9   : > { %v3300_v24 = vadd.f32 %v4525_v12, %v6616_v33 }
 0x6fa   : > { %v3291_v37 = vpop.f32.mrf.mxu0 }
 0x6fb   : > { %v3292_v61 = vadd.f32 %v6616_v33, %v3291_v37  ;;  %v3384_v39 = vmax.f32 %v3300_v24, 0.0 }
 0x6fc   : > { %v4526_v0 = vpop.f32.mrf.mxu0 }
 0x6fd   : > { %v3303_v50 = vadd.f32 %v4526_v0, %v6616_v33  ;;  %v3382_v34 = vmax.f32 %v3292_v61, 0.0 }
 0x6fe   : > { %v3294_v53 = vpop.f32.mrf.mxu0 }
 0x6ff   : > { %v3295_v11 = vadd.f32 %v6616_v33, %v3294_v53  ;;  %v3385_v2 = vmax.f32 %v3303_v50, 0.0 }
 0x701   : > { %v3383_v1 = vmax.f32 %v3295_v11, 0.0  ;;  %v3409_v46 = vpack.c.bf16 %v3385_v2, %v3384_v39 }
 0x703   : > { %v3408_v17 = vpack.c.bf16 %v3383_v1, %v3382_v34 }
 0x705   : > { %4571 = vmatprep.mubr.bf16.mxu1 %v3408_v17 }
 0x706   : > { %4572 = vmatmul.mubr.bf16.gmra.mxu1 %v3409_v46 }
 0x71e   : > { %v4529_v16 = vpop.f32.mrf.mxu0 }
 0x71f   : > { %v3316_v12 = vadd.f32 %v4529_v16, %v6616_v33 }
 0x720   : > { %v3307_v20 = vpop.f32.mrf.mxu0 }
 0x721   : > { %v3308_v36 = vadd.f32 %v6616_v33, %v3307_v20  ;;  %v3388_v24 = vmax.f32 %v3316_v12, 0.0 }
 0x722   : > { %v4530_v5 = vpop.f32.mrf.mxu0 }
 0x723   : > { %v3319_v29 = vadd.f32 %v4530_v5, %v6616_v33  ;;  %v3386_v61 = vmax.f32 %v3308_v36, 0.0 }
 0x724   : > { %v3310_v37 = vpop.f32.mrf.mxu0 }
 0x725   : > { %v3311_v0 = vadd.f32 %v6616_v33, %v3310_v37  ;;  %v3389_v50 = vmax.f32 %v3319_v29, 0.0 }
 0x727   : > { %v3387_v53 = vmax.f32 %v3311_v0, 0.0  ;;  %v3411_v2 = vpack.c.bf16 %v3389_v50, %v3388_v24 }
 0x729   : > { %v3410_v11 = vpack.c.bf16 %v3387_v53, %v3386_v61 }
 0x72b   : > { %4575 = vmatprep.mubr.bf16.mxu1 %v3410_v11 }
 0x72c   : > { %4576 = vmatmul.mubr.bf16.gmra.mxu1 %v3411_v2 }
 0x744   : > { %v4533_v34 = vpop.f32.mrf.mxu0 }
 0x745   : > { %v3332_v16 = vadd.f32 %v4533_v34, %v6616_v33 }
 0x746   : > { %v3323_v1 = vpop.f32.mrf.mxu0 }
 0x747   : > { %v3324_v17 = vadd.f32 %v6616_v33, %v3323_v1  ;;  %v3392_v12 = vmax.f32 %v3332_v16, 0.0 }
 0x748   : > { %v4534_v39 = vpop.f32.mrf.mxu0 }
 0x749   : > { %v3335_v46 = vadd.f32 %v4534_v39, %v6616_v33  ;;  %v3390_v36 = vmax.f32 %v3324_v17, 0.0 }
 0x74a   : > { %v3326_v20 = vpop.f32.mrf.mxu0 }
 0x74b   : > { %v3327_v5 = vadd.f32 %v6616_v33, %v3326_v20  ;;  %v3393_v29 = vmax.f32 %v3335_v46, 0.0 }
 0x74d   : > { %v3391_v37 = vmax.f32 %v3327_v5, 0.0  ;;  %v3413_v50 = vpack.c.bf16 %v3393_v29, %v3392_v12 }
 0x74f   : > { %v3412_v0 = vpack.c.bf16 %v3391_v37, %v3390_v36 }
 0x751   : > { %4579 = vmatprep.mubr.bf16.mxu1 %v3412_v0  ;;  %v6653_v0 = vld [vmem:[%s6906_s7 + $0x5] ss:$0 sm:$0xff] }
 0x752   : > { %4580 = vmatmul.mubr.bf16.gmra.mxu1 %v3413_v50  ;;  %v6655_v50 = vstv %s4154_s18 }
 0x753   : > { %v3657_v40 = vmul.f32 %v6655_v50, %v3091_v8  ;;  %v3655_v52 = vmul.f32 %v6655_v50, %v3089_v35  ;;  %v3660_v62 = vmul.f32 %v6655_v50, %v3094_v58  ;;  %v3661_v4 = vmul.f32 %v6655_v50, %v3095_v42 }
 0x754   : > { %v3664_v13 = vmul.f32 %v6655_v50, %v3098_v26  ;;  %v3665_v3 = vmul.f32 %v6655_v50, %v3099_v14 }
 0x76a   : > { %v4537_v61 = vpop.f32.mrf.mxu0 }
 0x76b   : > { %v3348_v34 = vadd.f32 %v4537_v61, %v6616_v33 }
 0x76c   : > { %v3339_v53 = vpop.f32.mrf.mxu0 }
 0x76d   : > { %v3340_v11 = vadd.f32 %v6616_v33, %v3339_v53  ;;  %v3396_v16 = vmax.f32 %v3348_v34, 0.0 }
 0x76e   : > { %v4538_v24 = vpop.f32.mrf.mxu0 }
 0x76f   : > { %v3351_v2 = vadd.f32 %v4538_v24, %v6616_v33  ;;  %v3394_v17 = vmax.f32 %v3340_v11, 0.0 }
 0x770   : > { %v3342_v1 = vpop.f32.mrf.mxu0 }
 0x771   : > { %v3343_v39 = vadd.f32 %v6616_v33, %v3342_v1  ;;  %v3397_v46 = vmax.f32 %v3351_v2, 0.0 }
 0x773   : > { %v3395_v20 = vmax.f32 %v3343_v39, 0.0  ;;  %v3415_v29 = vpack.c.bf16 %v3397_v46, %v3396_v16  ;;  %v3656_v39 = vmul.f32 %v6655_v50, %v3090_v56 }
 0x775   : > { %v3414_v5 = vpack.c.bf16 %v3395_v20, %v3394_v17  ;;  %v3654_v20 = vmul.f32 %v6655_v50, %v3088_v45 }
 0x777   : > { %4583 = vmatprep.mubr.bf16.mxu1 %v3414_v5 }
 0x778   : > { %4584 = vmatmul.mubr.bf16.gmra.mxu1 %v3415_v29 }
 0x790   : > { %v4541_v36 = vpop.f32.mrf.mxu0 }
 0x791   : > { %v3364_v24 = vadd.f32 %v4541_v36, %v6616_v33 }
 0x792   : > { %v3355_v37 = vpop.f32.mrf.mxu0 }
 0x793   : > { %v3356_v61 = vadd.f32 %v6616_v33, %v3355_v37  ;;  %v3400_v32 = vmax.f32 %v3364_v24, 0.0 }
 0x794   : > { %v4542_v12 = vpop.f32.mrf.mxu0 }
 0x795   : > { %v3367_v53 = vadd.f32 %v4542_v12, %v6616_v33  ;;  %v3398_v16 = vmax.f32 %v3356_v61, 0.0 }
 0x796   : > { %v3358_v11 = vpop.f32.mrf.mxu0  ;;  %v4561_v2 = vpop.f32.mrf.mxu1 }
 0x797   : > { %v3359_v34 = vadd.f32 %v6616_v33, %v3358_v11  ;;  %v3534_v1 = vadd.f32 %v4561_v2, %v6653_v0  ;;  %v3401_v46 = vmax.f32 %v3367_v53, 0.0 }
 0x798   : > { %v3525_v17 = vpop.f32.mrf.mxu1 }
 0x799   : > { %v3399_v5 = vmax.f32 %v3359_v34, 0.0  ;;  %v3688_v29 = vadd.f32 %v3656_v39, %v3534_v1  ;;  %v3526_v36 = vadd.f32 %v6653_v0, %v3525_v17  ;;  %v3417_v61 = vpack.c.bf16 %v3401_v46, %v3400_v32 }
 0x79a   : > { %v4562_v56 = vpop.f32.mrf.mxu1 }
 0x79b   : > { %v3416_v45 = vpack.c.bf16 %v3399_v5, %v3398_v16  ;;  %v3720_v33 = vmax.f32 %v3688_v29, 0.0  ;;  %v3686_v37 = vadd.f32 %v3654_v20, %v3526_v36  ;;  %v3537_v12 = vadd.f32 %v4562_v56, %v6653_v0 }
 0x79c   : > { %v3528_v53 = vpop.f32.mrf.mxu1  ;;  %v3658_v36 = vmul.f32 %v6655_v50, %v3092_v18  ;;  %v3659_v18 = vmul.f32 %v6655_v50, %v3093_v21 }
 0x79d   : > { %3753 = vst.msk [vmem:[%s6674_s15 + $0x10] sm:$0xff] %vm3750_vm0, %v3720_v33  ;;  %v3718_v11 = vmax.f32 %v3686_v37, 0.0  ;;  %v3689_v24 = vadd.f32 %v3657_v40, %v3537_v12  ;;  %v3529_v2 = vadd.f32 %v6653_v0, %v3528_v53  ;;  %4587 = vmatprep.mubr.bf16.mxu1 %v3416_v45 }
 0x79e   : > { %4588 = vmatmul.mubr.bf16.gmra.mxu1 %v3417_v61 }
 0x79f   : > { %3751 = vst.msk [vmem:[%s6674_s15] sm:$0xff] %vm3750_vm0, %v3718_v11  ;;  %v3721_v8 = vmax.f32 %v3689_v24, 0.0  ;;  %v3687_v34 = vadd.f32 %v3655_v52, %v3529_v2 }
 0x7a1   : > { %3754 = vst.msk [vmem:[%s6674_s15 + $0x18] sm:$0xff] %vm3750_vm0, %v3721_v8  ;;  %v3719_v1 = vmax.f32 %v3687_v34, 0.0 }
 0x7a3   : > { %3752 = vst.msk [vmem:[%s6674_s15 + $0x8] sm:$0xff] %vm3750_vm0, %v3719_v1  ;;  %v3783_v39 = vadd.f32 %v3719_v1, %v3718_v11  ;;  %v3662_v1 = vmul.f32 %v6655_v50, %v3096_v43  ;;  %v3663_v43 = vmul.f32 %v6655_v50, %v3097_v41  ;;  %v3668_v41 = vmul.f32 %v6655_v50, %v6990_v22 }
 0x7a5   : > { %v3784_v46 = vadd.f32 %v3783_v39, %v3720_v33 }
 0x7a6   : > { %v4565_v17 = vpop.f32.mrf.mxu1 }
 0x7a7   : > { %v3550_v20 = vadd.f32 %v4565_v17, %v6653_v0  ;;  %v3785_v35 = vadd.f32 %v3784_v46, %v3721_v8 }
 0x7a8   : > { %v3541_v16 = vpop.f32.mrf.mxu1 }
 0x7a9   : > { %v3692_v5 = vadd.f32 %v3660_v62, %v3550_v20  ;;  %v3542_v29 = vadd.f32 %v6653_v0, %v3541_v16 }
 0x7aa   : > { %v4566_v32 = vpop.f32.mrf.mxu1 }
 0x7ab   : > { %v3724_v56 = vmax.f32 %v3692_v5, 0.0  ;;  %v3690_v40 = vadd.f32 %v3658_v36, %v3542_v29  ;;  %v3553_v45 = vadd.f32 %v4566_v32, %v6653_v0 }
 0x7ac   : > { %v3544_v58 = vpop.f32.mrf.mxu1 }
 0x7ad   : > { %3757 = vst.msk [vmem:[%s6674_s15 + $0x30] sm:$0xff] %vm3750_vm0, %v3724_v56  ;;  %v3722_v33 = vmax.f32 %v3690_v40, 0.0  ;;  %v3693_v37 = vadd.f32 %v3661_v4, %v3553_v45  ;;  %v3545_v47 = vadd.f32 %v6653_v0, %v3544_v58 }
 0x7af   : > { %3755 = vst.msk [vmem:[%s6674_s15 + $0x20] sm:$0xff] %vm3750_vm0, %v3722_v33  ;;  %v3786_v12 = vadd.f32 %v3785_v35, %v3722_v33  ;;  %v3725_v61 = vmax.f32 %v3693_v37, 0.0  ;;  %v3691_v53 = vadd.f32 %v3659_v18, %v3545_v47  ;;  %v6991_v33 = vmax.f32 %v6439_v25, 0.0 }
 0x7b1   : > { %3758 = vst.msk [vmem:[%s6674_s15 + $0x38] sm:$0xff] %vm3750_vm0, %v3725_v61  ;;  %v3723_v10 = vmax.f32 %v3691_v53, 0.0  ;;  %v3666_v37 = vmul.f32 %v6655_v50, %v6991_v33  ;;  %v3669_v53 = vmul.f32 %v6655_v50, %v6992_v27  ;;  %v6999_v27 = vmax.f32 %v6526_v7, 0.0 }
 0x7b3   : > { %3756 = vst.msk [vmem:[%s6674_s15 + $0x28] sm:$0xff] %vm3750_vm0, %v3723_v10  ;;  %v3787_v42 = vadd.f32 %v3786_v12, %v3723_v10 }
 0x7b5   : > { %v3788_v11 = vadd.f32 %v3787_v42, %v3724_v56 }
 0x7b6   : > { %v4569_v24 = vpop.f32.mrf.mxu1 }
 0x7b7   : > { %v3566_v2 = vadd.f32 %v4569_v24, %v6653_v0  ;;  %v3789_v21 = vadd.f32 %v3788_v11, %v3725_v61  ;;  %v6993_v24 = vmax.f32 %v6446_v57, 0.0  ;;  %v6994_v57 = vmax.f32 %v6486_v28, 0.0 }
 0x7b8   : > { %v3557_v52 = vpop.f32.mrf.mxu1  ;;  %v6996_v28 = vmax.f32 %v6492_v44, 0.0 }
 0x7b9   : > { %v3696_v8 = vadd.f32 %v3664_v13, %v3566_v2  ;;  %v3558_v34 = vadd.f32 %v6653_v0, %v3557_v52  ;;  %v3667_v2 = vmul.f32 %v6655_v50, %v6993_v24 }
 0x7ba   : > { %v4570_v39 = vpop.f32.mrf.mxu1 }
 0x7bb   : > { %v3728_v46 = vmax.f32 %v3696_v8, 0.0  ;;  %v3694_v17 = vadd.f32 %v3662_v1, %v3558_v34  ;;  %v3569_v20 = vadd.f32 %v4570_v39, %v6653_v0 }
 0x7bc   : > { %v3560_v26 = vpop.f32.mrf.mxu1 }
 0x7bd   : > { %3761 = vst.msk [vmem:[%s6674_s15 + $0x50] sm:$0xff] %vm3750_vm0, %v3728_v46  ;;  %v3726_v62 = vmax.f32 %v3694_v17, 0.0  ;;  %v3697_v35 = vadd.f32 %v3665_v3, %v3569_v20  ;;  %v3561_v19 = vadd.f32 %v6653_v0, %v3560_v26  ;;  %v3672_v17 = vmul.f32 %v6655_v50, %v6994_v57 }
 0x7bf   : > { %3759 = vst.msk [vmem:[%s6674_s15 + $0x40] sm:$0xff] %vm3750_vm0, %v3726_v62  ;;  %v3790_v16 = vadd.f32 %v3789_v21, %v3726_v62  ;;  %v3729_v5 = vmax.f32 %v3697_v35, 0.0  ;;  %v3695_v29 = vadd.f32 %v3663_v43, %v3561_v19  ;;  %v6995_v62 = vmax.f32 %v6490_v63, 0.0 }
 0x7c1   : > { %3762 = vst.msk [vmem:[%s6674_s15 + $0x58] sm:$0xff] %vm3750_vm0, %v3729_v5  ;;  %v3727_v49 = vmax.f32 %v3695_v29, 0.0  ;;  %v3670_v35 = vmul.f32 %v6655_v50, %v6995_v62  ;;  %v3673_v29 = vmul.f32 %v6655_v50, %v6996_v28 }
 0x7c3   : > { %3760 = vst.msk [vmem:[%s6674_s15 + $0x48] sm:$0xff] %vm3750_vm0, %v3727_v49  ;;  %v3791_v14 = vadd.f32 %v3790_v16, %v3727_v49 }
 0x7c5   : > { %v3792_v36 = vadd.f32 %v3791_v14, %v3728_v46 }
 0x7c6   : > { %v4573_v32 = vpop.f32.mrf.mxu1 }
 0x7c7   : > { %v3582_v56 = vadd.f32 %v4573_v32, %v6653_v0  ;;  %v3793_v40 = vadd.f32 %v3792_v36, %v3729_v5  ;;  %v6997_v32 = vmax.f32 %v6497_v31, 0.0  ;;  %v6998_v31 = vmax.f32 %v6522_v51, 0.0 }
 0x7c8   : > { %v3573_v45 = vpop.f32.mrf.mxu1  ;;  %v7000_v51 = vmax.f32 %v6528_v54, 0.0 }
 0x7c9   : > { %v3700_v4 = vadd.f32 %v3668_v41, %v3582_v56  ;;  %v3574_v58 = vadd.f32 %v6653_v0, %v3573_v45  ;;  %v3671_v56 = vmul.f32 %v6655_v50, %v6997_v32  ;;  %v7005_v32 = vmax.f32 %v6569_v60, 0.0 }
 0x7ca   : > { %v4574_v47 = vpop.f32.mrf.mxu1  ;;  %v3677_v24 = vmul.f32 %v6655_v50, %v7000_v51  ;;  %v7006_v60 = vmax.f32 %v6594_v38, 0.0  ;;  %v7008_v38 = vmax.f32 %v6600_v6, 0.0 }
 0x7cb   : > { %v3732_v18 = vmax.f32 %v3700_v4, 0.0  ;;  %v3698_v12 = vadd.f32 %v3666_v37, %v3574_v58  ;;  %v3585_v61 = vadd.f32 %v4574_v47, %v6653_v0  ;;  %v3676_v47 = vmul.f32 %v6655_v50, %v6998_v31 }
 0x7cc   : > { %v3576_v10 = vpop.f32.mrf.mxu1 }
 0x7cd   : > { %3765 = vst.msk [vmem:[%s6674_s15 + $0x70] sm:$0xff] %vm3750_vm0, %v3732_v18  ;;  %v3730_v42 = vmax.f32 %v3698_v12, 0.0  ;;  %v3701_v11 = vadd.f32 %v3669_v53, %v3585_v61  ;;  %v3577_v25 = vadd.f32 %v6653_v0, %v3576_v10  ;;  %v3674_v53 = vmul.f32 %v6655_v50, %v6999_v27 }
 0x7cf   : > { %3763 = vst.msk [vmem:[%s6674_s15 + $0x60] sm:$0xff] %vm3750_vm0, %v3730_v42  ;;  %v3794_v13 = vadd.f32 %v3793_v40, %v3730_v42  ;;  %v3733_v21 = vmax.f32 %v3701_v11, 0.0  ;;  %v3699_v52 = vadd.f32 %v3667_v2, %v3577_v25 }
 0x7d1   : > { %3766 = vst.msk [vmem:[%s6674_s15 + $0x78] sm:$0xff] %vm3750_vm0, %v3733_v21  ;;  %v3731_v15 = vmax.f32 %v3699_v52, 0.0  ;;  %v7001_v52 = vmax.f32 %v6533_v48, 0.0  ;;  %v7002_v48 = vmax.f32 %v6558_v59, 0.0  ;;  %v7004_v59 = vmax.f32 %v6564_v9, 0.0 }
 0x7d3   : > { %3764 = vst.msk [vmem:[%s6674_s15 + $0x68] sm:$0xff] %vm3750_vm0, %v3731_v15  ;;  %v3795_v8 = vadd.f32 %v3794_v13, %v3731_v15  ;;  %v3675_v15 = vmul.f32 %v6655_v50, %v7001_v52 }
 0x7d5   : > { %v3796_v34 = vadd.f32 %v3795_v8, %v3732_v18 }
 0x7d7   : > { %v3797_v1 = vadd.f32 %v3796_v34, %v3733_v21 }
 0x7ec   : > { %v4577_v39 = vpop.f32.mrf.mxu1 }
 0x7ed   : > { %v3598_v46 = vadd.f32 %v4577_v39, %v6653_v0 }
 0x7ee   : > { %v3589_v20 = vpop.f32.mrf.mxu1 }
 0x7ef   : > { %v3704_v3 = vadd.f32 %v3672_v17, %v3598_v46  ;;  %v3590_v26 = vadd.f32 %v6653_v0, %v3589_v20 }
 0x7f0   : > { %v4578_v19 = vpop.f32.mrf.mxu1 }
 0x7f1   : > { %v3736_v43 = vmax.f32 %v3704_v3, 0.0  ;;  %v3702_v16 = vadd.f32 %v3670_v35, %v3590_v26  ;;  %v3601_v5 = vadd.f32 %v4578_v19, %v6653_v0  ;;  %v3680_v3 = vmul.f32 %v6655_v50, %v7002_v48 }
 0x7f2   : > { %v3592_v49 = vpop.f32.mrf.mxu1  ;;  %v7003_v19 = vmax.f32 %v6562_v55, 0.0 }
 0x7f3   : > { %3769 = vst.msk [vmem:[%s6674_s15 + $0x90] sm:$0xff] %vm3750_vm0, %v3736_v43  ;;  %v3734_v14 = vmax.f32 %v3702_v16, 0.0  ;;  %v3705_v36 = vadd.f32 %v3673_v29, %v3601_v5  ;;  %v3593_v63 = vadd.f32 %v6653_v0, %v3592_v49  ;;  %v3681_v49 = vmul.f32 %v6655_v50, %v7004_v59 }
 0x7f5   : > { %3767 = vst.msk [vmem:[%s6674_s15 + $0x80] sm:$0xff] %vm3750_vm0, %v3734_v14  ;;  %v3798_v22 = vadd.f32 %v3797_v1, %v3734_v14  ;;  %v3737_v41 = vmax.f32 %v3705_v36, 0.0  ;;  %v3703_v40 = vadd.f32 %v3671_v56, %v3593_v63  ;;  %v3679_v56 = vmul.f32 %v6655_v50, %v7005_v32 }
 0x7f7   : > { %3770 = vst.msk [vmem:[%s6674_s15 + $0x98] sm:$0xff] %vm3750_vm0, %v3737_v41  ;;  %v3735_v44 = vmax.f32 %v3703_v40, 0.0 }
 0x7f9   : > { %3768 = vst.msk [vmem:[%s6674_s15 + $0x88] sm:$0xff] %vm3750_vm0, %v3735_v44  ;;  %v3799_v45 = vadd.f32 %v3798_v22, %v3735_v44 }
 0x7fb   : > { %v3800_v4 = vadd.f32 %v3799_v45, %v3736_v43  ;;  %v3678_v43 = vmul.f32 %v6655_v50, %v7003_v19 }
 0x7fd   : > { %v3801_v58 = vadd.f32 %v3800_v4, %v3737_v41 }
 0x812   : > { %v4581_v33 = vpop.f32.mrf.mxu1 }
 0x813   : > { %v3614_v37 = vadd.f32 %v4581_v33, %v6653_v0 }
 0x814   : > { %v3605_v18 = vpop.f32.mrf.mxu1 }
 0x815   : > { %v3708_v12 = vadd.f32 %v3676_v47, %v3614_v37  ;;  %v3606_v61 = vadd.f32 %v6653_v0, %v3605_v18  ;;  %v3684_v37 = vmul.f32 %v6655_v50, %v7006_v60 }
 0x816   : > { %v4582_v10 = vpop.f32.mrf.mxu1 }
 0x817   : > { %v3740_v42 = vmax.f32 %v3708_v12, 0.0  ;;  %v3706_v11 = vadd.f32 %v3674_v53, %v3606_v61  ;;  %v3617_v25 = vadd.f32 %v4582_v10, %v6653_v0  ;;  %v7007_v12 = vmax.f32 %v6598_v30, 0.0 }
 0x818   : > { %v3608_v2 = vpop.f32.mrf.mxu1 }
 0x819   : > { %3773 = vst.msk [vmem:[%s6674_s15 + $0xb0] sm:$0xff] %vm3750_vm0, %v3740_v42  ;;  %v3738_v13 = vmax.f32 %v3706_v11, 0.0  ;;  %v3709_v21 = vadd.f32 %v3677_v24, %v3617_v25  ;;  %v3609_v7 = vadd.f32 %v6653_v0, %v3608_v2  ;;  %v3682_v61 = vmul.f32 %v6655_v50, %v7007_v12 }
 0x81a   : > { %v3685_v11 = vmul.f32 %v6655_v50, %v7008_v38  ;;  %v7009_v2 = vmax.f32 %v6605_v23, 0.0 }
 0x81b   : > { %3771 = vst.msk [vmem:[%s6674_s15 + $0xa0] sm:$0xff] %vm3750_vm0, %v3738_v13  ;;  %v3802_v8 = vadd.f32 %v3801_v58, %v3738_v13  ;;  %v3741_v34 = vmax.f32 %v3709_v21, 0.0  ;;  %v3707_v1 = vadd.f32 %v3675_v15, %v3609_v7 }
 0x81c   : > { %v3683_v13 = vmul.f32 %v6655_v50, %v7009_v2 }
 0x81d   : > { %3774 = vst.msk [vmem:[%s6674_s15 + $0xb8] sm:$0xff] %vm3750_vm0, %v3741_v34  ;;  %v3739_v54 = vmax.f32 %v3707_v1, 0.0 }
 0x81f   : > { %3772 = vst.msk [vmem:[%s6674_s15 + $0xa8] sm:$0xff] %vm3750_vm0, %v3739_v54  ;;  %v3803_v39 = vadd.f32 %v3802_v8, %v3739_v54 }
 0x821   : > { %v3804_v46 = vadd.f32 %v3803_v39, %v3740_v42 }
 0x823   : > { %v3805_v57 = vadd.f32 %v3804_v46, %v3741_v34 }
 0x838   : > { %v4585_v17 = vpop.f32.mrf.mxu1 }
 0x839   : > { %v3630_v20 = vadd.f32 %v4585_v17, %v6653_v0 }
 0x83a   : > { %v3621_v26 = vpop.f32.mrf.mxu1 }
 0x83b   : > { %v3712_v62 = vadd.f32 %v3680_v3, %v3630_v20  ;;  %v3622_v35 = vadd.f32 %v6653_v0, %v3621_v26 }
 0x83c   : > { %v4586_v16 = vpop.f32.mrf.mxu1 }
 0x83d   : > { %v3744_v5 = vmax.f32 %v3712_v62, 0.0  ;;  %v3710_v28 = vadd.f32 %v3678_v43, %v3622_v35  ;;  %v3633_v29 = vadd.f32 %v4586_v16, %v6653_v0 }
 0x83e   : > { %v3624_v14 = vpop.f32.mrf.mxu1 }
 0x83f   : > { %3777 = vst.msk [vmem:[%s6674_s15 + $0xd0] sm:$0xff] %vm3750_vm0, %v3744_v5  ;;  %v3742_v36 = vmax.f32 %v3710_v28, 0.0  ;;  %v3713_v63 = vadd.f32 %v3681_v49, %v3633_v29  ;;  %v3625_v55 = vadd.f32 %v6653_v0, %v3624_v14 }
 0x841   : > { %3775 = vst.msk [vmem:[%s6674_s15 + $0xc0] sm:$0xff] %vm3750_vm0, %v3742_v36  ;;  %v3806_v22 = vadd.f32 %v3805_v57, %v3742_v36  ;;  %v3745_v41 = vmax.f32 %v3713_v63, 0.0  ;;  %v3711_v40 = vadd.f32 %v3679_v56, %v3625_v55 }
 0x843   : > { %3778 = vst.msk [vmem:[%s6674_s15 + $0xd8] sm:$0xff] %vm3750_vm0, %v3745_v41  ;;  %v3743_v9 = vmax.f32 %v3711_v40, 0.0 }
 0x845   : > { %3776 = vst.msk [vmem:[%s6674_s15 + $0xc8] sm:$0xff] %vm3750_vm0, %v3743_v9  ;;  %v3807_v44 = vadd.f32 %v3806_v22, %v3743_v9 }
 0x847   : > { %v3808_v45 = vadd.f32 %v3807_v44, %v3744_v5 }
 0x849   : > { %v3809_v4 = vadd.f32 %v3808_v45, %v3745_v41 }
 0x85e   : > { %v4589_v58 = vpop.f32.mrf.mxu1 }
 0x85f   : > { %v3646_v33 = vadd.f32 %v4589_v58, %v6653_v0 }
 0x860   : > { %v3637_v31 = vpop.f32.mrf.mxu1 }
 0x861   : > { %v3716_v47 = vadd.f32 %v3684_v37, %v3646_v33  ;;  %v3638_v18 = vadd.f32 %v6653_v0, %v3637_v31 }
 0x862   : > { %v4590_v27 = vpop.f32.mrf.mxu1 }
 0x863   : > { %v3748_v53 = vmax.f32 %v3716_v47, 0.0  ;;  %v3714_v10 = vadd.f32 %v3682_v61, %v3638_v18  ;;  %v3649_v42 = vadd.f32 %v4590_v27, %v6653_v0 }
 0x864   : > { %v3640_v25 = vpop.f32.mrf.mxu1 }
 0x865   : > { %3781 = vst.msk [vmem:[%s6674_s15 + $0xf0] sm:$0xff] %vm3750_vm0, %v3748_v53  ;;  %v3746_v51 = vmax.f32 %v3714_v10, 0.0  ;;  %v3717_v24 = vadd.f32 %v3685_v11, %v3649_v42  ;;  %v3641_v30 = vadd.f32 %v6653_v0, %v3640_v25 }
 0x867   : > { %3779 = vst.msk [vmem:[%s6674_s15 + $0xe0] sm:$0xff] %vm3750_vm0, %v3746_v51  ;;  %v3810_v21 = vadd.f32 %v3809_v4, %v3746_v51  ;;  %v3749_v7 = vmax.f32 %v3717_v24, 0.0  ;;  %v3715_v6 = vadd.f32 %v3683_v13, %v3641_v30 }
 0x869   : > { %3782 = vst.msk [vmem:[%s6674_s15 + $0xf8] sm:$0xff] %vm3750_vm0, %v3749_v7  ;;  %v3747_v52 = vmax.f32 %v3715_v6, 0.0 }
 0x86b   : > { %3780 = vst.msk [vmem:[%s6674_s15 + $0xe8] sm:$0xff] %vm3750_vm0, %v3747_v52  ;;  %v3811_v15 = vadd.f32 %v3810_v21, %v3747_v52  ;;  %s4956_s15 = smov [#allocation7]  }
 0x86c   : > { %s4867_s0 = sshll.u32 %s4956_s15, 4  ;;  %s4868_s0 = int_to_ptr.vmem [resolvable:$false] %s4867_s0 }
 0x86d   : > { %v3812_v8 = vadd.f32 %v3811_v15, %v3748_v53  ;;  %s4869_s12 = scalar_lea.vmem %s4868_s0, 256  ;;  %p4870_p1 = scmp.lt.s32.totalorder %s3848_s16, %s4868_s0 }
 0x86e   : > { %p4871_p6 = scmp.lt.s32.totalorder %s4869_s12, %s4863_s29 }
 0x86f   : > { %v3813_v34 = vadd.f32 %v3812_v8, %v3749_v7 }
 0x870   : > { %p4872_p7 = por %p4871_p6, %p4870_p1 }
 0x871   : > { %v3814_v0 = vrot.slane %v3813_v34, 4 }
 0x872   : > { %p4873_p9 = pnand %p4872_p7, %p4866_p13 }
 0x873   : > { %v3815_v23 = vadd.f32 %v3814_v0, %v3813_v34 }
 0x875   : > { %v3816_v50 = vrot.slane %v3815_v23, 2 }
 0x877   : > { %v3817_v1 = vadd.f32 %v3816_v50, %v3815_v23 }
 0x879   : > { %v3818_v54 = vrot.slane %v3817_v1, 1 }
 0x87b   : > { %v3819_v39 = vadd.f32 %v3818_v54, %v3817_v1 }
 0x87d   : > { %3820 = vst [vmem:[%s385_s28] sm:$0xff] %v3819_v39 }
 0x87e   : > { %4876 = shalt.err (!%p4873_p9)
}
 0x87f   : > { %s4877_s23 = scalar_lea.hbm %s3845_s25, 128  ;;  %s4881_s28 = scalar_lea.hbm %s6908_s9, 256 }
 0x880   : > { %p4878_p12 = scmp.ne.s32.totalorder %s3845_s25, %s4877_s23  ;;  %p4882_p3 = scmp.lt.s32.totalorder %s3845_s25, %s6908_s9 }
 0x881   : > { %p4883_p5 = scmp.lt.s32.totalorder %s4881_s28, %s4877_s23 }
 0x882   : > { %p4879_p0 = pnand %p4878_p12, %p7010_p10 }
 0x883   : > { %p4884_p4 = por %p4883_p5, %p4882_p3 }
 0x884   : > { %p4880_p2 = pneg %p4879_p0 }
 0x886   : > { %p4885_p8 = pnand %p4884_p4, %p4880_p2 }
 0x888   : > { %4888 = shalt.err (!%p4885_p8)
}
 0x889   : > { %4599 = dma.vmem_to_hbm [thread:$0]  (%p7010_p10), %s3848_s16, 128, %s3845_s25, %s3828_s26  }
 0x88a PF: > { %p4616_p11 = scmp.ge.s32.totalorder %s4947_s14, 2  ;;  %s3868_s0 = sand.u32 1, %s4927_s30  }
 0x88b   : > { %p7011_p13 = scmp.ne.s32.totalorder %s6959_s21, 0  ;;  %s3869_s29 = scalar_lea.sflag [#allocation4], %s3868_s0 }
 0x88d   : > { %p4609_p1 = pnand %p4616_p11, %p7011_p13 }
 0x88f   : > { %p4610_p6 = pneg %p4609_p1 }
 0x891   : > { %4922 = dma.done.wait (%p4610_p6), %s3869_s29, 128  }
 0x892   : > { %4924 = vsyncadd (%p4610_p6), %s3869_s29, 4294967168  ;;  %s25_s14 = sadd.s32 1, %s4947_s14   ;;  %s7012_s30 = smov %s4931_s10 }
 0x893   : > { %p22_p7 = scmp.ge.s32.totalorder %s25_s14, 4   ;;  %s7013_s10 = smov %s4935_s11 }
 0x894   : > { %s7014_s11 = smov %s5060_s22  ;;  %s7015_s12 = smov %s4943_s13 }
 0x895   : > { %s7016_s13 = smov %s7018_s17  ;;  %24 = sbr.rel (!%p22_p7) target bundleno = 8 (0x8), region = 121 }
 0x89a   :  { %3874 = vsyncpa [#allocation3], 1 }
 0x89b   :  { %3876 = vsyncpa [#allocation3 + $0x1], 1 }
 0x89c   :  { %3877 = vsyncpa [#allocation4], 1 }
 0x89d   :  { %3879 = vsyncpa [#allocation4 + $0x1], 1 }
 0x89e   :  { %3880 = vsyncpa [#allocation5], 1 }
 0x89f   :  { %3882 = vsyncpa [#allocation5 + $0x1], 1 }

</bundles_post_ra>
